<compile_context>
chip_gen: v7x
topology: tpu7x:2x2x1
jax: 0.10.0
libtpu: 0.0.40
codegen_flags: <defaults>
</compile_context>

<pallas_src>
import numpy as np
import jax
import jax.numpy as jnp
from jax import lax
from jax.experimental import pallas as pl
from jax.experimental.pallas import tpu as pltpu


GROWTH = 8
BLOCK_CONFIG = (2, 2, 2, 2)
INIT_FEATURES = 16
BN_SIZE = 4
NUM_CLASSES = 5
NEG = -1.0e30  # dominated by any post-ReLU activation; stands in for -inf pool padding


# ----------------------------- parameter preparation -----------------------------

def _bn_scale_shift(bn, eps=1e-5):
    inv = bn["gamma"] / jnp.sqrt(bn["var"] + eps)
    return inv, bn["beta"] - bn["mean"] * inv


def _banded_weights(w_conv, w_in, w_out, stride, col_offset, out_perm=None):
    """Fold the KW column taps of a conv into banded (w_in*Cin, w_out*Cout) matrices,
    one per row tap.  `col_offset` = conv padding, so the band itself implements the
    zero column-padding (invalid taps are masked to 0).  `out_perm` optionally permutes
    the output-column order (used by the stem so its maxpool is lane aligned)."""
    cout, cin, kh, kw = w_conv.shape
    wt = jnp.transpose(w_conv, (2, 3, 1, 0))                     # (KH, KW, Cin, Cout)
    p_idx = np.arange(w_in)[:, None]
    j_idx = np.arange(w_out)[None, :]
    dj = p_idx - stride * j_idx + col_offset                     # (w_in, w_out)
    valid = jnp.asarray((dj >= 0) & (dj < kw))
    djc = jnp.asarray(np.clip(dj, 0, kw - 1))
    bands = []
    for di in range(kh):
        g = wt[di][djc]                                          # (w_in, w_out, Cin, Cout)
        g = jnp.where(valid[:, :, None, None], g, 0.0)
        if out_perm is not None:
            g = g[:, out_perm]
        g = jnp.transpose(g, (0, 2, 1, 3))                       # (w_in, Cin, w_out, Cout)
        bands.append(g.reshape(w_in * cin, w_out * cout))
    return jnp.stack(bands, axis=0).astype(jnp.bfloat16)         # (KH, w_in*Cin, w_out*Cout)


def prepare_params(params, img_hw=32):
    """One-time: turn raw PyTorch-style params into kernel-ready arrays (BN folded,
    banded/block-diag weights, bf16 casts, tiled per-lane scale/shift vectors)."""
    prep = {}

    # ---- stem: conv0 (7x7/2, pad 3) fused with norm0+relu0+maxpool(3x3/2, pad 1) ----
    c0w = params["conv0"]                                        # (16, 3, 7, 7)
    cout0, cin0, kh0, _ = c0w.shape
    hc = (img_hw + 2 * 3 - kh0) // 2 + 1                         # conv output spatial (16)
    assert hc % 2 == 0
    perm = np.concatenate([np.arange(0, hc, 2), np.arange(1, hc, 2)])  # even cols | odd cols
    band = _banded_weights(c0w, img_hw, hc, 2, 3, out_perm=perm)  # (7, img_hw*3, hc*16)
    prep["stem_w"] = band.reshape(kh0 * img_hw * cin0, hc * cout0)
    s0, b0 = _bn_scale_shift(params["norm0"])
    prep["stem_s"] = jnp.tile(s0, hc).reshape(1, hc * cout0)
    prep["stem_b"] = jnp.tile(b0, hc).reshape(1, hc * cout0)

    # ---- dense blocks / transitions ----
    h = hc // 2                                                  # after maxpool (8)
    nf = INIT_FEATURES
    c2 = BN_SIZE * GROWTH
    blocks = []
    for bi, nl in enumerate(BLOCK_CONFIG):
        layers = []
        for li in range(nl):
            lp = params["blocks"][bi][li]
            cf = nf + li * GROWTH
            w = h
            s1, b1 = _bn_scale_shift(lp["norm1"])
            s2, b2 = _bn_scale_shift(lp["norm2"])
            w1 = jnp.transpose(lp["conv1"].reshape(c2, cf))      # (cf, c2)
            layers.append(dict(
                s1=jnp.tile(s1, w).reshape(1, w * cf),
                b1=jnp.tile(b1, w).reshape(1, w * cf),
                # block-diagonal 1x1 weight so the GEMM runs directly on the (h, w*cf) layout
                w1=jnp.kron(jnp.eye(w, dtype=w1.dtype), w1).astype(jnp.bfloat16),
                s2=jnp.tile(s2, w).reshape(1, w * c2),
                b2=jnp.tile(b2, w).reshape(1, w * c2),
                w2=_banded_weights(lp["conv2"], w, w, 1, 1),     # (3, w*c2, w*growth)
            ))
        blocks.append(layers)
        nf = nf + nl * GROWTH
        if bi != len(BLOCK_CONFIG) - 1:
            tp = params["trans%d" % (bi + 1)]
            st, bt = _bn_scale_shift(tp["norm"])
            cout_t = nf // 2
            wm = jnp.transpose(tp["conv"].reshape(cout_t, nf))   # (nf, cout_t)
            w_sp, wo = h, h // 2
            # fold the 2x2 avgpool (linear, applied after the 1x1 conv) into the weight
            sel = (np.arange(w_sp)[:, None] // 2 == np.arange(wo)[None, :]).astype(np.float32)
            wpool = 0.25 * jnp.kron(jnp.asarray(sel), wm)        # (w*nf, wo*cout_t)
            prep["trans%d" % (bi + 1)] = dict(
                s=jnp.tile(st, 2 * w_sp).reshape(1, 2 * w_sp * nf),
                b=jnp.tile(bt, 2 * w_sp).reshape(1, 2 * w_sp * nf),
                w=jnp.concatenate([wpool, wpool], axis=0).astype(jnp.bfloat16),
            )
            nf, h = cout_t, h // 2
    prep["blocks"] = blocks

    # ---- final: norm5 -> relu -> GAP -> classifier (GAP folded into classifier weight) ----
    s5, b5 = _bn_scale_shift(params["norm5"])
    hw = h * h
    prep["final_s"] = jnp.tile(s5, hw).reshape(1, hw * nf)
    prep["final_b"] = jnp.tile(b5, hw).reshape(1, hw * nf)
    wc = jnp.transpose(params["classifier"]["w"])                # (nf, classes)
    prep["final_w"] = (jnp.tile(wc, (hw, 1)) / float(hw)).astype(jnp.bfloat16)
    prep["final_bias"] = params["classifier"]["b"].reshape(1, -1)
    return prep


# ------------------------------ Pallas kernels ------------------------------

def stem_conv_bn_relu_maxpool(slab, w, s, b, *, hc, c0):
    """One kernel: 7x7/2 conv (single long-K MXU matmul on pre-gathered row-tap slabs)
    -> BN -> ReLU -> 3x3/2/pad-1 maxpool, all on data resident in VMEM.
    slab: (n, hc, K) with per-image row order [even conv rows | odd conv rows] and the
    banded weight emitting columns in [even cols | odd cols] order, so the pool is
    aligned max + pltpu.roll.  Output: (n, hc//2, (hc//2)*c0), lane dense (128)."""
    n, _, K = slab.shape
    NO = hc * c0
    hpool = hc // 2

    def kernel(sl_ref, w_ref, s_ref, b_ref, o_ref):
        y = jnp.dot(sl_ref[0].astype(jnp.bfloat16), w_ref[...],
                    preferred_element_type=jnp.float32)
        y = jnp.maximum(y * s_ref[...] + b_ref[...], 0.0)            # (hc, NO)
        half = NO // 2
        ye, yo = y[:, :half], y[:, half:]                            # even / odd spatial cols
        lane = lax.broadcasted_iota(jnp.int32, ye.shape, 1)
        yo_l = jnp.where(lane < c0, NEG, pltpu.roll(yo, c0, axis=1))  # odd col j-1 (pad -> NEG)
        cpool = jnp.maximum(jnp.maximum(ye, yo), yo_l)               # (hc, half)
        ce, co = cpool[:hpool], cpool[hpool:]                        # even / odd conv rows
        row = lax.broadcasted_iota(jnp.int32, ce.shape, 0)
        co_u = jnp.where(row == 0, NEG, pltpu.roll(co, 1, axis=0))   # odd row r-1 (pad -> NEG)
        o_ref[0] = jnp.maximum(jnp.maximum(ce, co), co_u)            # (hpool, hpool*c0)

    return pl.pallas_call(
        kernel,
        grid=(n,),
        in_specs=[
            pl.BlockSpec((1, hc, K), lambda i: (i, 0, 0)),
            pl.BlockSpec((K, NO), lambda i: (0, 0)),
            pl.BlockSpec((1, NO), lambda i: (0, 0)),
            pl.BlockSpec((1, NO), lambda i: (0, 0)),
        ],
        out_specs=pl.BlockSpec((1, hpool, hpool * c0), lambda i: (i, 0, 0)),
        out_shape=jax.ShapeDtypeStruct((n, hpool, hpool * c0), jnp.float32),
        compiler_params=pltpu.CompilerParams(dimension_semantics=("parallel",)),
    )(slab, w, s, b)


def dense_layer(feats, lp, *, h, w, cf):
    """One fused kernel per dense layer:
       BN1+ReLU -> 1x1 bottleneck GEMM (block-diag weight, stays in (h, w*C) layout)
       -> BN2+ReLU -> scatter into a zero-initialized row-padded VMEM scratch
       -> 3 banded row-tap MXU matmuls (the 3x3 conv; column padding folded into the band).
    feats: (n, h, w*cf) -> new channels (n, h, w*GROWTH)."""
    n = feats.shape[0]
    c2 = BN_SIZE * GROWTH
    K1, N1, NO = w * cf, w * c2, w * GROWTH

    def kernel(x_ref, s1_ref, b1_ref, w1_ref, s2_ref, b2_ref, w2_ref, o_ref, zbuf):
        a = jnp.maximum(x_ref[0] * s1_ref[...] + b1_ref[...], 0.0)      # (h, w*cf)
        y = jnp.dot(a.astype(jnp.bfloat16), w1_ref[...],
                    preferred_element_type=jnp.float32)                 # (h, w*c2)
        z = jnp.maximum(y * s2_ref[...] + b2_ref[...], 0.0)
        zbuf[...] = jnp.zeros_like(zbuf)                                # zero row padding
        zbuf[pl.ds(1, h), :] = z
        acc = jnp.dot(zbuf[pl.ds(0, h), :].astype(jnp.bfloat16), w2_ref[0],
                      preferred_element_type=jnp.float32)
        acc = acc + jnp.dot(zbuf[pl.ds(1, h), :].astype(jnp.bfloat16), w2_ref[1],
                            preferred_element_type=jnp.float32)
        acc = acc + jnp.dot(zbuf[pl.ds(2, h), :].astype(jnp.bfloat16), w2_ref[2],
                            preferred_element_type=jnp.float32)
        o_ref[0] = acc                                                  # (h, w*growth)

    return pl.pallas_call(
        kernel,
        grid=(n,),
        in_specs=[
            pl.BlockSpec((1, h, K1), lambda i: (i, 0, 0)),
            pl.BlockSpec((1, K1), lambda i: (0, 0)),
            pl.BlockSpec((1, K1), lambda i: (0, 0)),
            pl.BlockSpec((K1, N1), lambda i: (0, 0)),
            pl.BlockSpec((1, N1), lambda i: (0, 0)),
            pl.BlockSpec((1, N1), lambda i: (0, 0)),
            pl.BlockSpec((3, N1, NO), lambda i: (0, 0, 0)),
        ],
        out_specs=pl.BlockSpec((1, h, NO), lambda i: (i, 0, 0)),
        out_shape=jax.ShapeDtypeStruct((n, h, NO), jnp.float32),
        scratch_shapes=[pltpu.VMEM((h + 2, N1), jnp.float32)],
        compiler_params=pltpu.CompilerParams(dimension_semantics=("parallel",)),
    )(feats, lp["s1"], lp["b1"], lp["w1"], lp["s2"], lp["b2"], lp["w2"])


def transition(feats, tp, *, h, w, cf):
    """Transition = BN -> ReLU -> 1x1 conv -> 2x2/2 avgpool, fused into a SINGLE GEMM:
    the (linear) avgpool is folded into the block-diagonal weight; adjacent row pairs are
    merged onto lanes by a free reshape in the wrapper."""
    n = feats.shape[0]
    ho, wo, co = h // 2, w // 2, cf // 2
    K, NO = 2 * w * cf, wo * co
    x2 = feats.reshape(n, ho, K)                                     # free row-pair merge

    def kernel(x_ref, s_ref, b_ref, w_ref, o_ref):
        a = jnp.maximum(x_ref[0] * s_ref[...] + b_ref[...], 0.0)
        o_ref[0] = jnp.dot(a.astype(jnp.bfloat16), w_ref[...],
                           preferred_element_type=jnp.float32)

    return pl.pallas_call(
        kernel,
        grid=(n,),
        in_specs=[
            pl.BlockSpec((1, ho, K), lambda i: (i, 0, 0)),
            pl.BlockSpec((1, K), lambda i: (0, 0)),
            pl.BlockSpec((1, K), lambda i: (0, 0)),
            pl.BlockSpec((K, NO), lambda i: (0, 0)),
        ],
        out_specs=pl.BlockSpec((1, ho, NO), lambda i: (i, 0, 0)),
        out_shape=jax.ShapeDtypeStruct((n, ho, NO), jnp.float32),
        compiler_params=pltpu.CompilerParams(dimension_semantics=("parallel",)),
    )(x2, tp["s"], tp["b"], tp["w"])


def final_head(feats, prep):
    """norm5 -> ReLU -> global avg pool -> classifier Linear in one kernel
    (GAP is folded into the classifier weight; bias added in the epilogue)."""
    n, h, wcf = feats.shape
    x2 = feats.reshape(n, h * wcf)
    K = x2.shape[1]
    ncls = prep["final_w"].shape[1]

    def kernel(x_ref, s_ref, b_ref, w_ref, bias_ref, o_ref):
        a = jnp.maximum(x_ref[...] * s_ref[...] + b_ref[...], 0.0)
        o_ref[...] = jnp.dot(a.astype(jnp.bfloat16), w_ref[...],
                             preferred_element_type=jnp.float32) + bias_ref[...]

    return pl.pallas_call(
        kernel,
        grid=(1,),
        in_specs=[
            pl.BlockSpec((n, K), lambda i: (0, 0)),
            pl.BlockSpec((1, K), lambda i: (0, 0)),
            pl.BlockSpec((1, K), lambda i: (0, 0)),
            pl.BlockSpec((K, ncls), lambda i: (0, 0)),
            pl.BlockSpec((1, ncls), lambda i: (0, 0)),
        ],
        out_specs=pl.BlockSpec((n, ncls), lambda i: (0, 0)),
        out_shape=jax.ShapeDtypeStruct((n, ncls), jnp.float32),
    )(x2, prep["final_s"], prep["final_b"], prep["final_w"], prep["final_bias"])


# ------------------------------ parameters ------------------------------

def init_densenet_params(key):
    keys = iter(jax.random.split(key, 1024))

    def conv_w(cout, cin, k):
        return 0.1 * jax.random.normal(next(keys), (cout, cin, k, k), jnp.float32)

    def bn_p(c):
        return dict(
            gamma=jnp.ones((c,), jnp.float32)
            + 0.1 * jax.random.normal(next(keys), (c,), jnp.float32),
            beta=0.1 * jax.random.normal(next(keys), (c,), jnp.float32),
            mean=0.1 * jax.random.normal(next(keys), (c,), jnp.float32),
            var=jnp.ones((c,), jnp.float32)
            + 0.1 * jnp.abs(jax.random.normal(next(keys), (c,), jnp.float32)),
        )

    params = {}
    params["conv0"] = conv_w(INIT_FEATURES, 3, 7)
    params["norm0"] = bn_p(INIT_FEATURES)
    nf = INIT_FEATURES
    blocks = []
    for bi, nl in enumerate(BLOCK_CONFIG):
        layers = []
        for li in range(nl):
            cin = nf + li * GROWTH
            layers.append(dict(
                norm1=bn_p(cin),
                conv1=conv_w(BN_SIZE * GROWTH, cin, 1),
                norm2=bn_p(BN_SIZE * GROWTH),
                conv2=conv_w(GROWTH, BN_SIZE * GROWTH, 3),
            ))
        blocks.append(layers)
        nf = nf + nl * GROWTH
        if bi != len(BLOCK_CONFIG) - 1:
            params["trans%d" % (bi + 1)] = dict(norm=bn_p(nf), conv=conv_w(nf // 2, nf, 1))
            nf = nf // 2
    params["blocks"] = blocks
    params["norm5"] = bn_p(nf)
    # fresh_params(): the re-initialized classifier Linear(nf, NUM_CLASSES)
    params["classifier"] = dict(
        w=0.1 * jax.random.normal(next(keys), (NUM_CLASSES, nf), jnp.float32),
        b=0.1 * jax.random.normal(next(keys), (NUM_CLASSES,), jnp.float32),
    )
    return params


# ------------------------------ forward pass ------------------------------

def densenet_forward(prep, x_nchw):
    n, cin, img_hw, _ = x_nchw.shape
    x = jnp.transpose(x_nchw, (0, 2, 3, 1)).astype(jnp.float32)      # NHWC

    # ---- stem: gather 7 stride-2 row-tap slabs (concatenated along K), one kernel ----
    # TODO(synk): this strided row-tap gather still runs in XLA each forward (a handful
    #             of slices/concats); everything downstream reads ready-made slabs.
    kh, pad, stride = 7, 3, 2
    hc = (img_hw + 2 * pad - kh) // stride + 1
    xp = jnp.pad(x, ((0, 0), (pad, pad), (0, 0), (0, 0)))            # row padding only
    taps = [xp[:, di:di + stride * hc:stride].reshape(n, hc, img_hw * cin) for di in range(kh)]
    sl = jnp.concatenate(taps, axis=-1)                              # (n, hc, 7*img_hw*cin)
    slab = jnp.concatenate([sl[:, 0::2], sl[:, 1::2]], axis=1)       # even conv rows | odd rows
    feats = stem_conv_bn_relu_maxpool(slab, prep["stem_w"], prep["stem_s"], prep["stem_b"],
                                      hc=hc, c0=INIT_FEATURES)       # (n, h, h*16)

    # ---- dense blocks + transitions ----
    h = hc // 2
    nf = INIT_FEATURES
    for bi in range(len(BLOCK_CONFIG)):
        for li in range(BLOCK_CONFIG[bi]):
            cf = nf + li * GROWTH
            new = dense_layer(feats, prep["blocks"][bi][li], h=h, w=h, cf=cf)
            # TODO(synk): channel-interleaved concat stays in XLA (O(L^2) tiny copies);
            #             at real densenet121 depth write new channels into a preallocated
            #             aliased feature slab inside the layer kernel instead.
            feats = jnp.concatenate(
                [feats.reshape(n, h, h, cf), new.reshape(n, h, h, GROWTH)],
                axis=-1).reshape(n, h, h * (cf + GROWTH))
        nf = nf + BLOCK_CONFIG[bi] * GROWTH
        tkey = "trans%d" % (bi + 1)
        if tkey in prep:
            feats = transition(feats, prep[tkey], h=h, w=h, cf=nf)
            nf, h = nf // 2, h // 2

    # ---- norm5 -> relu -> GAP -> classifier ----
    # TODO(synk): at torchvision scale add R/wo tiling + per-generation vmem_limit_bytes
    #             (v7x has only 64 MiB VMEM); unnecessary at this KB-scale config.
    return final_head(feats, prep)


# ---------------------------------- main ----------------------------------

if __name__ == "__main__":
    root = jax.random.PRNGKey(0)
    k_params, k_x = jax.random.split(root)
    params = init_densenet_params(k_params)
    prep = prepare_params(params, img_hw=32)        # one-time, outside the hot path
    x = jax.random.normal(k_x, (2, 3, 32, 32), jnp.float32)   # NCHW, like PyTorch

    fwd = jax.jit(densenet_forward)
    logits = jax.block_until_ready(fwd(prep, x))
    assert logits.shape == (2, NUM_CLASSES)
    assert bool(jnp.all(jnp.isfinite(logits)))
    print("KERNEL_OK")
</pallas_src>

<mosaic_0001>
module attributes {stable_mosaic.version = 11 : i64} {
  func.func @kernel(%arg0: i32, %arg1: memref<1x16x672xf32, #tpu.memory_space<vmem>>, %arg2: memref<672x256xbf16, #tpu.memory_space<vmem>>, %arg3: memref<1x256xf32, #tpu.memory_space<vmem>>, %arg4: memref<1x256xf32, #tpu.memory_space<vmem>>, %arg5: memref<1x8x128xf32, #tpu.memory_space<vmem>>) attributes {dimension_semantics = [#tpu.dimension_semantics<parallel>], iteration_bounds = array<i64: 2>, scalar_prefetch = 0 : i64, scratch_operands = 0 : i64, tpu.core_type = #tpu.core_type<tc>, window_params = [{transform_indices = @transform_0, window_bounds = array<i64: 1, 16, 672>}, {pipeline_mode = #tpu.pipeline_mode<synchronous>, transform_indices = @transform_1, window_bounds = array<i64: 672, 256>}, {pipeline_mode = #tpu.pipeline_mode<synchronous>, transform_indices = @transform_2, window_bounds = array<i64: 1, 256>}, {pipeline_mode = #tpu.pipeline_mode<synchronous>, transform_indices = @transform_3, window_bounds = array<i64: 1, 256>}, {transform_indices = @transform_4, window_bounds = array<i64: 1, 8, 128>}]} {
    %c0 = arith.constant 0 : index
    %c0_0 = arith.constant 0 : index
    %c0_1 = arith.constant 0 : index
    %0 = vector.load %arg1[%c0, %c0_0, %c0_1] : memref<1x16x672xf32, #tpu.memory_space<vmem>>, vector<1x16x672xf32>
    %1 = vector.shape_cast %0 : vector<1x16x672xf32> to vector<16x672xf32>
    %2 = arith.truncf %1 : vector<16x672xf32> to vector<16x672xbf16>
    %c0_2 = arith.constant 0 : index
    %c0_3 = arith.constant 0 : index
    %3 = vector.load %arg2[%c0_2, %c0_3] : memref<672x256xbf16, #tpu.memory_space<vmem>>, vector<672x256xbf16>
    %cst = arith.constant dense<0.000000e+00> : vector<16x256xf32>
    %4 = tpu.matmul %2, %3, %cst {dimension_numbers = #tpu.dot_dimension_numbers<[1], [0], [0], [1], [0, 0, 1, 1], [], []>} : vector<16x672xbf16>, vector<672x256xbf16>, vector<16x256xf32> -> vector<16x256xf32>
    %c0_4 = arith.constant 0 : index
    %c0_5 = arith.constant 0 : index
    %5 = vector.load %arg3[%c0_4, %c0_5] : memref<1x256xf32, #tpu.memory_space<vmem>>, vector<1x256xf32>
    %6 = vector.broadcast %5 : vector<1x256xf32> to vector<16x256xf32>
    %7 = arith.mulf %4, %6 : vector<16x256xf32>
    %c0_6 = arith.constant 0 : index
    %c0_7 = arith.constant 0 : index
    %8 = vector.load %arg4[%c0_6, %c0_7] : memref<1x256xf32, #tpu.memory_space<vmem>>, vector<1x256xf32>
    %9 = vector.broadcast %8 : vector<1x256xf32> to vector<16x256xf32>
    %10 = arith.addf %7, %9 : vector<16x256xf32>
    %cst_8 = arith.constant 0.000000e+00 : f32
    %11 = vector.broadcast %cst_8 : f32 to vector<16x256xf32>
    %12 = arith.maximumf %10, %11 : vector<16x256xf32>
    %13 = vector.extract_strided_slice %12 {offsets = [0, 0], sizes = [16, 128], strides = [1, 1]} : vector<16x256xf32> to vector<16x128xf32>
    %14 = vector.extract_strided_slice %12 {offsets = [0, 128], sizes = [16, 128], strides = [1, 1]} : vector<16x256xf32> to vector<16x128xf32>
    %15 = tpu.iota {dimensions = array<i32: 1>} : vector<16x128xi32>
    %c16_i32 = arith.constant 16 : i32
    %16 = vector.broadcast %c16_i32 : i32 to vector<16x128xi32>
    %17 = arith.cmpi slt, %15, %16 : vector<16x128xi32>
    %c16_i32_9 = arith.constant 16 : i32
    %18 = tpu.dynamic_rotate %14 by %c16_i32_9 dim 1 : vector<16x128xf32>, i32 -> vector<16x128xf32>
    %cst_10 = arith.constant -1.000000e+30 : f32
    %19 = vector.broadcast %cst_10 : f32 to vector<16x128xf32>
    %20 = arith.select %17, %19, %18 : vector<16x128xi1>, vector<16x128xf32>
    %21 = arith.maximumf %13, %14 : vector<16x128xf32>
    %22 = arith.maximumf %21, %20 : vector<16x128xf32>
    %23 = vector.extract_strided_slice %22 {offsets = [0, 0], sizes = [8, 128], strides = [1, 1]} : vector<16x128xf32> to vector<8x128xf32>
    %24 = vector.extract_strided_slice %22 {offsets = [8, 0], sizes = [8, 128], strides = [1, 1]} : vector<16x128xf32> to vector<8x128xf32>
    %25 = tpu.iota {dimensions = array<i32: 0>} : vector<8x128xi32>
    %c0_i32 = arith.constant 0 : i32
    %26 = vector.broadcast %c0_i32 : i32 to vector<8x128xi32>
    %27 = arith.cmpi eq, %25, %26 : vector<8x128xi32>
    %c1_i32 = arith.constant 1 : i32
    %28 = tpu.dynamic_rotate %24 by %c1_i32 dim 0 : vector<8x128xf32>, i32 -> vector<8x128xf32>
    %cst_11 = arith.constant -1.000000e+30 : f32
    %29 = vector.broadcast %cst_11 : f32 to vector<8x128xf32>
    %30 = arith.select %27, %29, %28 : vector<8x128xi1>, vector<8x128xf32>
    %31 = arith.maximumf %23, %24 : vector<8x128xf32>
    %32 = arith.maximumf %31, %30 : vector<8x128xf32>
    %c0_12 = arith.constant 0 : index
    %c0_13 = arith.constant 0 : index
    %c0_14 = arith.constant 0 : index
    %33 = vector.load %arg5[%c0_12, %c0_13, %c0_14] : memref<1x8x128xf32, #tpu.memory_space<vmem>>, vector<1x8x128xf32>
    %34 = vector.shape_cast %33 : vector<1x8x128xf32> to vector<8x128xf32>
    %35 = vector.shape_cast %32 : vector<8x128xf32> to vector<1x8x128xf32>
    tpu.vector_store %arg5[%c0_12, %c0_13, %c0_14], %35 {strides = array<i32>} : memref<1x8x128xf32, #tpu.memory_space<vmem>>, vector<1x8x128xf32>,
    return
  }
  func.func @transform_0(%arg0: i32) -> (i32, i32, i32) {
    %c0_i32 = arith.constant 0 : i32
    %c0_i32_0 = arith.constant 0 : i32
    %c0_i32_1 = arith.constant 0 : i32
    return %arg0, %c0_i32, %c0_i32_0 : i32, i32, i32
  }
  func.func @transform_1(%arg0: i32) -> (i32, i32) {
    %c0_i32 = arith.constant 0 : i32
    %c0_i32_0 = arith.constant 0 : i32
    %c0_i32_1 = arith.constant 0 : i32
    return %c0_i32, %c0_i32_0 : i32, i32
  }
  func.func @transform_2(%arg0: i32) -> (i32, i32) {
    %c0_i32 = arith.constant 0 : i32
    %c0_i32_0 = arith.constant 0 : i32
    %c0_i32_1 = arith.constant 0 : i32
    return %c0_i32, %c0_i32_0 : i32, i32
  }
  func.func @transform_3(%arg0: i32) -> (i32, i32) {
    %c0_i32 = arith.constant 0 : i32
    %c0_i32_0 = arith.constant 0 : i32
    %c0_i32_1 = arith.constant 0 : i32
    return %c0_i32, %c0_i32_0 : i32, i32
  }
  func.func @transform_4(%arg0: i32) -> (i32, i32, i32) {
    %c0_i32 = arith.constant 0 : i32
    %c0_i32_0 = arith.constant 0 : i32
    %c0_i32_1 = arith.constant 0 : i32
    return %arg0, %c0_i32, %c0_i32_0 : i32, i32, i32
  }
}

module attributes {stable_mosaic.version = 11 : i64} {
  func.func @kernel(%arg0: i32, %arg1: memref<1x8x128xf32, #tpu.memory_space<vmem>>, %arg2: memref<1x128xf32, #tpu.memory_space<vmem>>, %arg3: memref<1x128xf32, #tpu.memory_space<vmem>>, %arg4: memref<128x256xbf16, #tpu.memory_space<vmem>>, %arg5: memref<1x256xf32, #tpu.memory_space<vmem>>, %arg6: memref<1x256xf32, #tpu.memory_space<vmem>>, %arg7: memref<3x256x64xbf16, #tpu.memory_space<vmem>>, %arg8: memref<1x8x64xf32, #tpu.memory_space<vmem>>, %arg9: memref<10x256xf32, #tpu.memory_space<vmem>>) attributes {dimension_semantics = [#tpu.dimension_semantics<parallel>], iteration_bounds = array<i64: 2>, scalar_prefetch = 0 : i64, scratch_operands = 1 : i64, tpu.core_type = #tpu.core_type<tc>, window_params = [{transform_indices = @transform_0, window_bounds = array<i64: 1, 8, 128>}, {pipeline_mode = #tpu.pipeline_mode<synchronous>, transform_indices = @transform_1, window_bounds = array<i64: 1, 128>}, {pipeline_mode = #tpu.pipeline_mode<synchronous>, transform_indices = @transform_2, window_bounds = array<i64: 1, 128>}, {pipeline_mode = #tpu.pipeline_mode<synchronous>, transform_indices = @transform_3, window_bounds = array<i64: 128, 256>}, {pipeline_mode = #tpu.pipeline_mode<synchronous>, transform_indices = @transform_4, window_bounds = array<i64: 1, 256>}, {pipeline_mode = #tpu.pipeline_mode<synchronous>, transform_indices = @transform_5, window_bounds = array<i64: 1, 256>}, {pipeline_mode = #tpu.pipeline_mode<synchronous>, transform_indices = @transform_6, window_bounds = array<i64: 3, 256, 64>}, {transform_indices = @transform_7, window_bounds = array<i64: 1, 8, 64>}]} {
    %c0 = arith.constant 0 : index
    %c0_0 = arith.constant 0 : index
    %c0_1 = arith.constant 0 : index
    %0 = vector.load %arg1[%c0, %c0_0, %c0_1] : memref<1x8x128xf32, #tpu.memory_space<vmem>>, vector<1x8x128xf32>
    %1 = vector.shape_cast %0 : vector<1x8x128xf32> to vector<8x128xf32>
    %c0_2 = arith.constant 0 : index
    %c0_3 = arith.constant 0 : index
    %2 = vector.load %arg2[%c0_2, %c0_3] : memref<1x128xf32, #tpu.memory_space<vmem>>, vector<1x128xf32>
    %3 = vector.broadcast %2 : vector<1x128xf32> to vector<8x128xf32>
    %4 = arith.mulf %1, %3 : vector<8x128xf32>
    %c0_4 = arith.constant 0 : index
    %c0_5 = arith.constant 0 : index
    %5 = vector.load %arg3[%c0_4, %c0_5] : memref<1x128xf32, #tpu.memory_space<vmem>>, vector<1x128xf32>
    %6 = vector.broadcast %5 : vector<1x128xf32> to vector<8x128xf32>
    %7 = arith.addf %4, %6 : vector<8x128xf32>
    %cst = arith.constant 0.000000e+00 : f32
    %8 = vector.broadcast %cst : f32 to vector<8x128xf32>
    %9 = arith.maximumf %7, %8 : vector<8x128xf32>
    %10 = arith.truncf %9 : vector<8x128xf32> to vector<8x128xbf16>
    %c0_6 = arith.constant 0 : index
    %c0_7 = arith.constant 0 : index
    %11 = vector.load %arg4[%c0_6, %c0_7] : memref<128x256xbf16, #tpu.memory_space<vmem>>, vector<128x256xbf16>
    %cst_8 = arith.constant dense<0.000000e+00> : vector<8x256xf32>
    %12 = tpu.matmul %10, %11, %cst_8 {dimension_numbers = #tpu.dot_dimension_numbers<[1], [0], [0], [1], [0, 0, 1, 1], [], []>} : vector<8x128xbf16>, vector<128x256xbf16>, vector<8x256xf32> -> vector<8x256xf32>
    %c0_9 = arith.constant 0 : index
    %c0_10 = arith.constant 0 : index
    %13 = vector.load %arg5[%c0_9, %c0_10] : memref<1x256xf32, #tpu.memory_space<vmem>>, vector<1x256xf32>
    %14 = vector.broadcast %13 : vector<1x256xf32> to vector<8x256xf32>
    %15 = arith.mulf %12, %14 : vector<8x256xf32>
    %c0_11 = arith.constant 0 : index
    %c0_12 = arith.constant 0 : index
    %16 = vector.load %arg6[%c0_11, %c0_12] : memref<1x256xf32, #tpu.memory_space<vmem>>, vector<1x256xf32>
    %17 = vector.broadcast %16 : vector<1x256xf32> to vector<8x256xf32>
    %18 = arith.addf %15, %17 : vector<8x256xf32>
    %cst_13 = arith.constant 0.000000e+00 : f32
    %19 = vector.broadcast %cst_13 : f32 to vector<8x256xf32>
    %20 = arith.maximumf %18, %19 : vector<8x256xf32>
    %cst_14 = arith.constant 0.000000e+00 : f32
    %21 = vector.broadcast %cst_14 : f32 to vector<10x256xf32>
    %c0_15 = arith.constant 0 : index
    %c0_16 = arith.constant 0 : index
    %22 = vector.load %arg9[%c0_15, %c0_16] : memref<10x256xf32, #tpu.memory_space<vmem>>, vector<10x256xf32>
    tpu.vector_store %arg9[%c0_15, %c0_16], %21 {strides = array<i32>} : memref<10x256xf32, #tpu.memory_space<vmem>>, vector<10x256xf32>,
    %c1 = arith.constant 1 : index
    %c0_17 = arith.constant 0 : index
    %23 = vector.load %arg9[%c1, %c0_17] : memref<10x256xf32, #tpu.memory_space<vmem>>, vector<8x256xf32>
    tpu.vector_store %arg9[%c1, %c0_17], %20 {strides = array<i32>} : memref<10x256xf32, #tpu.memory_space<vmem>>, vector<8x256xf32>,
    %c0_18 = arith.constant 0 : index
    %c0_19 = arith.constant 0 : index
    %24 = vector.load %arg9[%c0_18, %c0_19] : memref<10x256xf32, #tpu.memory_space<vmem>>, vector<8x256xf32>
    %25 = arith.truncf %24 : vector<8x256xf32> to vector<8x256xbf16>
    %c0_20 = arith.constant 0 : index
    %c0_21 = arith.constant 0 : index
    %c0_22 = arith.constant 0 : index
    %26 = vector.load %arg7[%c0_20, %c0_21, %c0_22] : memref<3x256x64xbf16, #tpu.memory_space<vmem>>, vector<1x256x64xbf16>
    %27 = vector.shape_cast %26 : vector<1x256x64xbf16> to vector<256x64xbf16>
    %cst_23 = arith.constant dense<0.000000e+00> : vector<8x64xf32>
    %28 = tpu.matmul %25, %27, %cst_23 {dimension_numbers = #tpu.dot_dimension_numbers<[1], [0], [0], [1], [0, 0, 1, 1], [], []>} : vector<8x256xbf16>, vector<256x64xbf16>, vector<8x64xf32> -> vector<8x64xf32>
    %c1_24 = arith.constant 1 : index
    %c0_25 = arith.constant 0 : index
    %29 = vector.load %arg9[%c1_24, %c0_25] : memref<10x256xf32, #tpu.memory_space<vmem>>, vector<8x256xf32>
    %30 = arith.truncf %29 : vector<8x256xf32> to vector<8x256xbf16>
    %c1_26 = arith.constant 1 : index
    %c0_27 = arith.constant 0 : index
    %c0_28 = arith.constant 0 : index
    %31 = vector.load %arg7[%c1_26, %c0_27, %c0_28] : memref<3x256x64xbf16, #tpu.memory_space<vmem>>, vector<1x256x64xbf16>
    %32 = vector.shape_cast %31 : vector<1x256x64xbf16> to vector<256x64xbf16>
    %cst_29 = arith.constant dense<0.000000e+00> : vector<8x64xf32>
    %33 = tpu.matmul %30, %32, %cst_29 {dimension_numbers = #tpu.dot_dimension_numbers<[1], [0], [0], [1], [0, 0, 1, 1], [], []>} : vector<8x256xbf16>, vector<256x64xbf16>, vector<8x64xf32> -> vector<8x64xf32>
    %34 = arith.addf %28, %33 : vector<8x64xf32>
    %c2 = arith.constant 2 : index
    %c0_30 = arith.constant 0 : index
    %35 = vector.load %arg9[%c2, %c0_30] : memref<10x256xf32, #tpu.memory_space<vmem>>, vector<8x256xf32>
    %36 = arith.truncf %35 : vector<8x256xf32> to vector<8x256xbf16>
    %c2_31 = arith.constant 2 : index
    %c0_32 = arith.constant 0 : index
    %c0_33 = arith.constant 0 : index
    %37 = vector.load %arg7[%c2_31, %c0_32, %c0_33] : memref<3x256x64xbf16, #tpu.memory_space<vmem>>, vector<1x256x64xbf16>
    %38 = vector.shape_cast %37 : vector<1x256x64xbf16> to vector<256x64xbf16>
    %cst_34 = arith.constant dense<0.000000e+00> : vector<8x64xf32>
    %39 = tpu.matmul %36, %38, %cst_34 {dimension_numbers = #tpu.dot_dimension_numbers<[1], [0], [0], [1], [0, 0, 1, 1], [], []>} : vector<8x256xbf16>, vector<256x64xbf16>, vector<8x64xf32> -> vector<8x64xf32>
    %40 = arith.addf %34, %39 : vector<8x64xf32>
    %c0_35 = arith.constant 0 : index
    %c0_36 = arith.constant 0 : index
    %c0_37 = arith.constant 0 : index
    %41 = vector.load %arg8[%c0_35, %c0_36, %c0_37] : memref<1x8x64xf32, #tpu.memory_space<vmem>>, vector<1x8x64xf32>
    %42 = vector.shape_cast %41 : vector<1x8x64xf32> to vector<8x64xf32>
    %43 = vector.shape_cast %40 : vector<8x64xf32> to vector<1x8x64xf32>
    tpu.vector_store %arg8[%c0_35, %c0_36, %c0_37], %43 {strides = array<i32>} : memref<1x8x64xf32, #tpu.memory_space<vmem>>, vector<1x8x64xf32>,
    return
  }
  func.func @transform_0(%arg0: i32) -> (i32, i32, i32) {
    %c0_i32 = arith.constant 0 : i32
    %c0_i32_0 = arith.constant 0 : i32
    %c0_i32_1 = arith.constant 0 : i32
    return %arg0, %c0_i32, %c0_i32_0 : i32, i32, i32
  }
  func.func @transform_1(%arg0: i32) -> (i32, i32) {
    %c0_i32 = arith.constant 0 : i32
    %c0_i32_0 = arith.constant 0 : i32
    %c0_i32_1 = arith.constant 0 : i32
    return %c0_i32, %c0_i32_0 : i32, i32
  }
  func.func @transform_2(%arg0: i32) -> (i32, i32) {
    %c0_i32 = arith.constant 0 : i32
    %c0_i32_0 = arith.constant 0 : i32
    %c0_i32_1 = arith.constant 0 : i32
    return %c0_i32, %c0_i32_0 : i32, i32
  }
  func.func @transform_3(%arg0: i32) -> (i32, i32) {
    %c0_i32 = arith.constant 0 : i32
    %c0_i32_0 = arith.constant 0 : i32
    %c0_i32_1 = arith.constant 0 : i32
    return %c0_i32, %c0_i32_0 : i32, i32
  }
  func.func @transform_4(%arg0: i32) -> (i32, i32) {
    %c0_i32 = arith.constant 0 : i32
    %c0_i32_0 = arith.constant 0 : i32
    %c0_i32_1 = arith.constant 0 : i32
    return %c0_i32, %c0_i32_0 : i32, i32
  }
  func.func @transform_5(%arg0: i32) -> (i32, i32) {
    %c0_i32 = arith.constant 0 : i32
    %c0_i32_0 = arith.constant 0 : i32
    %c0_i32_1 = arith.constant 0 : i32
    return %c0_i32, %c0_i32_0 : i32, i32
  }
  func.func @transform_6(%arg0: i32) -> (i32, i32, i32) {
    %c0_i32 = arith.constant 0 : i32
    %c0_i32_0 = arith.constant 0 : i32
    %c0_i32_1 = arith.constant 0 : i32
    %c0_i32_2 = arith.constant 0 : i32
    return %c0_i32, %c0_i32_0, %c0_i32_1 : i32, i32, i32
  }
  func.func @transform_7(%arg0: i32) -> (i32, i32, i32) {
    %c0_i32 = arith.constant 0 : i32
    %c0_i32_0 = arith.constant 0 : i32
    %c0_i32_1 = arith.constant 0 : i32
    return %arg0, %c0_i32, %c0_i32_0 : i32, i32, i32
  }
}

module attributes {stable_mosaic.version = 11 : i64} {
  func.func @kernel(%arg0: i32, %arg1: memref<1x8x192xf32, #tpu.memory_space<vmem>>, %arg2: memref<1x192xf32, #tpu.memory_space<vmem>>, %arg3: memref<1x192xf32, #tpu.memory_space<vmem>>, %arg4: memref<192x256xbf16, #tpu.memory_space<vmem>>, %arg5: memref<1x256xf32, #tpu.memory_space<vmem>>, %arg6: memref<1x256xf32, #tpu.memory_space<vmem>>, %arg7: memref<3x256x64xbf16, #tpu.memory_space<vmem>>, %arg8: memref<1x8x64xf32, #tpu.memory_space<vmem>>, %arg9: memref<10x256xf32, #tpu.memory_space<vmem>>) attributes {dimension_semantics = [#tpu.dimension_semantics<parallel>], iteration_bounds = array<i64: 2>, scalar_prefetch = 0 : i64, scratch_operands = 1 : i64, tpu.core_type = #tpu.core_type<tc>, window_params = [{transform_indices = @transform_0, window_bounds = array<i64: 1, 8, 192>}, {pipeline_mode = #tpu.pipeline_mode<synchronous>, transform_indices = @transform_1, window_bounds = array<i64: 1, 192>}, {pipeline_mode = #tpu.pipeline_mode<synchronous>, transform_indices = @transform_2, window_bounds = array<i64: 1, 192>}, {pipeline_mode = #tpu.pipeline_mode<synchronous>, transform_indices = @transform_3, window_bounds = array<i64: 192, 256>}, {pipeline_mode = #tpu.pipeline_mode<synchronous>, transform_indices = @transform_4, window_bounds = array<i64: 1, 256>}, {pipeline_mode = #tpu.pipeline_mode<synchronous>, transform_indices = @transform_5, window_bounds = array<i64: 1, 256>}, {pipeline_mode = #tpu.pipeline_mode<synchronous>, transform_indices = @transform_6, window_bounds = array<i64: 3, 256, 64>}, {transform_indices = @transform_7, window_bounds = array<i64: 1, 8, 64>}]} {
    %c0 = arith.constant 0 : index
    %c0_0 = arith.constant 0 : index
    %c0_1 = arith.constant 0 : index
    %0 = vector.load %arg1[%c0, %c0_0, %c0_1] : memref<1x8x192xf32, #tpu.memory_space<vmem>>, vector<1x8x192xf32>
    %1 = vector.shape_cast %0 : vector<1x8x192xf32> to vector<8x192xf32>
    %c0_2 = arith.constant 0 : index
    %c0_3 = arith.constant 0 : index
    %2 = vector.load %arg2[%c0_2, %c0_3] : memref<1x192xf32, #tpu.memory_space<vmem>>, vector<1x192xf32>
    %3 = vector.broadcast %2 : vector<1x192xf32> to vector<8x192xf32>
    %4 = arith.mulf %1, %3 : vector<8x192xf32>
    %c0_4 = arith.constant 0 : index
    %c0_5 = arith.constant 0 : index
    %5 = vector.load %arg3[%c0_4, %c0_5] : memref<1x192xf32, #tpu.memory_space<vmem>>, vector<1x192xf32>
    %6 = vector.broadcast %5 : vector<1x192xf32> to vector<8x192xf32>
    %7 = arith.addf %4, %6 : vector<8x192xf32>
    %cst = arith.constant 0.000000e+00 : f32
    %8 = vector.broadcast %cst : f32 to vector<8x192xf32>
    %9 = arith.maximumf %7, %8 : vector<8x192xf32>
    %10 = arith.truncf %9 : vector<8x192xf32> to vector<8x192xbf16>
    %c0_6 = arith.constant 0 : index
    %c0_7 = arith.constant 0 : index
    %11 = vector.load %arg4[%c0_6, %c0_7] : memref<192x256xbf16, #tpu.memory_space<vmem>>, vector<192x256xbf16>
    %cst_8 = arith.constant dense<0.000000e+00> : vector<8x256xf32>
    %12 = tpu.matmul %10, %11, %cst_8 {dimension_numbers = #tpu.dot_dimension_numbers<[1], [0], [0], [1], [0, 0, 1, 1], [], []>} : vector<8x192xbf16>, vector<192x256xbf16>, vector<8x256xf32> -> vector<8x256xf32>
    %c0_9 = arith.constant 0 : index
    %c0_10 = arith.constant 0 : index
    %13 = vector.load %arg5[%c0_9, %c0_10] : memref<1x256xf32, #tpu.memory_space<vmem>>, vector<1x256xf32>
    %14 = vector.broadcast %13 : vector<1x256xf32> to vector<8x256xf32>
    %15 = arith.mulf %12, %14 : vector<8x256xf32>
    %c0_11 = arith.constant 0 : index
    %c0_12 = arith.constant 0 : index
    %16 = vector.load %arg6[%c0_11, %c0_12] : memref<1x256xf32, #tpu.memory_space<vmem>>, vector<1x256xf32>
    %17 = vector.broadcast %16 : vector<1x256xf32> to vector<8x256xf32>
    %18 = arith.addf %15, %17 : vector<8x256xf32>
    %cst_13 = arith.constant 0.000000e+00 : f32
    %19 = vector.broadcast %cst_13 : f32 to vector<8x256xf32>
    %20 = arith.maximumf %18, %19 : vector<8x256xf32>
    %cst_14 = arith.constant 0.000000e+00 : f32
    %21 = vector.broadcast %cst_14 : f32 to vector<10x256xf32>
    %c0_15 = arith.constant 0 : index
    %c0_16 = arith.constant 0 : index
    %22 = vector.load %arg9[%c0_15, %c0_16] : memref<10x256xf32, #tpu.memory_space<vmem>>, vector<10x256xf32>
    tpu.vector_store %arg9[%c0_15, %c0_16], %21 {strides = array<i32>} : memref<10x256xf32, #tpu.memory_space<vmem>>, vector<10x256xf32>,
    %c1 = arith.constant 1 : index
    %c0_17 = arith.constant 0 : index
    %23 = vector.load %arg9[%c1, %c0_17] : memref<10x256xf32, #tpu.memory_space<vmem>>, vector<8x256xf32>
    tpu.vector_store %arg9[%c1, %c0_17], %20 {strides = array<i32>} : memref<10x256xf32, #tpu.memory_space<vmem>>, vector<8x256xf32>,
    %c0_18 = arith.constant 0 : index
    %c0_19 = arith.constant 0 : index
    %24 = vector.load %arg9[%c0_18, %c0_19] : memref<10x256xf32, #tpu.memory_space<vmem>>, vector<8x256xf32>
    %25 = arith.truncf %24 : vector<8x256xf32> to vector<8x256xbf16>
    %c0_20 = arith.constant 0 : index
    %c0_21 = arith.constant 0 : index
    %c0_22 = arith.constant 0 : index
    %26 = vector.load %arg7[%c0_20, %c0_21, %c0_22] : memref<3x256x64xbf16, #tpu.memory_space<vmem>>, vector<1x256x64xbf16>
    %27 = vector.shape_cast %26 : vector<1x256x64xbf16> to vector<256x64xbf16>
    %cst_23 = arith.constant dense<0.000000e+00> : vector<8x64xf32>
    %28 = tpu.matmul %25, %27, %cst_23 {dimension_numbers = #tpu.dot_dimension_numbers<[1], [0], [0], [1], [0, 0, 1, 1], [], []>} : vector<8x256xbf16>, vector<256x64xbf16>, vector<8x64xf32> -> vector<8x64xf32>
    %c1_24 = arith.constant 1 : index
    %c0_25 = arith.constant 0 : index
    %29 = vector.load %arg9[%c1_24, %c0_25] : memref<10x256xf32, #tpu.memory_space<vmem>>, vector<8x256xf32>
    %30 = arith.truncf %29 : vector<8x256xf32> to vector<8x256xbf16>
    %c1_26 = arith.constant 1 : index
    %c0_27 = arith.constant 0 : index
    %c0_28 = arith.constant 0 : index
    %31 = vector.load %arg7[%c1_26, %c0_27, %c0_28] : memref<3x256x64xbf16, #tpu.memory_space<vmem>>, vector<1x256x64xbf16>
    %32 = vector.shape_cast %31 : vector<1x256x64xbf16> to vector<256x64xbf16>
    %cst_29 = arith.constant dense<0.000000e+00> : vector<8x64xf32>
    %33 = tpu.matmul %30, %32, %cst_29 {dimension_numbers = #tpu.dot_dimension_numbers<[1], [0], [0], [1], [0, 0, 1, 1], [], []>} : vector<8x256xbf16>, vector<256x64xbf16>, vector<8x64xf32> -> vector<8x64xf32>
    %34 = arith.addf %28, %33 : vector<8x64xf32>
    %c2 = arith.constant 2 : index
    %c0_30 = arith.constant 0 : index
    %35 = vector.load %arg9[%c2, %c0_30] : memref<10x256xf32, #tpu.memory_space<vmem>>, vector<8x256xf32>
    %36 = arith.truncf %35 : vector<8x256xf32> to vector<8x256xbf16>
    %c2_31 = arith.constant 2 : index
    %c0_32 = arith.constant 0 : index
    %c0_33 = arith.constant 0 : index
    %37 = vector.load %arg7[%c2_31, %c0_32, %c0_33] : memref<3x256x64xbf16, #tpu.memory_space<vmem>>, vector<1x256x64xbf16>
    %38 = vector.shape_cast %37 : vector<1x256x64xbf16> to vector<256x64xbf16>
    %cst_34 = arith.constant dense<0.000000e+00> : vector<8x64xf32>
    %39 = tpu.matmul %36, %38, %cst_34 {dimension_numbers = #tpu.dot_dimension_numbers<[1], [0], [0], [1], [0, 0, 1, 1], [], []>} : vector<8x256xbf16>, vector<256x64xbf16>, vector<8x64xf32> -> vector<8x64xf32>
    %40 = arith.addf %34, %39 : vector<8x64xf32>
    %c0_35 = arith.constant 0 : index
    %c0_36 = arith.constant 0 : index
    %c0_37 = arith.constant 0 : index
    %41 = vector.load %arg8[%c0_35, %c0_36, %c0_37] : memref<1x8x64xf32, #tpu.memory_space<vmem>>, vector<1x8x64xf32>
    %42 = vector.shape_cast %41 : vector<1x8x64xf32> to vector<8x64xf32>
    %43 = vector.shape_cast %40 : vector<8x64xf32> to vector<1x8x64xf32>
    tpu.vector_store %arg8[%c0_35, %c0_36, %c0_37], %43 {strides = array<i32>} : memref<1x8x64xf32, #tpu.memory_space<vmem>>, vector<1x8x64xf32>,
    return
  }
  func.func @transform_0(%arg0: i32) -> (i32, i32, i32) {
    %c0_i32 = arith.constant 0 : i32
    %c0_i32_0 = arith.constant 0 : i32
    %c0_i32_1 = arith.constant 0 : i32
    return %arg0, %c0_i32, %c0_i32_0 : i32, i32, i32
  }
  func.func @transform_1(%arg0: i32) -> (i32, i32) {
    %c0_i32 = arith.constant 0 : i32
    %c0_i32_0 = arith.constant 0 : i32
    %c0_i32_1 = arith.constant 0 : i32
    return %c0_i32, %c0_i32_0 : i32, i32
  }
  func.func @transform_2(%arg0: i32) -> (i32, i32) {
    %c0_i32 = arith.constant 0 : i32
    %c0_i32_0 = arith.constant 0 : i32
    %c0_i32_1 = arith.constant 0 : i32
    return %c0_i32, %c0_i32_0 : i32, i32
  }
  func.func @transform_3(%arg0: i32) -> (i32, i32) {
    %c0_i32 = arith.constant 0 : i32
    %c0_i32_0 = arith.constant 0 : i32
    %c0_i32_1 = arith.constant 0 : i32
    return %c0_i32, %c0_i32_0 : i32, i32
  }
  func.func @transform_4(%arg0: i32) -> (i32, i32) {
    %c0_i32 = arith.constant 0 : i32
    %c0_i32_0 = arith.constant 0 : i32
    %c0_i32_1 = arith.constant 0 : i32
    return %c0_i32, %c0_i32_0 : i32, i32
  }
  func.func @transform_5(%arg0: i32) -> (i32, i32) {
    %c0_i32 = arith.constant 0 : i32
    %c0_i32_0 = arith.constant 0 : i32
    %c0_i32_1 = arith.constant 0 : i32
    return %c0_i32, %c0_i32_0 : i32, i32
  }
  func.func @transform_6(%arg0: i32) -> (i32, i32, i32) {
    %c0_i32 = arith.constant 0 : i32
    %c0_i32_0 = arith.constant 0 : i32
    %c0_i32_1 = arith.constant 0 : i32
    %c0_i32_2 = arith.constant 0 : i32
    return %c0_i32, %c0_i32_0, %c0_i32_1 : i32, i32, i32
  }
  func.func @transform_7(%arg0: i32) -> (i32, i32, i32) {
    %c0_i32 = arith.constant 0 : i32
    %c0_i32_0 = arith.constant 0 : i32
    %c0_i32_1 = arith.constant 0 : i32
    return %arg0, %c0_i32, %c0_i32_0 : i32, i32, i32
  }
}

module attributes {stable_mosaic.version = 11 : i64} {
  func.func @kernel(%arg0: i32, %arg1: memref<1x4x512xf32, #tpu.memory_space<vmem>>, %arg2: memref<1x512xf32, #tpu.memory_space<vmem>>, %arg3: memref<1x512xf32, #tpu.memory_space<vmem>>, %arg4: memref<512x64xbf16, #tpu.memory_space<vmem>>, %arg5: memref<1x4x64xf32, #tpu.memory_space<vmem>>) attributes {dimension_semantics = [#tpu.dimension_semantics<parallel>], iteration_bounds = array<i64: 2>, scalar_prefetch = 0 : i64, scratch_operands = 0 : i64, tpu.core_type = #tpu.core_type<tc>, window_params = [{transform_indices = @transform_0, window_bounds = array<i64: 1, 4, 512>}, {pipeline_mode = #tpu.pipeline_mode<synchronous>, transform_indices = @transform_1, window_bounds = array<i64: 1, 512>}, {pipeline_mode = #tpu.pipeline_mode<synchronous>, transform_indices = @transform_2, window_bounds = array<i64: 1, 512>}, {pipeline_mode = #tpu.pipeline_mode<synchronous>, transform_indices = @transform_3, window_bounds = array<i64: 512, 64>}, {transform_indices = @transform_4, window_bounds = array<i64: 1, 4, 64>}]} {
    %c0 = arith.constant 0 : index
    %c0_0 = arith.constant 0 : index
    %c0_1 = arith.constant 0 : index
    %0 = vector.load %arg1[%c0, %c0_0, %c0_1] : memref<1x4x512xf32, #tpu.memory_space<vmem>>, vector<1x4x512xf32>
    %1 = vector.shape_cast %0 : vector<1x4x512xf32> to vector<4x512xf32>
    %c0_2 = arith.constant 0 : index
    %c0_3 = arith.constant 0 : index
    %2 = vector.load %arg2[%c0_2, %c0_3] : memref<1x512xf32, #tpu.memory_space<vmem>>, vector<1x512xf32>
    %3 = vector.broadcast %2 : vector<1x512xf32> to vector<4x512xf32>
    %4 = arith.mulf %1, %3 : vector<4x512xf32>
    %c0_4 = arith.constant 0 : index
    %c0_5 = arith.constant 0 : index
    %5 = vector.load %arg3[%c0_4, %c0_5] : memref<1x512xf32, #tpu.memory_space<vmem>>, vector<1x512xf32>
    %6 = vector.broadcast %5 : vector<1x512xf32> to vector<4x512xf32>
    %7 = arith.addf %4, %6 : vector<4x512xf32>
    %cst = arith.constant 0.000000e+00 : f32
    %8 = vector.broadcast %cst : f32 to vector<4x512xf32>
    %9 = arith.maximumf %7, %8 : vector<4x512xf32>
    %10 = arith.truncf %9 : vector<4x512xf32> to vector<4x512xbf16>
    %c0_6 = arith.constant 0 : index
    %c0_7 = arith.constant 0 : index
    %11 = vector.load %arg4[%c0_6, %c0_7] : memref<512x64xbf16, #tpu.memory_space<vmem>>, vector<512x64xbf16>
    %cst_8 = arith.constant dense<0.000000e+00> : vector<4x64xf32>
    %12 = tpu.matmul %10, %11, %cst_8 {dimension_numbers = #tpu.dot_dimension_numbers<[1], [0], [0], [1], [0, 0, 1, 1], [], []>} : vector<4x512xbf16>, vector<512x64xbf16>, vector<4x64xf32> -> vector<4x64xf32>
    %c0_9 = arith.constant 0 : index
    %c0_10 = arith.constant 0 : index
    %c0_11 = arith.constant 0 : index
    %13 = vector.load %arg5[%c0_9, %c0_10, %c0_11] : memref<1x4x64xf32, #tpu.memory_space<vmem>>, vector<1x4x64xf32>
    %14 = vector.shape_cast %13 : vector<1x4x64xf32> to vector<4x64xf32>
    %15 = vector.shape_cast %12 : vector<4x64xf32> to vector<1x4x64xf32>
    tpu.vector_store %arg5[%c0_9, %c0_10, %c0_11], %15 {strides = array<i32>} : memref<1x4x64xf32, #tpu.memory_space<vmem>>, vector<1x4x64xf32>,
    return
  }
  func.func @transform_0(%arg0: i32) -> (i32, i32, i32) {
    %c0_i32 = arith.constant 0 : i32
    %c0_i32_0 = arith.constant 0 : i32
    %c0_i32_1 = arith.constant 0 : i32
    return %arg0, %c0_i32, %c0_i32_0 : i32, i32, i32
  }
  func.func @transform_1(%arg0: i32) -> (i32, i32) {
    %c0_i32 = arith.constant 0 : i32
    %c0_i32_0 = arith.constant 0 : i32
    %c0_i32_1 = arith.constant 0 : i32
    return %c0_i32, %c0_i32_0 : i32, i32
  }
  func.func @transform_2(%arg0: i32) -> (i32, i32) {
    %c0_i32 = arith.constant 0 : i32
    %c0_i32_0 = arith.constant 0 : i32
    %c0_i32_1 = arith.constant 0 : i32
    return %c0_i32, %c0_i32_0 : i32, i32
  }
  func.func @transform_3(%arg0: i32) -> (i32, i32) {
    %c0_i32 = arith.constant 0 : i32
    %c0_i32_0 = arith.constant 0 : i32
    %c0_i32_1 = arith.constant 0 : i32
    return %c0_i32, %c0_i32_0 : i32, i32
  }
  func.func @transform_4(%arg0: i32) -> (i32, i32, i32) {
    %c0_i32 = arith.constant 0 : i32
    %c0_i32_0 = arith.constant 0 : i32
    %c0_i32_1 = arith.constant 0 : i32
    return %arg0, %c0_i32, %c0_i32_0 : i32, i32, i32
  }
}

module attributes {stable_mosaic.version = 11 : i64} {
  func.func @kernel(%arg0: i32, %arg1: memref<1x4x64xf32, #tpu.memory_space<vmem>>, %arg2: memref<1x64xf32, #tpu.memory_space<vmem>>, %arg3: memref<1x64xf32, #tpu.memory_space<vmem>>, %arg4: memref<64x128xbf16, #tpu.memory_space<vmem>>, %arg5: memref<1x128xf32, #tpu.memory_space<vmem>>, %arg6: memref<1x128xf32, #tpu.memory_space<vmem>>, %arg7: memref<3x128x32xbf16, #tpu.memory_space<vmem>>, %arg8: memref<1x4x32xf32, #tpu.memory_space<vmem>>, %arg9: memref<6x128xf32, #tpu.memory_space<vmem>>) attributes {dimension_semantics = [#tpu.dimension_semantics<parallel>], iteration_bounds = array<i64: 2>, scalar_prefetch = 0 : i64, scratch_operands = 1 : i64, tpu.core_type = #tpu.core_type<tc>, window_params = [{transform_indices = @transform_0, window_bounds = array<i64: 1, 4, 64>}, {pipeline_mode = #tpu.pipeline_mode<synchronous>, transform_indices = @transform_1, window_bounds = array<i64: 1, 64>}, {pipeline_mode = #tpu.pipeline_mode<synchronous>, transform_indices = @transform_2, window_bounds = array<i64: 1, 64>}, {pipeline_mode = #tpu.pipeline_mode<synchronous>, transform_indices = @transform_3, window_bounds = array<i64: 64, 128>}, {pipeline_mode = #tpu.pipeline_mode<synchronous>, transform_indices = @transform_4, window_bounds = array<i64: 1, 128>}, {pipeline_mode = #tpu.pipeline_mode<synchronous>, transform_indices = @transform_5, window_bounds = array<i64: 1, 128>}, {pipeline_mode = #tpu.pipeline_mode<synchronous>, transform_indices = @transform_6, window_bounds = array<i64: 3, 128, 32>}, {transform_indices = @transform_7, window_bounds = array<i64: 1, 4, 32>}]} {
    %c0 = arith.constant 0 : index
    %c0_0 = arith.constant 0 : index
    %c0_1 = arith.constant 0 : index
    %0 = vector.load %arg1[%c0, %c0_0, %c0_1] : memref<1x4x64xf32, #tpu.memory_space<vmem>>, vector<1x4x64xf32>
    %1 = vector.shape_cast %0 : vector<1x4x64xf32> to vector<4x64xf32>
    %c0_2 = arith.constant 0 : index
    %c0_3 = arith.constant 0 : index
    %2 = vector.load %arg2[%c0_2, %c0_3] : memref<1x64xf32, #tpu.memory_space<vmem>>, vector<1x64xf32>
    %3 = vector.broadcast %2 : vector<1x64xf32> to vector<4x64xf32>
    %4 = arith.mulf %1, %3 : vector<4x64xf32>
    %c0_4 = arith.constant 0 : index
    %c0_5 = arith.constant 0 : index
    %5 = vector.load %arg3[%c0_4, %c0_5] : memref<1x64xf32, #tpu.memory_space<vmem>>, vector<1x64xf32>
    %6 = vector.broadcast %5 : vector<1x64xf32> to vector<4x64xf32>
    %7 = arith.addf %4, %6 : vector<4x64xf32>
    %cst = arith.constant 0.000000e+00 : f32
    %8 = vector.broadcast %cst : f32 to vector<4x64xf32>
    %9 = arith.maximumf %7, %8 : vector<4x64xf32>
    %10 = arith.truncf %9 : vector<4x64xf32> to vector<4x64xbf16>
    %c0_6 = arith.constant 0 : index
    %c0_7 = arith.constant 0 : index
    %11 = vector.load %arg4[%c0_6, %c0_7] : memref<64x128xbf16, #tpu.memory_space<vmem>>, vector<64x128xbf16>
    %cst_8 = arith.constant dense<0.000000e+00> : vector<4x128xf32>
    %12 = tpu.matmul %10, %11, %cst_8 {dimension_numbers = #tpu.dot_dimension_numbers<[1], [0], [0], [1], [0, 0, 1, 1], [], []>} : vector<4x64xbf16>, vector<64x128xbf16>, vector<4x128xf32> -> vector<4x128xf32>
    %c0_9 = arith.constant 0 : index
    %c0_10 = arith.constant 0 : index
    %13 = vector.load %arg5[%c0_9, %c0_10] : memref<1x128xf32, #tpu.memory_space<vmem>>, vector<1x128xf32>
    %14 = vector.broadcast %13 : vector<1x128xf32> to vector<4x128xf32>
    %15 = arith.mulf %12, %14 : vector<4x128xf32>
    %c0_11 = arith.constant 0 : index
    %c0_12 = arith.constant 0 : index
    %16 = vector.load %arg6[%c0_11, %c0_12] : memref<1x128xf32, #tpu.memory_space<vmem>>, vector<1x128xf32>
    %17 = vector.broadcast %16 : vector<1x128xf32> to vector<4x128xf32>
    %18 = arith.addf %15, %17 : vector<4x128xf32>
    %cst_13 = arith.constant 0.000000e+00 : f32
    %19 = vector.broadcast %cst_13 : f32 to vector<4x128xf32>
    %20 = arith.maximumf %18, %19 : vector<4x128xf32>
    %cst_14 = arith.constant 0.000000e+00 : f32
    %21 = vector.broadcast %cst_14 : f32 to vector<6x128xf32>
    %c0_15 = arith.constant 0 : index
    %c0_16 = arith.constant 0 : index
    %22 = vector.load %arg9[%c0_15, %c0_16] : memref<6x128xf32, #tpu.memory_space<vmem>>, vector<6x128xf32>
    tpu.vector_store %arg9[%c0_15, %c0_16], %21 {strides = array<i32>} : memref<6x128xf32, #tpu.memory_space<vmem>>, vector<6x128xf32>,
    %c1 = arith.constant 1 : index
    %c0_17 = arith.constant 0 : index
    %23 = vector.load %arg9[%c1, %c0_17] : memref<6x128xf32, #tpu.memory_space<vmem>>, vector<4x128xf32>
    tpu.vector_store %arg9[%c1, %c0_17], %20 {strides = array<i32>} : memref<6x128xf32, #tpu.memory_space<vmem>>, vector<4x128xf32>,
    %c0_18 = arith.constant 0 : index
    %c0_19 = arith.constant 0 : index
    %24 = vector.load %arg9[%c0_18, %c0_19] : memref<6x128xf32, #tpu.memory_space<vmem>>, vector<4x128xf32>
    %25 = arith.truncf %24 : vector<4x128xf32> to vector<4x128xbf16>
    %c0_20 = arith.constant 0 : index
    %c0_21 = arith.constant 0 : index
    %c0_22 = arith.constant 0 : index
    %26 = vector.load %arg7[%c0_20, %c0_21, %c0_22] : memref<3x128x32xbf16, #tpu.memory_space<vmem>>, vector<1x128x32xbf16>
    %27 = vector.shape_cast %26 : vector<1x128x32xbf16> to vector<128x32xbf16>
    %cst_23 = arith.constant dense<0.000000e+00> : vector<4x32xf32>
    %28 = tpu.matmul %25, %27, %cst_23 {dimension_numbers = #tpu.dot_dimension_numbers<[1], [0], [0], [1], [0, 0, 1, 1], [], []>} : vector<4x128xbf16>, vector<128x32xbf16>, vector<4x32xf32> -> vector<4x32xf32>
    %c1_24 = arith.constant 1 : index
    %c0_25 = arith.constant 0 : index
    %29 = vector.load %arg9[%c1_24, %c0_25] : memref<6x128xf32, #tpu.memory_space<vmem>>, vector<4x128xf32>
    %30 = arith.truncf %29 : vector<4x128xf32> to vector<4x128xbf16>
    %c1_26 = arith.constant 1 : index
    %c0_27 = arith.constant 0 : index
    %c0_28 = arith.constant 0 : index
    %31 = vector.load %arg7[%c1_26, %c0_27, %c0_28] : memref<3x128x32xbf16, #tpu.memory_space<vmem>>, vector<1x128x32xbf16>
    %32 = vector.shape_cast %31 : vector<1x128x32xbf16> to vector<128x32xbf16>
    %cst_29 = arith.constant dense<0.000000e+00> : vector<4x32xf32>
    %33 = tpu.matmul %30, %32, %cst_29 {dimension_numbers = #tpu.dot_dimension_numbers<[1], [0], [0], [1], [0, 0, 1, 1], [], []>} : vector<4x128xbf16>, vector<128x32xbf16>, vector<4x32xf32> -> vector<4x32xf32>
    %34 = arith.addf %28, %33 : vector<4x32xf32>
    %c2 = arith.constant 2 : index
    %c0_30 = arith.constant 0 : index
    %35 = vector.load %arg9[%c2, %c0_30] : memref<6x128xf32, #tpu.memory_space<vmem>>, vector<4x128xf32>
    %36 = arith.truncf %35 : vector<4x128xf32> to vector<4x128xbf16>
    %c2_31 = arith.constant 2 : index
    %c0_32 = arith.constant 0 : index
    %c0_33 = arith.constant 0 : index
    %37 = vector.load %arg7[%c2_31, %c0_32, %c0_33] : memref<3x128x32xbf16, #tpu.memory_space<vmem>>, vector<1x128x32xbf16>
    %38 = vector.shape_cast %37 : vector<1x128x32xbf16> to vector<128x32xbf16>
    %cst_34 = arith.constant dense<0.000000e+00> : vector<4x32xf32>
    %39 = tpu.matmul %36, %38, %cst_34 {dimension_numbers = #tpu.dot_dimension_numbers<[1], [0], [0], [1], [0, 0, 1, 1], [], []>} : vector<4x128xbf16>, vector<128x32xbf16>, vector<4x32xf32> -> vector<4x32xf32>
    %40 = arith.addf %34, %39 : vector<4x32xf32>
    %c0_35 = arith.constant 0 : index
    %c0_36 = arith.constant 0 : index
    %c0_37 = arith.constant 0 : index
    %41 = vector.load %arg8[%c0_35, %c0_36, %c0_37] : memref<1x4x32xf32, #tpu.memory_space<vmem>>, vector<1x4x32xf32>
    %42 = vector.shape_cast %41 : vector<1x4x32xf32> to vector<4x32xf32>
    %43 = vector.shape_cast %40 : vector<4x32xf32> to vector<1x4x32xf32>
    tpu.vector_store %arg8[%c0_35, %c0_36, %c0_37], %43 {strides = array<i32>} : memref<1x4x32xf32, #tpu.memory_space<vmem>>, vector<1x4x32xf32>,
    return
  }
  func.func @transform_0(%arg0: i32) -> (i32, i32, i32) {
    %c0_i32 = arith.constant 0 : i32
    %c0_i32_0 = arith.constant 0 : i32
    %c0_i32_1 = arith.constant 0 : i32
    return %arg0, %c0_i32, %c0_i32_0 : i32, i32, i32
  }
  func.func @transform_1(%arg0: i32) -> (i32, i32) {
    %c0_i32 = arith.constant 0 : i32
    %c0_i32_0 = arith.constant 0 : i32
    %c0_i32_1 = arith.constant 0 : i32
    return %c0_i32, %c0_i32_0 : i32, i32
  }
  func.func @transform_2(%arg0: i32) -> (i32, i32) {
    %c0_i32 = arith.constant 0 : i32
    %c0_i32_0 = arith.constant 0 : i32
    %c0_i32_1 = arith.constant 0 : i32
    return %c0_i32, %c0_i32_0 : i32, i32
  }
  func.func @transform_3(%arg0: i32) -> (i32, i32) {
    %c0_i32 = arith.constant 0 : i32
    %c0_i32_0 = arith.constant 0 : i32
    %c0_i32_1 = arith.constant 0 : i32
    return %c0_i32, %c0_i32_0 : i32, i32
  }
  func.func @transform_4(%arg0: i32) -> (i32, i32) {
    %c0_i32 = arith.constant 0 : i32
    %c0_i32_0 = arith.constant 0 : i32
    %c0_i32_1 = arith.constant 0 : i32
    return %c0_i32, %c0_i32_0 : i32, i32
  }
  func.func @transform_5(%arg0: i32) -> (i32, i32) {
    %c0_i32 = arith.constant 0 : i32
    %c0_i32_0 = arith.constant 0 : i32
    %c0_i32_1 = arith.constant 0 : i32
    return %c0_i32, %c0_i32_0 : i32, i32
  }
  func.func @transform_6(%arg0: i32) -> (i32, i32, i32) {
    %c0_i32 = arith.constant 0 : i32
    %c0_i32_0 = arith.constant 0 : i32
    %c0_i32_1 = arith.constant 0 : i32
    %c0_i32_2 = arith.constant 0 : i32
    return %c0_i32, %c0_i32_0, %c0_i32_1 : i32, i32, i32
  }
  func.func @transform_7(%arg0: i32) -> (i32, i32, i32) {
    %c0_i32 = arith.constant 0 : i32
    %c0_i32_0 = arith.constant 0 : i32
    %c0_i32_1 = arith.constant 0 : i32
    return %arg0, %c0_i32, %c0_i32_0 : i32, i32, i32
  }
}

module attributes {stable_mosaic.version = 11 : i64} {
  func.func @kernel(%arg0: i32, %arg1: memref<1x4x96xf32, #tpu.memory_space<vmem>>, %arg2: memref<1x96xf32, #tpu.memory_space<vmem>>, %arg3: memref<1x96xf32, #tpu.memory_space<vmem>>, %arg4: memref<96x128xbf16, #tpu.memory_space<vmem>>, %arg5: memref<1x128xf32, #tpu.memory_space<vmem>>, %arg6: memref<1x128xf32, #tpu.memory_space<vmem>>, %arg7: memref<3x128x32xbf16, #tpu.memory_space<vmem>>, %arg8: memref<1x4x32xf32, #tpu.memory_space<vmem>>, %arg9: memref<6x128xf32, #tpu.memory_space<vmem>>) attributes {dimension_semantics = [#tpu.dimension_semantics<parallel>], iteration_bounds = array<i64: 2>, scalar_prefetch = 0 : i64, scratch_operands = 1 : i64, tpu.core_type = #tpu.core_type<tc>, window_params = [{transform_indices = @transform_0, window_bounds = array<i64: 1, 4, 96>}, {pipeline_mode = #tpu.pipeline_mode<synchronous>, transform_indices = @transform_1, window_bounds = array<i64: 1, 96>}, {pipeline_mode = #tpu.pipeline_mode<synchronous>, transform_indices = @transform_2, window_bounds = array<i64: 1, 96>}, {pipeline_mode = #tpu.pipeline_mode<synchronous>, transform_indices = @transform_3, window_bounds = array<i64: 96, 128>}, {pipeline_mode = #tpu.pipeline_mode<synchronous>, transform_indices = @transform_4, window_bounds = array<i64: 1, 128>}, {pipeline_mode = #tpu.pipeline_mode<synchronous>, transform_indices = @transform_5, window_bounds = array<i64: 1, 128>}, {pipeline_mode = #tpu.pipeline_mode<synchronous>, transform_indices = @transform_6, window_bounds = array<i64: 3, 128, 32>}, {transform_indices = @transform_7, window_bounds = array<i64: 1, 4, 32>}]} {
    %c0 = arith.constant 0 : index
    %c0_0 = arith.constant 0 : index
    %c0_1 = arith.constant 0 : index
    %0 = vector.load %arg1[%c0, %c0_0, %c0_1] : memref<1x4x96xf32, #tpu.memory_space<vmem>>, vector<1x4x96xf32>
    %1 = vector.shape_cast %0 : vector<1x4x96xf32> to vector<4x96xf32>
    %c0_2 = arith.constant 0 : index
    %c0_3 = arith.constant 0 : index
    %2 = vector.load %arg2[%c0_2, %c0_3] : memref<1x96xf32, #tpu.memory_space<vmem>>, vector<1x96xf32>
    %3 = vector.broadcast %2 : vector<1x96xf32> to vector<4x96xf32>
    %4 = arith.mulf %1, %3 : vector<4x96xf32>
    %c0_4 = arith.constant 0 : index
    %c0_5 = arith.constant 0 : index
    %5 = vector.load %arg3[%c0_4, %c0_5] : memref<1x96xf32, #tpu.memory_space<vmem>>, vector<1x96xf32>
    %6 = vector.broadcast %5 : vector<1x96xf32> to vector<4x96xf32>
    %7 = arith.addf %4, %6 : vector<4x96xf32>
    %cst = arith.constant 0.000000e+00 : f32
    %8 = vector.broadcast %cst : f32 to vector<4x96xf32>
    %9 = arith.maximumf %7, %8 : vector<4x96xf32>
    %10 = arith.truncf %9 : vector<4x96xf32> to vector<4x96xbf16>
    %c0_6 = arith.constant 0 : index
    %c0_7 = arith.constant 0 : index
    %11 = vector.load %arg4[%c0_6, %c0_7] : memref<96x128xbf16, #tpu.memory_space<vmem>>, vector<96x128xbf16>
    %cst_8 = arith.constant dense<0.000000e+00> : vector<4x128xf32>
    %12 = tpu.matmul %10, %11, %cst_8 {dimension_numbers = #tpu.dot_dimension_numbers<[1], [0], [0], [1], [0, 0, 1, 1], [], []>} : vector<4x96xbf16>, vector<96x128xbf16>, vector<4x128xf32> -> vector<4x128xf32>
    %c0_9 = arith.constant 0 : index
    %c0_10 = arith.constant 0 : index
    %13 = vector.load %arg5[%c0_9, %c0_10] : memref<1x128xf32, #tpu.memory_space<vmem>>, vector<1x128xf32>
    %14 = vector.broadcast %13 : vector<1x128xf32> to vector<4x128xf32>
    %15 = arith.mulf %12, %14 : vector<4x128xf32>
    %c0_11 = arith.constant 0 : index
    %c0_12 = arith.constant 0 : index
    %16 = vector.load %arg6[%c0_11, %c0_12] : memref<1x128xf32, #tpu.memory_space<vmem>>, vector<1x128xf32>
    %17 = vector.broadcast %16 : vector<1x128xf32> to vector<4x128xf32>
    %18 = arith.addf %15, %17 : vector<4x128xf32>
    %cst_13 = arith.constant 0.000000e+00 : f32
    %19 = vector.broadcast %cst_13 : f32 to vector<4x128xf32>
    %20 = arith.maximumf %18, %19 : vector<4x128xf32>
    %cst_14 = arith.constant 0.000000e+00 : f32
    %21 = vector.broadcast %cst_14 : f32 to vector<6x128xf32>
    %c0_15 = arith.constant 0 : index
    %c0_16 = arith.constant 0 : index
    %22 = vector.load %arg9[%c0_15, %c0_16] : memref<6x128xf32, #tpu.memory_space<vmem>>, vector<6x128xf32>
    tpu.vector_store %arg9[%c0_15, %c0_16], %21 {strides = array<i32>} : memref<6x128xf32, #tpu.memory_space<vmem>>, vector<6x128xf32>,
    %c1 = arith.constant 1 : index
    %c0_17 = arith.constant 0 : index
    %23 = vector.load %arg9[%c1, %c0_17] : memref<6x128xf32, #tpu.memory_space<vmem>>, vector<4x128xf32>
    tpu.vector_store %arg9[%c1, %c0_17], %20 {strides = array<i32>} : memref<6x128xf32, #tpu.memory_space<vmem>>, vector<4x128xf32>,
    %c0_18 = arith.constant 0 : index
    %c0_19 = arith.constant 0 : index
    %24 = vector.load %arg9[%c0_18, %c0_19] : memref<6x128xf32, #tpu.memory_space<vmem>>, vector<4x128xf32>
    %25 = arith.truncf %24 : vector<4x128xf32> to vector<4x128xbf16>
    %c0_20 = arith.constant 0 : index
    %c0_21 = arith.constant 0 : index
    %c0_22 = arith.constant 0 : index
    %26 = vector.load %arg7[%c0_20, %c0_21, %c0_22] : memref<3x128x32xbf16, #tpu.memory_space<vmem>>, vector<1x128x32xbf16>
    %27 = vector.shape_cast %26 : vector<1x128x32xbf16> to vector<128x32xbf16>
    %cst_23 = arith.constant dense<0.000000e+00> : vector<4x32xf32>
    %28 = tpu.matmul %25, %27, %cst_23 {dimension_numbers = #tpu.dot_dimension_numbers<[1], [0], [0], [1], [0, 0, 1, 1], [], []>} : vector<4x128xbf16>, vector<128x32xbf16>, vector<4x32xf32> -> vector<4x32xf32>
    %c1_24 = arith.constant 1 : index
    %c0_25 = arith.constant 0 : index
    %29 = vector.load %arg9[%c1_24, %c0_25] : memref<6x128xf32, #tpu.memory_space<vmem>>, vector<4x128xf32>
    %30 = arith.truncf %29 : vector<4x128xf32> to vector<4x128xbf16>
    %c1_26 = arith.constant 1 : index
    %c0_27 = arith.constant 0 : index
    %c0_28 = arith.constant 0 : index
    %31 = vector.load %arg7[%c1_26, %c0_27, %c0_28] : memref<3x128x32xbf16, #tpu.memory_space<vmem>>, vector<1x128x32xbf16>
    %32 = vector.shape_cast %31 : vector<1x128x32xbf16> to vector<128x32xbf16>
    %cst_29 = arith.constant dense<0.000000e+00> : vector<4x32xf32>
    %33 = tpu.matmul %30, %32, %cst_29 {dimension_numbers = #tpu.dot_dimension_numbers<[1], [0], [0], [1], [0, 0, 1, 1], [], []>} : vector<4x128xbf16>, vector<128x32xbf16>, vector<4x32xf32> -> vector<4x32xf32>
    %34 = arith.addf %28, %33 : vector<4x32xf32>
    %c2 = arith.constant 2 : index
    %c0_30 = arith.constant 0 : index
    %35 = vector.load %arg9[%c2, %c0_30] : memref<6x128xf32, #tpu.memory_space<vmem>>, vector<4x128xf32>
    %36 = arith.truncf %35 : vector<4x128xf32> to vector<4x128xbf16>
    %c2_31 = arith.constant 2 : index
    %c0_32 = arith.constant 0 : index
    %c0_33 = arith.constant 0 : index
    %37 = vector.load %arg7[%c2_31, %c0_32, %c0_33] : memref<3x128x32xbf16, #tpu.memory_space<vmem>>, vector<1x128x32xbf16>
    %38 = vector.shape_cast %37 : vector<1x128x32xbf16> to vector<128x32xbf16>
    %cst_34 = arith.constant dense<0.000000e+00> : vector<4x32xf32>
    %39 = tpu.matmul %36, %38, %cst_34 {dimension_numbers = #tpu.dot_dimension_numbers<[1], [0], [0], [1], [0, 0, 1, 1], [], []>} : vector<4x128xbf16>, vector<128x32xbf16>, vector<4x32xf32> -> vector<4x32xf32>
    %40 = arith.addf %34, %39 : vector<4x32xf32>
    %c0_35 = arith.constant 0 : index
    %c0_36 = arith.constant 0 : index
    %c0_37 = arith.constant 0 : index
    %41 = vector.load %arg8[%c0_35, %c0_36, %c0_37] : memref<1x4x32xf32, #tpu.memory_space<vmem>>, vector<1x4x32xf32>
    %42 = vector.shape_cast %41 : vector<1x4x32xf32> to vector<4x32xf32>
    %43 = vector.shape_cast %40 : vector<4x32xf32> to vector<1x4x32xf32>
    tpu.vector_store %arg8[%c0_35, %c0_36, %c0_37], %43 {strides = array<i32>} : memref<1x4x32xf32, #tpu.memory_space<vmem>>, vector<1x4x32xf32>,
    return
  }
  func.func @transform_0(%arg0: i32) -> (i32, i32, i32) {
    %c0_i32 = arith.constant 0 : i32
    %c0_i32_0 = arith.constant 0 : i32
    %c0_i32_1 = arith.constant 0 : i32
    return %arg0, %c0_i32, %c0_i32_0 : i32, i32, i32
  }
  func.func @transform_1(%arg0: i32) -> (i32, i32) {
    %c0_i32 = arith.constant 0 : i32
    %c0_i32_0 = arith.constant 0 : i32
    %c0_i32_1 = arith.constant 0 : i32
    return %c0_i32, %c0_i32_0 : i32, i32
  }
  func.func @transform_2(%arg0: i32) -> (i32, i32) {
    %c0_i32 = arith.constant 0 : i32
    %c0_i32_0 = arith.constant 0 : i32
    %c0_i32_1 = arith.constant 0 : i32
    return %c0_i32, %c0_i32_0 : i32, i32
  }
  func.func @transform_3(%arg0: i32) -> (i32, i32) {
    %c0_i32 = arith.constant 0 : i32
    %c0_i32_0 = arith.constant 0 : i32
    %c0_i32_1 = arith.constant 0 : i32
    return %c0_i32, %c0_i32_0 : i32, i32
  }
  func.func @transform_4(%arg0: i32) -> (i32, i32) {
    %c0_i32 = arith.constant 0 : i32
    %c0_i32_0 = arith.constant 0 : i32
    %c0_i32_1 = arith.constant 0 : i32
    return %c0_i32, %c0_i32_0 : i32, i32
  }
  func.func @transform_5(%arg0: i32) -> (i32, i32) {
    %c0_i32 = arith.constant 0 : i32
    %c0_i32_0 = arith.constant 0 : i32
    %c0_i32_1 = arith.constant 0 : i32
    return %c0_i32, %c0_i32_0 : i32, i32
  }
  func.func @transform_6(%arg0: i32) -> (i32, i32, i32) {
    %c0_i32 = arith.constant 0 : i32
    %c0_i32_0 = arith.constant 0 : i32
    %c0_i32_1 = arith.constant 0 : i32
    %c0_i32_2 = arith.constant 0 : i32
    return %c0_i32, %c0_i32_0, %c0_i32_1 : i32, i32, i32
  }
  func.func @transform_7(%arg0: i32) -> (i32, i32, i32) {
    %c0_i32 = arith.constant 0 : i32
    %c0_i32_0 = arith.constant 0 : i32
    %c0_i32_1 = arith.constant 0 : i32
    return %arg0, %c0_i32, %c0_i32_0 : i32, i32, i32
  }
}

module attributes {stable_mosaic.version = 11 : i64} {
  func.func @kernel(%arg0: i32, %arg1: memref<1x2x256xf32, #tpu.memory_space<vmem>>, %arg2: memref<1x256xf32, #tpu.memory_space<vmem>>, %arg3: memref<1x256xf32, #tpu.memory_space<vmem>>, %arg4: memref<256x32xbf16, #tpu.memory_space<vmem>>, %arg5: memref<1x2x32xf32, #tpu.memory_space<vmem>>) attributes {dimension_semantics = [#tpu.dimension_semantics<parallel>], iteration_bounds = array<i64: 2>, scalar_prefetch = 0 : i64, scratch_operands = 0 : i64, tpu.core_type = #tpu.core_type<tc>, window_params = [{transform_indices = @transform_0, window_bounds = array<i64: 1, 2, 256>}, {pipeline_mode = #tpu.pipeline_mode<synchronous>, transform_indices = @transform_1, window_bounds = array<i64: 1, 256>}, {pipeline_mode = #tpu.pipeline_mode<synchronous>, transform_indices = @transform_2, window_bounds = array<i64: 1, 256>}, {pipeline_mode = #tpu.pipeline_mode<synchronous>, transform_indices = @transform_3, window_bounds = array<i64: 256, 32>}, {transform_indices = @transform_4, window_bounds = array<i64: 1, 2, 32>}]} {
    %c0 = arith.constant 0 : index
    %c0_0 = arith.constant 0 : index
    %c0_1 = arith.constant 0 : index
    %0 = vector.load %arg1[%c0, %c0_0, %c0_1] : memref<1x2x256xf32, #tpu.memory_space<vmem>>, vector<1x2x256xf32>
    %1 = vector.shape_cast %0 : vector<1x2x256xf32> to vector<2x256xf32>
    %c0_2 = arith.constant 0 : index
    %c0_3 = arith.constant 0 : index
    %2 = vector.load %arg2[%c0_2, %c0_3] : memref<1x256xf32, #tpu.memory_space<vmem>>, vector<1x256xf32>
    %3 = vector.broadcast %2 : vector<1x256xf32> to vector<2x256xf32>
    %4 = arith.mulf %1, %3 : vector<2x256xf32>
    %c0_4 = arith.constant 0 : index
    %c0_5 = arith.constant 0 : index
    %5 = vector.load %arg3[%c0_4, %c0_5] : memref<1x256xf32, #tpu.memory_space<vmem>>, vector<1x256xf32>
    %6 = vector.broadcast %5 : vector<1x256xf32> to vector<2x256xf32>
    %7 = arith.addf %4, %6 : vector<2x256xf32>
    %cst = arith.constant 0.000000e+00 : f32
    %8 = vector.broadcast %cst : f32 to vector<2x256xf32>
    %9 = arith.maximumf %7, %8 : vector<2x256xf32>
    %10 = arith.truncf %9 : vector<2x256xf32> to vector<2x256xbf16>
    %c0_6 = arith.constant 0 : index
    %c0_7 = arith.constant 0 : index
    %11 = vector.load %arg4[%c0_6, %c0_7] : memref<256x32xbf16, #tpu.memory_space<vmem>>, vector<256x32xbf16>
    %cst_8 = arith.constant dense<0.000000e+00> : vector<2x32xf32>
    %12 = tpu.matmul %10, %11, %cst_8 {dimension_numbers = #tpu.dot_dimension_numbers<[1], [0], [0], [1], [0, 0, 1, 1], [], []>} : vector<2x256xbf16>, vector<256x32xbf16>, vector<2x32xf32> -> vector<2x32xf32>
    %c0_9 = arith.constant 0 : index
    %c0_10 = arith.constant 0 : index
    %c0_11 = arith.constant 0 : index
    %13 = vector.load %arg5[%c0_9, %c0_10, %c0_11] : memref<1x2x32xf32, #tpu.memory_space<vmem>>, vector<1x2x32xf32>
    %14 = vector.shape_cast %13 : vector<1x2x32xf32> to vector<2x32xf32>
    %15 = vector.shape_cast %12 : vector<2x32xf32> to vector<1x2x32xf32>
    tpu.vector_store %arg5[%c0_9, %c0_10, %c0_11], %15 {strides = array<i32>} : memref<1x2x32xf32, #tpu.memory_space<vmem>>, vector<1x2x32xf32>,
    return
  }
  func.func @transform_0(%arg0: i32) -> (i32, i32, i32) {
    %c0_i32 = arith.constant 0 : i32
    %c0_i32_0 = arith.constant 0 : i32
    %c0_i32_1 = arith.constant 0 : i32
    return %arg0, %c0_i32, %c0_i32_0 : i32, i32, i32
  }
  func.func @transform_1(%arg0: i32) -> (i32, i32) {
    %c0_i32 = arith.constant 0 : i32
    %c0_i32_0 = arith.constant 0 : i32
    %c0_i32_1 = arith.constant 0 : i32
    return %c0_i32, %c0_i32_0 : i32, i32
  }
  func.func @transform_2(%arg0: i32) -> (i32, i32) {
    %c0_i32 = arith.constant 0 : i32
    %c0_i32_0 = arith.constant 0 : i32
    %c0_i32_1 = arith.constant 0 : i32
    return %c0_i32, %c0_i32_0 : i32, i32
  }
  func.func @transform_3(%arg0: i32) -> (i32, i32) {
    %c0_i32 = arith.constant 0 : i32
    %c0_i32_0 = arith.constant 0 : i32
    %c0_i32_1 = arith.constant 0 : i32
    return %c0_i32, %c0_i32_0 : i32, i32
  }
  func.func @transform_4(%arg0: i32) -> (i32, i32, i32) {
    %c0_i32 = arith.constant 0 : i32
    %c0_i32_0 = arith.constant 0 : i32
    %c0_i32_1 = arith.constant 0 : i32
    return %arg0, %c0_i32, %c0_i32_0 : i32, i32, i32
  }
}

module attributes {stable_mosaic.version = 11 : i64} {
  func.func @kernel(%arg0: i32, %arg1: memref<1x2x32xf32, #tpu.memory_space<vmem>>, %arg2: memref<1x32xf32, #tpu.memory_space<vmem>>, %arg3: memref<1x32xf32, #tpu.memory_space<vmem>>, %arg4: memref<32x64xbf16, #tpu.memory_space<vmem>>, %arg5: memref<1x64xf32, #tpu.memory_space<vmem>>, %arg6: memref<1x64xf32, #tpu.memory_space<vmem>>, %arg7: memref<3x64x16xbf16, #tpu.memory_space<vmem>>, %arg8: memref<1x2x16xf32, #tpu.memory_space<vmem>>, %arg9: memref<4x64xf32, #tpu.memory_space<vmem>>) attributes {dimension_semantics = [#tpu.dimension_semantics<parallel>], iteration_bounds = array<i64: 2>, scalar_prefetch = 0 : i64, scratch_operands = 1 : i64, tpu.core_type = #tpu.core_type<tc>, window_params = [{transform_indices = @transform_0, window_bounds = array<i64: 1, 2, 32>}, {pipeline_mode = #tpu.pipeline_mode<synchronous>, transform_indices = @transform_1, window_bounds = array<i64: 1, 32>}, {pipeline_mode = #tpu.pipeline_mode<synchronous>, transform_indices = @transform_2, window_bounds = array<i64: 1, 32>}, {pipeline_mode = #tpu.pipeline_mode<synchronous>, transform_indices = @transform_3, window_bounds = array<i64: 32, 64>}, {pipeline_mode = #tpu.pipeline_mode<synchronous>, transform_indices = @transform_4, window_bounds = array<i64: 1, 64>}, {pipeline_mode = #tpu.pipeline_mode<synchronous>, transform_indices = @transform_5, window_bounds = array<i64: 1, 64>}, {pipeline_mode = #tpu.pipeline_mode<synchronous>, transform_indices = @transform_6, window_bounds = array<i64: 3, 64, 16>}, {transform_indices = @transform_7, window_bounds = array<i64: 1, 2, 16>}]} {
    %c0 = arith.constant 0 : index
    %c0_0 = arith.constant 0 : index
    %c0_1 = arith.constant 0 : index
    %0 = vector.load %arg1[%c0, %c0_0, %c0_1] : memref<1x2x32xf32, #tpu.memory_space<vmem>>, vector<1x2x32xf32>
    %1 = vector.shape_cast %0 : vector<1x2x32xf32> to vector<2x32xf32>
    %c0_2 = arith.constant 0 : index
    %c0_3 = arith.constant 0 : index
    %2 = vector.load %arg2[%c0_2, %c0_3] : memref<1x32xf32, #tpu.memory_space<vmem>>, vector<1x32xf32>
    %3 = vector.broadcast %2 : vector<1x32xf32> to vector<2x32xf32>
    %4 = arith.mulf %1, %3 : vector<2x32xf32>
    %c0_4 = arith.constant 0 : index
    %c0_5 = arith.constant 0 : index
    %5 = vector.load %arg3[%c0_4, %c0_5] : memref<1x32xf32, #tpu.memory_space<vmem>>, vector<1x32xf32>
    %6 = vector.broadcast %5 : vector<1x32xf32> to vector<2x32xf32>
    %7 = arith.addf %4, %6 : vector<2x32xf32>
    %cst = arith.constant 0.000000e+00 : f32
    %8 = vector.broadcast %cst : f32 to vector<2x32xf32>
    %9 = arith.maximumf %7, %8 : vector<2x32xf32>
    %10 = arith.truncf %9 : vector<2x32xf32> to vector<2x32xbf16>
    %c0_6 = arith.constant 0 : index
    %c0_7 = arith.constant 0 : index
    %11 = vector.load %arg4[%c0_6, %c0_7] : memref<32x64xbf16, #tpu.memory_space<vmem>>, vector<32x64xbf16>
    %cst_8 = arith.constant dense<0.000000e+00> : vector<2x64xf32>
    %12 = tpu.matmul %10, %11, %cst_8 {dimension_numbers = #tpu.dot_dimension_numbers<[1], [0], [0], [1], [0, 0, 1, 1], [], []>} : vector<2x32xbf16>, vector<32x64xbf16>, vector<2x64xf32> -> vector<2x64xf32>
    %c0_9 = arith.constant 0 : index
    %c0_10 = arith.constant 0 : index
    %13 = vector.load %arg5[%c0_9, %c0_10] : memref<1x64xf32, #tpu.memory_space<vmem>>, vector<1x64xf32>
    %14 = vector.broadcast %13 : vector<1x64xf32> to vector<2x64xf32>
    %15 = arith.mulf %12, %14 : vector<2x64xf32>
    %c0_11 = arith.constant 0 : index
    %c0_12 = arith.constant 0 : index
    %16 = vector.load %arg6[%c0_11, %c0_12] : memref<1x64xf32, #tpu.memory_space<vmem>>, vector<1x64xf32>
    %17 = vector.broadcast %16 : vector<1x64xf32> to vector<2x64xf32>
    %18 = arith.addf %15, %17 : vector<2x64xf32>
    %cst_13 = arith.constant 0.000000e+00 : f32
    %19 = vector.broadcast %cst_13 : f32 to vector<2x64xf32>
    %20 = arith.maximumf %18, %19 : vector<2x64xf32>
    %cst_14 = arith.constant 0.000000e+00 : f32
    %21 = vector.broadcast %cst_14 : f32 to vector<4x64xf32>
    %c0_15 = arith.constant 0 : index
    %c0_16 = arith.constant 0 : index
    %22 = vector.load %arg9[%c0_15, %c0_16] : memref<4x64xf32, #tpu.memory_space<vmem>>, vector<4x64xf32>
    tpu.vector_store %arg9[%c0_15, %c0_16], %21 {strides = array<i32>} : memref<4x64xf32, #tpu.memory_space<vmem>>, vector<4x64xf32>,
    %c1 = arith.constant 1 : index
    %c0_17 = arith.constant 0 : index
    %23 = vector.load %arg9[%c1, %c0_17] : memref<4x64xf32, #tpu.memory_space<vmem>>, vector<2x64xf32>
    tpu.vector_store %arg9[%c1, %c0_17], %20 {strides = array<i32>} : memref<4x64xf32, #tpu.memory_space<vmem>>, vector<2x64xf32>,
    %c0_18 = arith.constant 0 : index
    %c0_19 = arith.constant 0 : index
    %24 = vector.load %arg9[%c0_18, %c0_19] : memref<4x64xf32, #tpu.memory_space<vmem>>, vector<2x64xf32>
    %25 = arith.truncf %24 : vector<2x64xf32> to vector<2x64xbf16>
    %c0_20 = arith.constant 0 : index
    %c0_21 = arith.constant 0 : index
    %c0_22 = arith.constant 0 : index
    %26 = vector.load %arg7[%c0_20, %c0_21, %c0_22] : memref<3x64x16xbf16, #tpu.memory_space<vmem>>, vector<1x64x16xbf16>
    %27 = vector.shape_cast %26 : vector<1x64x16xbf16> to vector<64x16xbf16>
    %cst_23 = arith.constant dense<0.000000e+00> : vector<2x16xf32>
    %28 = tpu.matmul %25, %27, %cst_23 {dimension_numbers = #tpu.dot_dimension_numbers<[1], [0], [0], [1], [0, 0, 1, 1], [], []>} : vector<2x64xbf16>, vector<64x16xbf16>, vector<2x16xf32> -> vector<2x16xf32>
    %c1_24 = arith.constant 1 : index
    %c0_25 = arith.constant 0 : index
    %29 = vector.load %arg9[%c1_24, %c0_25] : memref<4x64xf32, #tpu.memory_space<vmem>>, vector<2x64xf32>
    %30 = arith.truncf %29 : vector<2x64xf32> to vector<2x64xbf16>
    %c1_26 = arith.constant 1 : index
    %c0_27 = arith.constant 0 : index
    %c0_28 = arith.constant 0 : index
    %31 = vector.load %arg7[%c1_26, %c0_27, %c0_28] : memref<3x64x16xbf16, #tpu.memory_space<vmem>>, vector<1x64x16xbf16>
    %32 = vector.shape_cast %31 : vector<1x64x16xbf16> to vector<64x16xbf16>
    %cst_29 = arith.constant dense<0.000000e+00> : vector<2x16xf32>
    %33 = tpu.matmul %30, %32, %cst_29 {dimension_numbers = #tpu.dot_dimension_numbers<[1], [0], [0], [1], [0, 0, 1, 1], [], []>} : vector<2x64xbf16>, vector<64x16xbf16>, vector<2x16xf32> -> vector<2x16xf32>
    %34 = arith.addf %28, %33 : vector<2x16xf32>
    %c2 = arith.constant 2 : index
    %c0_30 = arith.constant 0 : index
    %35 = vector.load %arg9[%c2, %c0_30] : memref<4x64xf32, #tpu.memory_space<vmem>>, vector<2x64xf32>
    %36 = arith.truncf %35 : vector<2x64xf32> to vector<2x64xbf16>
    %c2_31 = arith.constant 2 : index
    %c0_32 = arith.constant 0 : index
    %c0_33 = arith.constant 0 : index
    %37 = vector.load %arg7[%c2_31, %c0_32, %c0_33] : memref<3x64x16xbf16, #tpu.memory_space<vmem>>, vector<1x64x16xbf16>
    %38 = vector.shape_cast %37 : vector<1x64x16xbf16> to vector<64x16xbf16>
    %cst_34 = arith.constant dense<0.000000e+00> : vector<2x16xf32>
    %39 = tpu.matmul %36, %38, %cst_34 {dimension_numbers = #tpu.dot_dimension_numbers<[1], [0], [0], [1], [0, 0, 1, 1], [], []>} : vector<2x64xbf16>, vector<64x16xbf16>, vector<2x16xf32> -> vector<2x16xf32>
    %40 = arith.addf %34, %39 : vector<2x16xf32>
    %c0_35 = arith.constant 0 : index
    %c0_36 = arith.constant 0 : index
    %c0_37 = arith.constant 0 : index
    %41 = vector.load %arg8[%c0_35, %c0_36, %c0_37] : memref<1x2x16xf32, #tpu.memory_space<vmem>>, vector<1x2x16xf32>
    %42 = vector.shape_cast %41 : vector<1x2x16xf32> to vector<2x16xf32>
    %43 = vector.shape_cast %40 : vector<2x16xf32> to vector<1x2x16xf32>
    tpu.vector_store %arg8[%c0_35, %c0_36, %c0_37], %43 {strides = array<i32>} : memref<1x2x16xf32, #tpu.memory_space<vmem>>, vector<1x2x16xf32>,
    return
  }
  func.func @transform_0(%arg0: i32) -> (i32, i32, i32) {
    %c0_i32 = arith.constant 0 : i32
    %c0_i32_0 = arith.constant 0 : i32
    %c0_i32_1 = arith.constant 0 : i32
    return %arg0, %c0_i32, %c0_i32_0 : i32, i32, i32
  }
  func.func @transform_1(%arg0: i32) -> (i32, i32) {
    %c0_i32 = arith.constant 0 : i32
    %c0_i32_0 = arith.constant 0 : i32
    %c0_i32_1 = arith.constant 0 : i32
    return %c0_i32, %c0_i32_0 : i32, i32
  }
  func.func @transform_2(%arg0: i32) -> (i32, i32) {
    %c0_i32 = arith.constant 0 : i32
    %c0_i32_0 = arith.constant 0 : i32
    %c0_i32_1 = arith.constant 0 : i32
    return %c0_i32, %c0_i32_0 : i32, i32
  }
  func.func @transform_3(%arg0: i32) -> (i32, i32) {
    %c0_i32 = arith.constant 0 : i32
    %c0_i32_0 = arith.constant 0 : i32
    %c0_i32_1 = arith.constant 0 : i32
    return %c0_i32, %c0_i32_0 : i32, i32
  }
  func.func @transform_4(%arg0: i32) -> (i32, i32) {
    %c0_i32 = arith.constant 0 : i32
    %c0_i32_0 = arith.constant 0 : i32
    %c0_i32_1 = arith.constant 0 : i32
    return %c0_i32, %c0_i32_0 : i32, i32
  }
  func.func @transform_5(%arg0: i32) -> (i32, i32) {
    %c0_i32 = arith.constant 0 : i32
    %c0_i32_0 = arith.constant 0 : i32
    %c0_i32_1 = arith.constant 0 : i32
    return %c0_i32, %c0_i32_0 : i32, i32
  }
  func.func @transform_6(%arg0: i32) -> (i32, i32, i32) {
    %c0_i32 = arith.constant 0 : i32
    %c0_i32_0 = arith.constant 0 : i32
    %c0_i32_1 = arith.constant 0 : i32
    %c0_i32_2 = arith.constant 0 : i32
    return %c0_i32, %c0_i32_0, %c0_i32_1 : i32, i32, i32
  }
  func.func @transform_7(%arg0: i32) -> (i32, i32, i32) {
    %c0_i32 = arith.constant 0 : i32
    %c0_i32_0 = arith.constant 0 : i32
    %c0_i32_1 = arith.constant 0 : i32
    return %arg0, %c0_i32, %c0_i32_0 : i32, i32, i32
  }
}

module attributes {stable_mosaic.version = 11 : i64} {
  func.func @kernel(%arg0: i32, %arg1: memref<1x2x48xf32, #tpu.memory_space<vmem>>, %arg2: memref<1x48xf32, #tpu.memory_space<vmem>>, %arg3: memref<1x48xf32, #tpu.memory_space<vmem>>, %arg4: memref<48x64xbf16, #tpu.memory_space<vmem>>, %arg5: memref<1x64xf32, #tpu.memory_space<vmem>>, %arg6: memref<1x64xf32, #tpu.memory_space<vmem>>, %arg7: memref<3x64x16xbf16, #tpu.memory_space<vmem>>, %arg8: memref<1x2x16xf32, #tpu.memory_space<vmem>>, %arg9: memref<4x64xf32, #tpu.memory_space<vmem>>) attributes {dimension_semantics = [#tpu.dimension_semantics<parallel>], iteration_bounds = array<i64: 2>, scalar_prefetch = 0 : i64, scratch_operands = 1 : i64, tpu.core_type = #tpu.core_type<tc>, window_params = [{transform_indices = @transform_0, window_bounds = array<i64: 1, 2, 48>}, {pipeline_mode = #tpu.pipeline_mode<synchronous>, transform_indices = @transform_1, window_bounds = array<i64: 1, 48>}, {pipeline_mode = #tpu.pipeline_mode<synchronous>, transform_indices = @transform_2, window_bounds = array<i64: 1, 48>}, {pipeline_mode = #tpu.pipeline_mode<synchronous>, transform_indices = @transform_3, window_bounds = array<i64: 48, 64>}, {pipeline_mode = #tpu.pipeline_mode<synchronous>, transform_indices = @transform_4, window_bounds = array<i64: 1, 64>}, {pipeline_mode = #tpu.pipeline_mode<synchronous>, transform_indices = @transform_5, window_bounds = array<i64: 1, 64>}, {pipeline_mode = #tpu.pipeline_mode<synchronous>, transform_indices = @transform_6, window_bounds = array<i64: 3, 64, 16>}, {transform_indices = @transform_7, window_bounds = array<i64: 1, 2, 16>}]} {
    %c0 = arith.constant 0 : index
    %c0_0 = arith.constant 0 : index
    %c0_1 = arith.constant 0 : index
    %0 = vector.load %arg1[%c0, %c0_0, %c0_1] : memref<1x2x48xf32, #tpu.memory_space<vmem>>, vector<1x2x48xf32>
    %1 = vector.shape_cast %0 : vector<1x2x48xf32> to vector<2x48xf32>
    %c0_2 = arith.constant 0 : index
    %c0_3 = arith.constant 0 : index
    %2 = vector.load %arg2[%c0_2, %c0_3] : memref<1x48xf32, #tpu.memory_space<vmem>>, vector<1x48xf32>
    %3 = vector.broadcast %2 : vector<1x48xf32> to vector<2x48xf32>
    %4 = arith.mulf %1, %3 : vector<2x48xf32>
    %c0_4 = arith.constant 0 : index
    %c0_5 = arith.constant 0 : index
    %5 = vector.load %arg3[%c0_4, %c0_5] : memref<1x48xf32, #tpu.memory_space<vmem>>, vector<1x48xf32>
    %6 = vector.broadcast %5 : vector<1x48xf32> to vector<2x48xf32>
    %7 = arith.addf %4, %6 : vector<2x48xf32>
    %cst = arith.constant 0.000000e+00 : f32
    %8 = vector.broadcast %cst : f32 to vector<2x48xf32>
    %9 = arith.maximumf %7, %8 : vector<2x48xf32>
    %10 = arith.truncf %9 : vector<2x48xf32> to vector<2x48xbf16>
    %c0_6 = arith.constant 0 : index
    %c0_7 = arith.constant 0 : index
    %11 = vector.load %arg4[%c0_6, %c0_7] : memref<48x64xbf16, #tpu.memory_space<vmem>>, vector<48x64xbf16>
    %cst_8 = arith.constant dense<0.000000e+00> : vector<2x64xf32>
    %12 = tpu.matmul %10, %11, %cst_8 {dimension_numbers = #tpu.dot_dimension_numbers<[1], [0], [0], [1], [0, 0, 1, 1], [], []>} : vector<2x48xbf16>, vector<48x64xbf16>, vector<2x64xf32> -> vector<2x64xf32>
    %c0_9 = arith.constant 0 : index
    %c0_10 = arith.constant 0 : index
    %13 = vector.load %arg5[%c0_9, %c0_10] : memref<1x64xf32, #tpu.memory_space<vmem>>, vector<1x64xf32>
    %14 = vector.broadcast %13 : vector<1x64xf32> to vector<2x64xf32>
    %15 = arith.mulf %12, %14 : vector<2x64xf32>
    %c0_11 = arith.constant 0 : index
    %c0_12 = arith.constant 0 : index
    %16 = vector.load %arg6[%c0_11, %c0_12] : memref<1x64xf32, #tpu.memory_space<vmem>>, vector<1x64xf32>
    %17 = vector.broadcast %16 : vector<1x64xf32> to vector<2x64xf32>
    %18 = arith.addf %15, %17 : vector<2x64xf32>
    %cst_13 = arith.constant 0.000000e+00 : f32
    %19 = vector.broadcast %cst_13 : f32 to vector<2x64xf32>
    %20 = arith.maximumf %18, %19 : vector<2x64xf32>
    %cst_14 = arith.constant 0.000000e+00 : f32
    %21 = vector.broadcast %cst_14 : f32 to vector<4x64xf32>
    %c0_15 = arith.constant 0 : index
    %c0_16 = arith.constant 0 : index
    %22 = vector.load %arg9[%c0_15, %c0_16] : memref<4x64xf32, #tpu.memory_space<vmem>>, vector<4x64xf32>
    tpu.vector_store %arg9[%c0_15, %c0_16], %21 {strides = array<i32>} : memref<4x64xf32, #tpu.memory_space<vmem>>, vector<4x64xf32>,
    %c1 = arith.constant 1 : index
    %c0_17 = arith.constant 0 : index
    %23 = vector.load %arg9[%c1, %c0_17] : memref<4x64xf32, #tpu.memory_space<vmem>>, vector<2x64xf32>
    tpu.vector_store %arg9[%c1, %c0_17], %20 {strides = array<i32>} : memref<4x64xf32, #tpu.memory_space<vmem>>, vector<2x64xf32>,
    %c0_18 = arith.constant 0 : index
    %c0_19 = arith.constant 0 : index
    %24 = vector.load %arg9[%c0_18, %c0_19] : memref<4x64xf32, #tpu.memory_space<vmem>>, vector<2x64xf32>
    %25 = arith.truncf %24 : vector<2x64xf32> to vector<2x64xbf16>
    %c0_20 = arith.constant 0 : index
    %c0_21 = arith.constant 0 : index
    %c0_22 = arith.constant 0 : index
    %26 = vector.load %arg7[%c0_20, %c0_21, %c0_22] : memref<3x64x16xbf16, #tpu.memory_space<vmem>>, vector<1x64x16xbf16>
    %27 = vector.shape_cast %26 : vector<1x64x16xbf16> to vector<64x16xbf16>
    %cst_23 = arith.constant dense<0.000000e+00> : vector<2x16xf32>
    %28 = tpu.matmul %25, %27, %cst_23 {dimension_numbers = #tpu.dot_dimension_numbers<[1], [0], [0], [1], [0, 0, 1, 1], [], []>} : vector<2x64xbf16>, vector<64x16xbf16>, vector<2x16xf32> -> vector<2x16xf32>
    %c1_24 = arith.constant 1 : index
    %c0_25 = arith.constant 0 : index
    %29 = vector.load %arg9[%c1_24, %c0_25] : memref<4x64xf32, #tpu.memory_space<vmem>>, vector<2x64xf32>
    %30 = arith.truncf %29 : vector<2x64xf32> to vector<2x64xbf16>
    %c1_26 = arith.constant 1 : index
    %c0_27 = arith.constant 0 : index
    %c0_28 = arith.constant 0 : index
    %31 = vector.load %arg7[%c1_26, %c0_27, %c0_28] : memref<3x64x16xbf16, #tpu.memory_space<vmem>>, vector<1x64x16xbf16>
    %32 = vector.shape_cast %31 : vector<1x64x16xbf16> to vector<64x16xbf16>
    %cst_29 = arith.constant dense<0.000000e+00> : vector<2x16xf32>
    %33 = tpu.matmul %30, %32, %cst_29 {dimension_numbers = #tpu.dot_dimension_numbers<[1], [0], [0], [1], [0, 0, 1, 1], [], []>} : vector<2x64xbf16>, vector<64x16xbf16>, vector<2x16xf32> -> vector<2x16xf32>
    %34 = arith.addf %28, %33 : vector<2x16xf32>
    %c2 = arith.constant 2 : index
    %c0_30 = arith.constant 0 : index
    %35 = vector.load %arg9[%c2, %c0_30] : memref<4x64xf32, #tpu.memory_space<vmem>>, vector<2x64xf32>
    %36 = arith.truncf %35 : vector<2x64xf32> to vector<2x64xbf16>
    %c2_31 = arith.constant 2 : index
    %c0_32 = arith.constant 0 : index
    %c0_33 = arith.constant 0 : index
    %37 = vector.load %arg7[%c2_31, %c0_32, %c0_33] : memref<3x64x16xbf16, #tpu.memory_space<vmem>>, vector<1x64x16xbf16>
    %38 = vector.shape_cast %37 : vector<1x64x16xbf16> to vector<64x16xbf16>
    %cst_34 = arith.constant dense<0.000000e+00> : vector<2x16xf32>
    %39 = tpu.matmul %36, %38, %cst_34 {dimension_numbers = #tpu.dot_dimension_numbers<[1], [0], [0], [1], [0, 0, 1, 1], [], []>} : vector<2x64xbf16>, vector<64x16xbf16>, vector<2x16xf32> -> vector<2x16xf32>
    %40 = arith.addf %34, %39 : vector<2x16xf32>
    %c0_35 = arith.constant 0 : index
    %c0_36 = arith.constant 0 : index
    %c0_37 = arith.constant 0 : index
    %41 = vector.load %arg8[%c0_35, %c0_36, %c0_37] : memref<1x2x16xf32, #tpu.memory_space<vmem>>, vector<1x2x16xf32>
    %42 = vector.shape_cast %41 : vector<1x2x16xf32> to vector<2x16xf32>
    %43 = vector.shape_cast %40 : vector<2x16xf32> to vector<1x2x16xf32>
    tpu.vector_store %arg8[%c0_35, %c0_36, %c0_37], %43 {strides = array<i32>} : memref<1x2x16xf32, #tpu.memory_space<vmem>>, vector<1x2x16xf32>,
    return
  }
  func.func @transform_0(%arg0: i32) -> (i32, i32, i32) {
    %c0_i32 = arith.constant 0 : i32
    %c0_i32_0 = arith.constant 0 : i32
    %c0_i32_1 = arith.constant 0 : i32
    return %arg0, %c0_i32, %c0_i32_0 : i32, i32, i32
  }
  func.func @transform_1(%arg0: i32) -> (i32, i32) {
    %c0_i32 = arith.constant 0 : i32
    %c0_i32_0 = arith.constant 0 : i32
    %c0_i32_1 = arith.constant 0 : i32
    return %c0_i32, %c0_i32_0 : i32, i32
  }
  func.func @transform_2(%arg0: i32) -> (i32, i32) {
    %c0_i32 = arith.constant 0 : i32
    %c0_i32_0 = arith.constant 0 : i32
    %c0_i32_1 = arith.constant 0 : i32
    return %c0_i32, %c0_i32_0 : i32, i32
  }
  func.func @transform_3(%arg0: i32) -> (i32, i32) {
    %c0_i32 = arith.constant 0 : i32
    %c0_i32_0 = arith.constant 0 : i32
    %c0_i32_1 = arith.constant 0 : i32
    return %c0_i32, %c0_i32_0 : i32, i32
  }
  func.func @transform_4(%arg0: i32) -> (i32, i32) {
    %c0_i32 = arith.constant 0 : i32
    %c0_i32_0 = arith.constant 0 : i32
    %c0_i32_1 = arith.constant 0 : i32
    return %c0_i32, %c0_i32_0 : i32, i32
  }
  func.func @transform_5(%arg0: i32) -> (i32, i32) {
    %c0_i32 = arith.constant 0 : i32
    %c0_i32_0 = arith.constant 0 : i32
    %c0_i32_1 = arith.constant 0 : i32
    return %c0_i32, %c0_i32_0 : i32, i32
  }
  func.func @transform_6(%arg0: i32) -> (i32, i32, i32) {
    %c0_i32 = arith.constant 0 : i32
    %c0_i32_0 = arith.constant 0 : i32
    %c0_i32_1 = arith.constant 0 : i32
    %c0_i32_2 = arith.constant 0 : i32
    return %c0_i32, %c0_i32_0, %c0_i32_1 : i32, i32, i32
  }
  func.func @transform_7(%arg0: i32) -> (i32, i32, i32) {
    %c0_i32 = arith.constant 0 : i32
    %c0_i32_0 = arith.constant 0 : i32
    %c0_i32_1 = arith.constant 0 : i32
    return %arg0, %c0_i32, %c0_i32_0 : i32, i32, i32
  }
}

module attributes {stable_mosaic.version = 11 : i64} {
  func.func @kernel(%arg0: i32, %arg1: memref<1x1x128xf32, #tpu.memory_space<vmem>>, %arg2: memref<1x128xf32, #tpu.memory_space<vmem>>, %arg3: memref<1x128xf32, #tpu.memory_space<vmem>>, %arg4: memref<128x16xbf16, #tpu.memory_space<vmem>>, %arg5: memref<1x1x16xf32, #tpu.memory_space<vmem>>) attributes {dimension_semantics = [#tpu.dimension_semantics<parallel>], iteration_bounds = array<i64: 2>, scalar_prefetch = 0 : i64, scratch_operands = 0 : i64, tpu.core_type = #tpu.core_type<tc>, window_params = [{transform_indices = @transform_0, window_bounds = array<i64: 1, 1, 128>}, {pipeline_mode = #tpu.pipeline_mode<synchronous>, transform_indices = @transform_1, window_bounds = array<i64: 1, 128>}, {pipeline_mode = #tpu.pipeline_mode<synchronous>, transform_indices = @transform_2, window_bounds = array<i64: 1, 128>}, {pipeline_mode = #tpu.pipeline_mode<synchronous>, transform_indices = @transform_3, window_bounds = array<i64: 128, 16>}, {transform_indices = @transform_4, window_bounds = array<i64: 1, 1, 16>}]} {
    %c0 = arith.constant 0 : index
    %c0_0 = arith.constant 0 : index
    %c0_1 = arith.constant 0 : index
    %0 = vector.load %arg1[%c0, %c0_0, %c0_1] : memref<1x1x128xf32, #tpu.memory_space<vmem>>, vector<1x1x128xf32>
    %1 = vector.shape_cast %0 : vector<1x1x128xf32> to vector<1x128xf32>
    %c0_2 = arith.constant 0 : index
    %c0_3 = arith.constant 0 : index
    %2 = vector.load %arg2[%c0_2, %c0_3] : memref<1x128xf32, #tpu.memory_space<vmem>>, vector<1x128xf32>
    %3 = arith.mulf %1, %2 : vector<1x128xf32>
    %c0_4 = arith.constant 0 : index
    %c0_5 = arith.constant 0 : index
    %4 = vector.load %arg3[%c0_4, %c0_5] : memref<1x128xf32, #tpu.memory_space<vmem>>, vector<1x128xf32>
    %5 = arith.addf %3, %4 : vector<1x128xf32>
    %cst = arith.constant 0.000000e+00 : f32
    %6 = vector.broadcast %cst : f32 to vector<1x128xf32>
    %7 = arith.maximumf %5, %6 : vector<1x128xf32>
    %8 = arith.truncf %7 : vector<1x128xf32> to vector<1x128xbf16>
    %c0_6 = arith.constant 0 : index
    %c0_7 = arith.constant 0 : index
    %9 = vector.load %arg4[%c0_6, %c0_7] : memref<128x16xbf16, #tpu.memory_space<vmem>>, vector<128x16xbf16>
    %cst_8 = arith.constant dense<0.000000e+00> : vector<1x16xf32>
    %10 = tpu.matmul %8, %9, %cst_8 {dimension_numbers = #tpu.dot_dimension_numbers<[1], [0], [0], [1], [0, 0, 1, 1], [], []>} : vector<1x128xbf16>, vector<128x16xbf16>, vector<1x16xf32> -> vector<1x16xf32>
    %c0_9 = arith.constant 0 : index
    %c0_10 = arith.constant 0 : index
    %c0_11 = arith.constant 0 : index
    %11 = vector.load %arg5[%c0_9, %c0_10, %c0_11] : memref<1x1x16xf32, #tpu.memory_space<vmem>>, vector<1x1x16xf32>
    %12 = vector.shape_cast %11 : vector<1x1x16xf32> to vector<1x16xf32>
    %13 = vector.shape_cast %10 : vector<1x16xf32> to vector<1x1x16xf32>
    tpu.vector_store %arg5[%c0_9, %c0_10, %c0_11], %13 {strides = array<i32>} : memref<1x1x16xf32, #tpu.memory_space<vmem>>, vector<1x1x16xf32>,
    return
  }
  func.func @transform_0(%arg0: i32) -> (i32, i32, i32) {
    %c0_i32 = arith.constant 0 : i32
    %c0_i32_0 = arith.constant 0 : i32
    %c0_i32_1 = arith.constant 0 : i32
    return %arg0, %c0_i32, %c0_i32_0 : i32, i32, i32
  }
  func.func @transform_1(%arg0: i32) -> (i32, i32) {
    %c0_i32 = arith.constant 0 : i32
    %c0_i32_0 = arith.constant 0 : i32
    %c0_i32_1 = arith.constant 0 : i32
    return %c0_i32, %c0_i32_0 : i32, i32
  }
  func.func @transform_2(%arg0: i32) -> (i32, i32) {
    %c0_i32 = arith.constant 0 : i32
    %c0_i32_0 = arith.constant 0 : i32
    %c0_i32_1 = arith.constant 0 : i32
    return %c0_i32, %c0_i32_0 : i32, i32
  }
  func.func @transform_3(%arg0: i32) -> (i32, i32) {
    %c0_i32 = arith.constant 0 : i32
    %c0_i32_0 = arith.constant 0 : i32
    %c0_i32_1 = arith.constant 0 : i32
    return %c0_i32, %c0_i32_0 : i32, i32
  }
  func.func @transform_4(%arg0: i32) -> (i32, i32, i32) {
    %c0_i32 = arith.constant 0 : i32
    %c0_i32_0 = arith.constant 0 : i32
    %c0_i32_1 = arith.constant 0 : i32
    return %arg0, %c0_i32, %c0_i32_0 : i32, i32, i32
  }
}

module attributes {stable_mosaic.version = 11 : i64} {
  func.func @kernel(%arg0: i32, %arg1: memref<1x1x16xf32, #tpu.memory_space<vmem>>, %arg2: memref<1x16xf32, #tpu.memory_space<vmem>>, %arg3: memref<1x16xf32, #tpu.memory_space<vmem>>, %arg4: memref<16x32xbf16, #tpu.memory_space<vmem>>, %arg5: memref<1x32xf32, #tpu.memory_space<vmem>>, %arg6: memref<1x32xf32, #tpu.memory_space<vmem>>, %arg7: memref<3x32x8xbf16, #tpu.memory_space<vmem>>, %arg8: memref<1x1x8xf32, #tpu.memory_space<vmem>>, %arg9: memref<3x32xf32, #tpu.memory_space<vmem>>) attributes {dimension_semantics = [#tpu.dimension_semantics<parallel>], iteration_bounds = array<i64: 2>, scalar_prefetch = 0 : i64, scratch_operands = 1 : i64, tpu.core_type = #tpu.core_type<tc>, window_params = [{transform_indices = @transform_0, window_bounds = array<i64: 1, 1, 16>}, {pipeline_mode = #tpu.pipeline_mode<synchronous>, transform_indices = @transform_1, window_bounds = array<i64: 1, 16>}, {pipeline_mode = #tpu.pipeline_mode<synchronous>, transform_indices = @transform_2, window_bounds = array<i64: 1, 16>}, {pipeline_mode = #tpu.pipeline_mode<synchronous>, transform_indices = @transform_3, window_bounds = array<i64: 16, 32>}, {pipeline_mode = #tpu.pipeline_mode<synchronous>, transform_indices = @transform_4, window_bounds = array<i64: 1, 32>}, {pipeline_mode = #tpu.pipeline_mode<synchronous>, transform_indices = @transform_5, window_bounds = array<i64: 1, 32>}, {pipeline_mode = #tpu.pipeline_mode<synchronous>, transform_indices = @transform_6, window_bounds = array<i64: 3, 32, 8>}, {transform_indices = @transform_7, window_bounds = array<i64: 1, 1, 8>}]} {
    %c0 = arith.constant 0 : index
    %c0_0 = arith.constant 0 : index
    %c0_1 = arith.constant 0 : index
    %0 = vector.load %arg1[%c0, %c0_0, %c0_1] : memref<1x1x16xf32, #tpu.memory_space<vmem>>, vector<1x1x16xf32>
    %1 = vector.shape_cast %0 : vector<1x1x16xf32> to vector<1x16xf32>
    %c0_2 = arith.constant 0 : index
    %c0_3 = arith.constant 0 : index
    %2 = vector.load %arg2[%c0_2, %c0_3] : memref<1x16xf32, #tpu.memory_space<vmem>>, vector<1x16xf32>
    %3 = arith.mulf %1, %2 : vector<1x16xf32>
    %c0_4 = arith.constant 0 : index
    %c0_5 = arith.constant 0 : index
    %4 = vector.load %arg3[%c0_4, %c0_5] : memref<1x16xf32, #tpu.memory_space<vmem>>, vector<1x16xf32>
    %5 = arith.addf %3, %4 : vector<1x16xf32>
    %cst = arith.constant 0.000000e+00 : f32
    %6 = vector.broadcast %cst : f32 to vector<1x16xf32>
    %7 = arith.maximumf %5, %6 : vector<1x16xf32>
    %8 = arith.truncf %7 : vector<1x16xf32> to vector<1x16xbf16>
    %c0_6 = arith.constant 0 : index
    %c0_7 = arith.constant 0 : index
    %9 = vector.load %arg4[%c0_6, %c0_7] : memref<16x32xbf16, #tpu.memory_space<vmem>>, vector<16x32xbf16>
    %cst_8 = arith.constant dense<0.000000e+00> : vector<1x32xf32>
    %10 = tpu.matmul %8, %9, %cst_8 {dimension_numbers = #tpu.dot_dimension_numbers<[1], [0], [0], [1], [0, 0, 1, 1], [], []>} : vector<1x16xbf16>, vector<16x32xbf16>, vector<1x32xf32> -> vector<1x32xf32>
    %c0_9 = arith.constant 0 : index
    %c0_10 = arith.constant 0 : index
    %11 = vector.load %arg5[%c0_9, %c0_10] : memref<1x32xf32, #tpu.memory_space<vmem>>, vector<1x32xf32>
    %12 = arith.mulf %10, %11 : vector<1x32xf32>
    %c0_11 = arith.constant 0 : index
    %c0_12 = arith.constant 0 : index
    %13 = vector.load %arg6[%c0_11, %c0_12] : memref<1x32xf32, #tpu.memory_space<vmem>>, vector<1x32xf32>
    %14 = arith.addf %12, %13 : vector<1x32xf32>
    %cst_13 = arith.constant 0.000000e+00 : f32
    %15 = vector.broadcast %cst_13 : f32 to vector<1x32xf32>
    %16 = arith.maximumf %14, %15 : vector<1x32xf32>
    %cst_14 = arith.constant 0.000000e+00 : f32
    %17 = vector.broadcast %cst_14 : f32 to vector<3x32xf32>
    %c0_15 = arith.constant 0 : index
    %c0_16 = arith.constant 0 : index
    %18 = vector.load %arg9[%c0_15, %c0_16] : memref<3x32xf32, #tpu.memory_space<vmem>>, vector<3x32xf32>
    tpu.vector_store %arg9[%c0_15, %c0_16], %17 {strides = array<i32>} : memref<3x32xf32, #tpu.memory_space<vmem>>, vector<3x32xf32>,
    %c1 = arith.constant 1 : index
    %c0_17 = arith.constant 0 : index
    %19 = vector.load %arg9[%c1, %c0_17] : memref<3x32xf32, #tpu.memory_space<vmem>>, vector<1x32xf32>
    tpu.vector_store %arg9[%c1, %c0_17], %16 {strides = array<i32>} : memref<3x32xf32, #tpu.memory_space<vmem>>, vector<1x32xf32>,
    %c0_18 = arith.constant 0 : index
    %c0_19 = arith.constant 0 : index
    %20 = vector.load %arg9[%c0_18, %c0_19] : memref<3x32xf32, #tpu.memory_space<vmem>>, vector<1x32xf32>
    %21 = arith.truncf %20 : vector<1x32xf32> to vector<1x32xbf16>
    %c0_20 = arith.constant 0 : index
    %c0_21 = arith.constant 0 : index
    %c0_22 = arith.constant 0 : index
    %22 = vector.load %arg7[%c0_20, %c0_21, %c0_22] : memref<3x32x8xbf16, #tpu.memory_space<vmem>>, vector<1x32x8xbf16>
    %23 = vector.shape_cast %22 : vector<1x32x8xbf16> to vector<32x8xbf16>
    %cst_23 = arith.constant dense<0.000000e+00> : vector<1x8xf32>
    %24 = tpu.matmul %21, %23, %cst_23 {dimension_numbers = #tpu.dot_dimension_numbers<[1], [0], [0], [1], [0, 0, 1, 1], [], []>} : vector<1x32xbf16>, vector<32x8xbf16>, vector<1x8xf32> -> vector<1x8xf32>
    %c1_24 = arith.constant 1 : index
    %c0_25 = arith.constant 0 : index
    %25 = vector.load %arg9[%c1_24, %c0_25] : memref<3x32xf32, #tpu.memory_space<vmem>>, vector<1x32xf32>
    %26 = arith.truncf %25 : vector<1x32xf32> to vector<1x32xbf16>
    %c1_26 = arith.constant 1 : index
    %c0_27 = arith.constant 0 : index
    %c0_28 = arith.constant 0 : index
    %27 = vector.load %arg7[%c1_26, %c0_27, %c0_28] : memref<3x32x8xbf16, #tpu.memory_space<vmem>>, vector<1x32x8xbf16>
    %28 = vector.shape_cast %27 : vector<1x32x8xbf16> to vector<32x8xbf16>
    %cst_29 = arith.constant dense<0.000000e+00> : vector<1x8xf32>
    %29 = tpu.matmul %26, %28, %cst_29 {dimension_numbers = #tpu.dot_dimension_numbers<[1], [0], [0], [1], [0, 0, 1, 1], [], []>} : vector<1x32xbf16>, vector<32x8xbf16>, vector<1x8xf32> -> vector<1x8xf32>
    %30 = arith.addf %24, %29 : vector<1x8xf32>
    %c2 = arith.constant 2 : index
    %c0_30 = arith.constant 0 : index
    %31 = vector.load %arg9[%c2, %c0_30] : memref<3x32xf32, #tpu.memory_space<vmem>>, vector<1x32xf32>
    %32 = arith.truncf %31 : vector<1x32xf32> to vector<1x32xbf16>
    %c2_31 = arith.constant 2 : index
    %c0_32 = arith.constant 0 : index
    %c0_33 = arith.constant 0 : index
    %33 = vector.load %arg7[%c2_31, %c0_32, %c0_33] : memref<3x32x8xbf16, #tpu.memory_space<vmem>>, vector<1x32x8xbf16>
    %34 = vector.shape_cast %33 : vector<1x32x8xbf16> to vector<32x8xbf16>
    %cst_34 = arith.constant dense<0.000000e+00> : vector<1x8xf32>
    %35 = tpu.matmul %32, %34, %cst_34 {dimension_numbers = #tpu.dot_dimension_numbers<[1], [0], [0], [1], [0, 0, 1, 1], [], []>} : vector<1x32xbf16>, vector<32x8xbf16>, vector<1x8xf32> -> vector<1x8xf32>
    %36 = arith.addf %30, %35 : vector<1x8xf32>
    %c0_35 = arith.constant 0 : index
    %c0_36 = arith.constant 0 : index
    %c0_37 = arith.constant 0 : index
    %37 = vector.load %arg8[%c0_35, %c0_36, %c0_37] : memref<1x1x8xf32, #tpu.memory_space<vmem>>, vector<1x1x8xf32>
    %38 = vector.shape_cast %37 : vector<1x1x8xf32> to vector<1x8xf32>
    %39 = vector.shape_cast %36 : vector<1x8xf32> to vector<1x1x8xf32>
    tpu.vector_store %arg8[%c0_35, %c0_36, %c0_37], %39 {strides = array<i32>} : memref<1x1x8xf32, #tpu.memory_space<vmem>>, vector<1x1x8xf32>,
    return
  }
  func.func @transform_0(%arg0: i32) -> (i32, i32, i32) {
    %c0_i32 = arith.constant 0 : i32
    %c0_i32_0 = arith.constant 0 : i32
    %c0_i32_1 = arith.constant 0 : i32
    return %arg0, %c0_i32, %c0_i32_0 : i32, i32, i32
  }
  func.func @transform_1(%arg0: i32) -> (i32, i32) {
    %c0_i32 = arith.constant 0 : i32
    %c0_i32_0 = arith.constant 0 : i32
    %c0_i32_1 = arith.constant 0 : i32
    return %c0_i32, %c0_i32_0 : i32, i32
  }
  func.func @transform_2(%arg0: i32) -> (i32, i32) {
    %c0_i32 = arith.constant 0 : i32
    %c0_i32_0 = arith.constant 0 : i32
    %c0_i32_1 = arith.constant 0 : i32
    return %c0_i32, %c0_i32_0 : i32, i32
  }
  func.func @transform_3(%arg0: i32) -> (i32, i32) {
    %c0_i32 = arith.constant 0 : i32
    %c0_i32_0 = arith.constant 0 : i32
    %c0_i32_1 = arith.constant 0 : i32
    return %c0_i32, %c0_i32_0 : i32, i32
  }
  func.func @transform_4(%arg0: i32) -> (i32, i32) {
    %c0_i32 = arith.constant 0 : i32
    %c0_i32_0 = arith.constant 0 : i32
    %c0_i32_1 = arith.constant 0 : i32
    return %c0_i32, %c0_i32_0 : i32, i32
  }
  func.func @transform_5(%arg0: i32) -> (i32, i32) {
    %c0_i32 = arith.constant 0 : i32
    %c0_i32_0 = arith.constant 0 : i32
    %c0_i32_1 = arith.constant 0 : i32
    return %c0_i32, %c0_i32_0 : i32, i32
  }
  func.func @transform_6(%arg0: i32) -> (i32, i32, i32) {
    %c0_i32 = arith.constant 0 : i32
    %c0_i32_0 = arith.constant 0 : i32
    %c0_i32_1 = arith.constant 0 : i32
    %c0_i32_2 = arith.constant 0 : i32
    return %c0_i32, %c0_i32_0, %c0_i32_1 : i32, i32, i32
  }
  func.func @transform_7(%arg0: i32) -> (i32, i32, i32) {
    %c0_i32 = arith.constant 0 : i32
    %c0_i32_0 = arith.constant 0 : i32
    %c0_i32_1 = arith.constant 0 : i32
    return %arg0, %c0_i32, %c0_i32_0 : i32, i32, i32
  }
}

module attributes {stable_mosaic.version = 11 : i64} {
  func.func @kernel(%arg0: i32, %arg1: memref<1x1x24xf32, #tpu.memory_space<vmem>>, %arg2: memref<1x24xf32, #tpu.memory_space<vmem>>, %arg3: memref<1x24xf32, #tpu.memory_space<vmem>>, %arg4: memref<24x32xbf16, #tpu.memory_space<vmem>>, %arg5: memref<1x32xf32, #tpu.memory_space<vmem>>, %arg6: memref<1x32xf32, #tpu.memory_space<vmem>>, %arg7: memref<3x32x8xbf16, #tpu.memory_space<vmem>>, %arg8: memref<1x1x8xf32, #tpu.memory_space<vmem>>, %arg9: memref<3x32xf32, #tpu.memory_space<vmem>>) attributes {dimension_semantics = [#tpu.dimension_semantics<parallel>], iteration_bounds = array<i64: 2>, scalar_prefetch = 0 : i64, scratch_operands = 1 : i64, tpu.core_type = #tpu.core_type<tc>, window_params = [{transform_indices = @transform_0, window_bounds = array<i64: 1, 1, 24>}, {pipeline_mode = #tpu.pipeline_mode<synchronous>, transform_indices = @transform_1, window_bounds = array<i64: 1, 24>}, {pipeline_mode = #tpu.pipeline_mode<synchronous>, transform_indices = @transform_2, window_bounds = array<i64: 1, 24>}, {pipeline_mode = #tpu.pipeline_mode<synchronous>, transform_indices = @transform_3, window_bounds = array<i64: 24, 32>}, {pipeline_mode = #tpu.pipeline_mode<synchronous>, transform_indices = @transform_4, window_bounds = array<i64: 1, 32>}, {pipeline_mode = #tpu.pipeline_mode<synchronous>, transform_indices = @transform_5, window_bounds = array<i64: 1, 32>}, {pipeline_mode = #tpu.pipeline_mode<synchronous>, transform_indices = @transform_6, window_bounds = array<i64: 3, 32, 8>}, {transform_indices = @transform_7, window_bounds = array<i64: 1, 1, 8>}]} {
    %c0 = arith.constant 0 : index
    %c0_0 = arith.constant 0 : index
    %c0_1 = arith.constant 0 : index
    %0 = vector.load %arg1[%c0, %c0_0, %c0_1] : memref<1x1x24xf32, #tpu.memory_space<vmem>>, vector<1x1x24xf32>
    %1 = vector.shape_cast %0 : vector<1x1x24xf32> to vector<1x24xf32>
    %c0_2 = arith.constant 0 : index
    %c0_3 = arith.constant 0 : index
    %2 = vector.load %arg2[%c0_2, %c0_3] : memref<1x24xf32, #tpu.memory_space<vmem>>, vector<1x24xf32>
    %3 = arith.mulf %1, %2 : vector<1x24xf32>
    %c0_4 = arith.constant 0 : index
    %c0_5 = arith.constant 0 : index
    %4 = vector.load %arg3[%c0_4, %c0_5] : memref<1x24xf32, #tpu.memory_space<vmem>>, vector<1x24xf32>
    %5 = arith.addf %3, %4 : vector<1x24xf32>
    %cst = arith.constant 0.000000e+00 : f32
    %6 = vector.broadcast %cst : f32 to vector<1x24xf32>
    %7 = arith.maximumf %5, %6 : vector<1x24xf32>
    %8 = arith.truncf %7 : vector<1x24xf32> to vector<1x24xbf16>
    %c0_6 = arith.constant 0 : index
    %c0_7 = arith.constant 0 : index
    %9 = vector.load %arg4[%c0_6, %c0_7] : memref<24x32xbf16, #tpu.memory_space<vmem>>, vector<24x32xbf16>
    %cst_8 = arith.constant dense<0.000000e+00> : vector<1x32xf32>
    %10 = tpu.matmul %8, %9, %cst_8 {dimension_numbers = #tpu.dot_dimension_numbers<[1], [0], [0], [1], [0, 0, 1, 1], [], []>} : vector<1x24xbf16>, vector<24x32xbf16>, vector<1x32xf32> -> vector<1x32xf32>
    %c0_9 = arith.constant 0 : index
    %c0_10 = arith.constant 0 : index
    %11 = vector.load %arg5[%c0_9, %c0_10] : memref<1x32xf32, #tpu.memory_space<vmem>>, vector<1x32xf32>
    %12 = arith.mulf %10, %11 : vector<1x32xf32>
    %c0_11 = arith.constant 0 : index
    %c0_12 = arith.constant 0 : index
    %13 = vector.load %arg6[%c0_11, %c0_12] : memref<1x32xf32, #tpu.memory_space<vmem>>, vector<1x32xf32>
    %14 = arith.addf %12, %13 : vector<1x32xf32>
    %cst_13 = arith.constant 0.000000e+00 : f32
    %15 = vector.broadcast %cst_13 : f32 to vector<1x32xf32>
    %16 = arith.maximumf %14, %15 : vector<1x32xf32>
    %cst_14 = arith.constant 0.000000e+00 : f32
    %17 = vector.broadcast %cst_14 : f32 to vector<3x32xf32>
    %c0_15 = arith.constant 0 : index
    %c0_16 = arith.constant 0 : index
    %18 = vector.load %arg9[%c0_15, %c0_16] : memref<3x32xf32, #tpu.memory_space<vmem>>, vector<3x32xf32>
    tpu.vector_store %arg9[%c0_15, %c0_16], %17 {strides = array<i32>} : memref<3x32xf32, #tpu.memory_space<vmem>>, vector<3x32xf32>,
    %c1 = arith.constant 1 : index
    %c0_17 = arith.constant 0 : index
    %19 = vector.load %arg9[%c1, %c0_17] : memref<3x32xf32, #tpu.memory_space<vmem>>, vector<1x32xf32>
    tpu.vector_store %arg9[%c1, %c0_17], %16 {strides = array<i32>} : memref<3x32xf32, #tpu.memory_space<vmem>>, vector<1x32xf32>,
    %c0_18 = arith.constant 0 : index
    %c0_19 = arith.constant 0 : index
    %20 = vector.load %arg9[%c0_18, %c0_19] : memref<3x32xf32, #tpu.memory_space<vmem>>, vector<1x32xf32>
    %21 = arith.truncf %20 : vector<1x32xf32> to vector<1x32xbf16>
    %c0_20 = arith.constant 0 : index
    %c0_21 = arith.constant 0 : index
    %c0_22 = arith.constant 0 : index
    %22 = vector.load %arg7[%c0_20, %c0_21, %c0_22] : memref<3x32x8xbf16, #tpu.memory_space<vmem>>, vector<1x32x8xbf16>
    %23 = vector.shape_cast %22 : vector<1x32x8xbf16> to vector<32x8xbf16>
    %cst_23 = arith.constant dense<0.000000e+00> : vector<1x8xf32>
    %24 = tpu.matmul %21, %23, %cst_23 {dimension_numbers = #tpu.dot_dimension_numbers<[1], [0], [0], [1], [0, 0, 1, 1], [], []>} : vector<1x32xbf16>, vector<32x8xbf16>, vector<1x8xf32> -> vector<1x8xf32>
    %c1_24 = arith.constant 1 : index
    %c0_25 = arith.constant 0 : index
    %25 = vector.load %arg9[%c1_24, %c0_25] : memref<3x32xf32, #tpu.memory_space<vmem>>, vector<1x32xf32>
    %26 = arith.truncf %25 : vector<1x32xf32> to vector<1x32xbf16>
    %c1_26 = arith.constant 1 : index
    %c0_27 = arith.constant 0 : index
    %c0_28 = arith.constant 0 : index
    %27 = vector.load %arg7[%c1_26, %c0_27, %c0_28] : memref<3x32x8xbf16, #tpu.memory_space<vmem>>, vector<1x32x8xbf16>
    %28 = vector.shape_cast %27 : vector<1x32x8xbf16> to vector<32x8xbf16>
    %cst_29 = arith.constant dense<0.000000e+00> : vector<1x8xf32>
    %29 = tpu.matmul %26, %28, %cst_29 {dimension_numbers = #tpu.dot_dimension_numbers<[1], [0], [0], [1], [0, 0, 1, 1], [], []>} : vector<1x32xbf16>, vector<32x8xbf16>, vector<1x8xf32> -> vector<1x8xf32>
    %30 = arith.addf %24, %29 : vector<1x8xf32>
    %c2 = arith.constant 2 : index
    %c0_30 = arith.constant 0 : index
    %31 = vector.load %arg9[%c2, %c0_30] : memref<3x32xf32, #tpu.memory_space<vmem>>, vector<1x32xf32>
    %32 = arith.truncf %31 : vector<1x32xf32> to vector<1x32xbf16>
    %c2_31 = arith.constant 2 : index
    %c0_32 = arith.constant 0 : index
    %c0_33 = arith.constant 0 : index
    %33 = vector.load %arg7[%c2_31, %c0_32, %c0_33] : memref<3x32x8xbf16, #tpu.memory_space<vmem>>, vector<1x32x8xbf16>
    %34 = vector.shape_cast %33 : vector<1x32x8xbf16> to vector<32x8xbf16>
    %cst_34 = arith.constant dense<0.000000e+00> : vector<1x8xf32>
    %35 = tpu.matmul %32, %34, %cst_34 {dimension_numbers = #tpu.dot_dimension_numbers<[1], [0], [0], [1], [0, 0, 1, 1], [], []>} : vector<1x32xbf16>, vector<32x8xbf16>, vector<1x8xf32> -> vector<1x8xf32>
    %36 = arith.addf %30, %35 : vector<1x8xf32>
    %c0_35 = arith.constant 0 : index
    %c0_36 = arith.constant 0 : index
    %c0_37 = arith.constant 0 : index
    %37 = vector.load %arg8[%c0_35, %c0_36, %c0_37] : memref<1x1x8xf32, #tpu.memory_space<vmem>>, vector<1x1x8xf32>
    %38 = vector.shape_cast %37 : vector<1x1x8xf32> to vector<1x8xf32>
    %39 = vector.shape_cast %36 : vector<1x8xf32> to vector<1x1x8xf32>
    tpu.vector_store %arg8[%c0_35, %c0_36, %c0_37], %39 {strides = array<i32>} : memref<1x1x8xf32, #tpu.memory_space<vmem>>, vector<1x1x8xf32>,
    return
  }
  func.func @transform_0(%arg0: i32) -> (i32, i32, i32) {
    %c0_i32 = arith.constant 0 : i32
    %c0_i32_0 = arith.constant 0 : i32
    %c0_i32_1 = arith.constant 0 : i32
    return %arg0, %c0_i32, %c0_i32_0 : i32, i32, i32
  }
  func.func @transform_1(%arg0: i32) -> (i32, i32) {
    %c0_i32 = arith.constant 0 : i32
    %c0_i32_0 = arith.constant 0 : i32
    %c0_i32_1 = arith.constant 0 : i32
    return %c0_i32, %c0_i32_0 : i32, i32
  }
  func.func @transform_2(%arg0: i32) -> (i32, i32) {
    %c0_i32 = arith.constant 0 : i32
    %c0_i32_0 = arith.constant 0 : i32
    %c0_i32_1 = arith.constant 0 : i32
    return %c0_i32, %c0_i32_0 : i32, i32
  }
  func.func @transform_3(%arg0: i32) -> (i32, i32) {
    %c0_i32 = arith.constant 0 : i32
    %c0_i32_0 = arith.constant 0 : i32
    %c0_i32_1 = arith.constant 0 : i32
    return %c0_i32, %c0_i32_0 : i32, i32
  }
  func.func @transform_4(%arg0: i32) -> (i32, i32) {
    %c0_i32 = arith.constant 0 : i32
    %c0_i32_0 = arith.constant 0 : i32
    %c0_i32_1 = arith.constant 0 : i32
    return %c0_i32, %c0_i32_0 : i32, i32
  }
  func.func @transform_5(%arg0: i32) -> (i32, i32) {
    %c0_i32 = arith.constant 0 : i32
    %c0_i32_0 = arith.constant 0 : i32
    %c0_i32_1 = arith.constant 0 : i32
    return %c0_i32, %c0_i32_0 : i32, i32
  }
  func.func @transform_6(%arg0: i32) -> (i32, i32, i32) {
    %c0_i32 = arith.constant 0 : i32
    %c0_i32_0 = arith.constant 0 : i32
    %c0_i32_1 = arith.constant 0 : i32
    %c0_i32_2 = arith.constant 0 : i32
    return %c0_i32, %c0_i32_0, %c0_i32_1 : i32, i32, i32
  }
  func.func @transform_7(%arg0: i32) -> (i32, i32, i32) {
    %c0_i32 = arith.constant 0 : i32
    %c0_i32_0 = arith.constant 0 : i32
    %c0_i32_1 = arith.constant 0 : i32
    return %arg0, %c0_i32, %c0_i32_0 : i32, i32, i32
  }
}

module attributes {stable_mosaic.version = 11 : i64} {
  func.func @kernel(%arg0: i32, %arg1: memref<2x32xf32, #tpu.memory_space<vmem>>, %arg2: memref<1x32xf32, #tpu.memory_space<vmem>>, %arg3: memref<1x32xf32, #tpu.memory_space<vmem>>, %arg4: memref<32x5xbf16, #tpu.memory_space<vmem>>, %arg5: memref<1x5xf32, #tpu.memory_space<vmem>>, %arg6: memref<2x5xf32, #tpu.memory_space<vmem>>) attributes {dimension_semantics = [#tpu.dimension_semantics<arbitrary>], iteration_bounds = array<i64: 1>, scalar_prefetch = 0 : i64, scratch_operands = 0 : i64, tpu.core_type = #tpu.core_type<tc>, window_params = [{pipeline_mode = #tpu.pipeline_mode<synchronous>, transform_indices = @transform_0, window_bounds = array<i64: 2, 32>}, {pipeline_mode = #tpu.pipeline_mode<synchronous>, transform_indices = @transform_1, window_bounds = array<i64: 1, 32>}, {pipeline_mode = #tpu.pipeline_mode<synchronous>, transform_indices = @transform_2, window_bounds = array<i64: 1, 32>}, {pipeline_mode = #tpu.pipeline_mode<synchronous>, transform_indices = @transform_3, window_bounds = array<i64: 32, 5>}, {pipeline_mode = #tpu.pipeline_mode<synchronous>, transform_indices = @transform_4, window_bounds = array<i64: 1, 5>}, {pipeline_mode = #tpu.pipeline_mode<synchronous>, transform_indices = @transform_5, window_bounds = array<i64: 2, 5>}]} {
    %c0 = arith.constant 0 : index
    %c0_0 = arith.constant 0 : index
    %0 = vector.load %arg1[%c0, %c0_0] : memref<2x32xf32, #tpu.memory_space<vmem>>, vector<2x32xf32>
    %c0_1 = arith.constant 0 : index
    %c0_2 = arith.constant 0 : index
    %1 = vector.load %arg2[%c0_1, %c0_2] : memref<1x32xf32, #tpu.memory_space<vmem>>, vector<1x32xf32>
    %2 = vector.broadcast %1 : vector<1x32xf32> to vector<2x32xf32>
    %3 = arith.mulf %0, %2 : vector<2x32xf32>
    %c0_3 = arith.constant 0 : index
    %c0_4 = arith.constant 0 : index
    %4 = vector.load %arg3[%c0_3, %c0_4] : memref<1x32xf32, #tpu.memory_space<vmem>>, vector<1x32xf32>
    %5 = vector.broadcast %4 : vector<1x32xf32> to vector<2x32xf32>
    %6 = arith.addf %3, %5 : vector<2x32xf32>
    %cst = arith.constant 0.000000e+00 : f32
    %7 = vector.broadcast %cst : f32 to vector<2x32xf32>
    %8 = arith.maximumf %6, %7 : vector<2x32xf32>
    %9 = arith.truncf %8 : vector<2x32xf32> to vector<2x32xbf16>
    %c0_5 = arith.constant 0 : index
    %c0_6 = arith.constant 0 : index
    %10 = vector.load %arg4[%c0_5, %c0_6] : memref<32x5xbf16, #tpu.memory_space<vmem>>, vector<32x5xbf16>
    %cst_7 = arith.constant dense<0.000000e+00> : vector<2x5xf32>
    %11 = tpu.matmul %9, %10, %cst_7 {dimension_numbers = #tpu.dot_dimension_numbers<[1], [0], [0], [1], [0, 0, 1, 1], [], []>} : vector<2x32xbf16>, vector<32x5xbf16>, vector<2x5xf32> -> vector<2x5xf32>
    %c0_8 = arith.constant 0 : index
    %c0_9 = arith.constant 0 : index
    %12 = vector.load %arg5[%c0_8, %c0_9] : memref<1x5xf32, #tpu.memory_space<vmem>>, vector<1x5xf32>
    %13 = vector.broadcast %12 : vector<1x5xf32> to vector<2x5xf32>
    %14 = arith.addf %11, %13 : vector<2x5xf32>
    %c0_10 = arith.constant 0 : index
    %c0_11 = arith.constant 0 : index
    %15 = vector.load %arg6[%c0_10, %c0_11] : memref<2x5xf32, #tpu.memory_space<vmem>>, vector<2x5xf32>
    tpu.vector_store %arg6[%c0_10, %c0_11], %14 {strides = array<i32>} : memref<2x5xf32, #tpu.memory_space<vmem>>, vector<2x5xf32>,
    return
  }
  func.func @transform_0(%arg0: i32) -> (i32, i32) {
    %c0_i32 = arith.constant 0 : i32
    %c0_i32_0 = arith.constant 0 : i32
    %c0_i32_1 = arith.constant 0 : i32
    return %c0_i32, %c0_i32_0 : i32, i32
  }
  func.func @transform_1(%arg0: i32) -> (i32, i32) {
    %c0_i32 = arith.constant 0 : i32
    %c0_i32_0 = arith.constant 0 : i32
    %c0_i32_1 = arith.constant 0 : i32
    return %c0_i32, %c0_i32_0 : i32, i32
  }
  func.func @transform_2(%arg0: i32) -> (i32, i32) {
    %c0_i32 = arith.constant 0 : i32
    %c0_i32_0 = arith.constant 0 : i32
    %c0_i32_1 = arith.constant 0 : i32
    return %c0_i32, %c0_i32_0 : i32, i32
  }
  func.func @transform_3(%arg0: i32) -> (i32, i32) {
    %c0_i32 = arith.constant 0 : i32
    %c0_i32_0 = arith.constant 0 : i32
    %c0_i32_1 = arith.constant 0 : i32
    return %c0_i32, %c0_i32_0 : i32, i32
  }
  func.func @transform_4(%arg0: i32) -> (i32, i32) {
    %c0_i32 = arith.constant 0 : i32
    %c0_i32_0 = arith.constant 0 : i32
    %c0_i32_1 = arith.constant 0 : i32
    return %c0_i32, %c0_i32_0 : i32, i32
  }
  func.func @transform_5(%arg0: i32) -> (i32, i32) {
    %c0_i32 = arith.constant 0 : i32
    %c0_i32_0 = arith.constant 0 : i32
    %c0_i32_1 = arith.constant 0 : i32
    return %c0_i32, %c0_i32_0 : i32, i32
  }
}

</mosaic_0001>

<bundles_post_ra>
// kernel: densenet_forward.13
= control target key start
LH: loop header
LB: loop body
LE: loop exit
PB: predicated region body
PF: predicated region fallthrough
CT: control target
= control target key end

     0   :  { %s1234_s15 = smov 0   ;;  %s1531_s0 = inlined_call_operand.vmem [shape: f32[2,16,672], index: 0, kind: input, shape index: {}]   ;;  %s1532_s1 = inlined_call_operand.vmem [shape: bf16[672,256], index: 1, kind: input, shape index: {}]   ;;  %s1533_s2 = inlined_call_operand.vmem [shape: f32[1,256], index: 2, kind: input, shape index: {}]   ;;  %s1534_s3 = inlined_call_operand.vmem [shape: f32[1,256], index: 3, kind: input, shape index: {}]   ;;  %s1535_s4 = inlined_call_operand.vmem [shape: f32[2,8,128], index: 4, kind: output, shape index: {}]  }
   0x1 LB: > { %s962_s16 = sadd.s32 4294967295, %s1206_s15   ;;  %p966_p0 = scmp.ge.s32.totalorder %s1206_s15, 1  ;;  %s1206_s15 = sphi %s1234_s15, %s14_s15  }
   0x2   : > { %p162_p1 = scmp.lt.s32.totalorder %s1206_s15, 3 }
   0x4   : > { %p163_p2 = pnand %p966_p0, %p162_p1 }
   0x5   : > { %v1074_v0 = vld [vmem:[%s1532_s1 + $0x104] ss:$8 sps:$4 sm:$0xff] (!%p163_p2)   ;;  %v1076_v1 = vld [vmem:[%s1532_s1 + $0x100] ss:$8 sps:$4 sm:$0xff] (!%p163_p2)   ;;  %v1077_v2 = vld [vmem:[%s1532_s1 + $0x114] ss:$8 sps:$4 sm:$0xff] (!%p163_p2)  }
   0x6   : > { %166 = sbr.rel (%p163_p2) target bundleno = 460 (0x1cc), region = 36  ;;  %766 = vmatprep.subr.bf16.mxu0 (!%p163_p2), %v1074_v0  ;;  %v1079_v3 = vld [vmem:[%s1532_s1 + $0x110] ss:$8 sps:$4 sm:$0xff] (!%p163_p2)   ;;  %v1080_v4 = vld [vmem:[%s1532_s1 + $0x124] ss:$8 sps:$4 sm:$0xff] (!%p163_p2)   ;;  %p187_p3 = scmp.lt.s32.totalorder (!%p163_p2), %s962_s16, 1 }
   0x7   : > { %767 = vmatpush1.bf16.msra.mxu0 (!%p163_p2), %v1076_v1  ;;  %v1082_v5 = vld [vmem:[%s1532_s1 + $0x120] ss:$8 sps:$4 sm:$0xff] (!%p163_p2)   ;;  %v1083_v6 = vld [vmem:[%s1532_s1 + $0x134] ss:$8 sps:$4 sm:$0xff] (!%p163_p2)   ;;  %v1085_v7 = vld [vmem:[%s1532_s1 + $0x130] ss:$8 sps:$4 sm:$0xff] (!%p163_p2)  }
   0x8   : > { %768 = vmatprep.subr.bf16.mxu0 (!%p163_p2), %v1077_v2  ;;  %v1086_v8 = vld [vmem:[%s1532_s1 + $0x144] ss:$8 sps:$4 sm:$0xff] (!%p163_p2)   ;;  %v1106_v10 = vld [vmem:[%s1532_s1] ss:$8 sps:$4 sm:$0xff] (!%p163_p2)   ;;  %v1089_v12 = vld [vmem:[%s1532_s1 + $0x154] ss:$8 sps:$4 sm:$0xff] (!%p163_p2)  }
   0x9   : > { %v1103_v9 = vld [vmem:[%s1532_s1 + $0x4] ss:$8 sps:$4 sm:$0xff] (!%p163_p2)   ;;  %v1088_v11 = vld [vmem:[%s1532_s1 + $0x140] ss:$8 sps:$4 sm:$0xff] (!%p163_p2)   ;;  %v1109_v13 = vld [vmem:[%s1532_s1 + $0x14] ss:$8 sps:$4 sm:$0xff] (!%p163_p2)  }
   0xa   : > { %723 = vmatprep.subr.bf16.mxu1 (!%p163_p2), %v1103_v9  ;;  %v1112_v14 = vld [vmem:[%s1532_s1 + $0x10] ss:$8 sps:$4 sm:$0xff] (!%p163_p2)   ;;  %v1092_v16 = vld [vmem:[%s1532_s1 + $0x164] ss:$8 sps:$4 sm:$0xff] (!%p163_p2)   ;;  %v1118_v18 = vld [vmem:[%s1532_s1 + $0x20] ss:$8 sps:$4 sm:$0xff] (!%p163_p2)  }
   0xb   : > { %769 = vmatpush1.bf16.msra.mxu0 (!%p163_p2), %v1079_v3  ;;  %724 = vmatpush1.bf16.msra.mxu1 (!%p163_p2), %v1106_v10  ;;  %v1091_v15 = vld [vmem:[%s1532_s1 + $0x150] ss:$8 sps:$4 sm:$0xff] (!%p163_p2)   ;;  %v1115_v17 = vld [vmem:[%s1532_s1 + $0x24] ss:$8 sps:$4 sm:$0xff] (!%p163_p2)   ;;  %v1121_v19 = vld [vmem:[%s1532_s1 + $0x34] ss:$8 sps:$4 sm:$0xff] (!%p163_p2)  }
   0xc   : > { %770 = vmatprep.subr.bf16.mxu0 (!%p163_p2), %v1080_v4  ;;  %725 = vmatprep.subr.bf16.mxu1 (!%p163_p2), %v1109_v13  ;;  %v1094_v20 = vld [vmem:[%s1532_s1 + $0x160] ss:$8 sps:$4 sm:$0xff] (!%p163_p2)   ;;  %v1095_v21 = vld [vmem:[%s1532_s1 + $0x174] ss:$8 sps:$4 sm:$0xff] (!%p163_p2)   ;;  %v1124_v22 = vld [vmem:[%s1532_s1 + $0x30] ss:$8 sps:$4 sm:$0xff] (!%p163_p2)  }
   0xd   : > { %s1537_s16 = smov (!%p187_p3, %s962_s16), 1  ;;  %v1127_v23 = vld [vmem:[%s1532_s1 + $0x44] ss:$8 sps:$4 sm:$0xff]   ;;  %v1097_v24 = vld [vmem:[%s1532_s1 + $0x170] ss:$8 sps:$4 sm:$0xff]   ;;  %vm719_vm0 = vcmask 261120  }
   0xe   : > { %s1064_s9 = smul.u32 96, %s1537_s16  ;;  %v1098_v25 = vld [vmem:[%s1532_s1 + $0x184] ss:$8 sps:$4 sm:$0xff]   ;;  %v1130_v26 = vld [vmem:[%s1532_s1 + $0x40] ss:$8 sps:$4 sm:$0xff]   ;;  %s968_s30 = sshll.u32 %s1537_s16, 3 }
   0xf   : > { %771 = vmatpush1.bf16.msra.mxu0 %v1082_v5  ;;  %726 = vmatpush1.bf16.msra.mxu1 %v1112_v14  ;;  %v1133_v27 = vld [vmem:[%s1532_s1 + $0x54] ss:$8 sps:$4 sm:$0xff]   ;;  %v1100_v28 = vld [vmem:[%s1532_s1 + $0x180] ss:$8 sps:$4 sm:$0xff]   ;;  %v1136_v32 = vld [vmem:[%s1532_s1 + $0x50] ss:$8 sps:$4 sm:$0xff]   ;;  %s195_s7 = scalar_lea.vmem %s1535_s4, %s968_s30 }
  0x10   : > { %772 = vmatprep.subr.bf16.mxu0 %v1083_v6  ;;  %727 = vmatprep.subr.bf16.mxu1 %v1115_v17  ;;  %s1330_s24 = scalar_lea.vmem %s1531_s0, %s1064_s9  ;;  %v1101_v31 = vld [vmem:[%s1532_s1 + $0x194] ss:$8 sps:$4 sm:$0xff]   ;;  %v1139_v34 = vld [vmem:[%s1532_s1 + $0x64] ss:$8 sps:$4 sm:$0xff]   ;;  %v1105_v35 = vld [vmem:[%s1532_s1 + $0x190] ss:$8 sps:$4 sm:$0xff]  }
  0x11   : > { %v200_v29 = vld [vmem:[%s1330_s24 + $0x18] sm:$0xff]  ;;  %v206_v30 = vld [vmem:[%s1330_s24 + $0x48] sm:$0xff]  ;;  %v199_v0 = vld [vmem:[%s1330_s24 + $0x10] sm:$0xff] }
  0x12   : > { %v212_v33 = vpack.c.bf16 %v206_v30, %v200_v29  ;;  %v1107_v36 = vld [vmem:[%s1532_s1 + $0x1a4] ss:$8 sps:$4 sm:$0xff]   ;;  %v1142_v37 = vld [vmem:[%s1532_s1 + $0x60] ss:$8 sps:$4 sm:$0xff]   ;;  %v1146_v38 = vld [vmem:[%s1532_s1 + $0x74] ss:$8 sps:$4 sm:$0xff]  }
  0x13   : > { %773 = vmatpush1.bf16.msra.mxu0 %v1085_v7  ;;  %728 = vmatpush1.bf16.msra.mxu1 %v1118_v18  ;;  %v1111_v39 = vld [vmem:[%s1532_s1 + $0x1a0] ss:$8 sps:$4 sm:$0xff]   ;;  %v1113_v40 = vld [vmem:[%s1532_s1 + $0x1b4] ss:$8 sps:$4 sm:$0xff]   ;;  %v1148_v41 = vld [vmem:[%s1532_s1 + $0x70] ss:$8 sps:$4 sm:$0xff]  }
  0x14   : > { %774 = vmatprep.subr.bf16.mxu0 %v1086_v8  ;;  %729 = vmatprep.subr.bf16.mxu1 %v1121_v19  ;;  %v1152_v42 = vld [vmem:[%s1532_s1 + $0x84] ss:$8 sps:$4 sm:$0xff]   ;;  %v1117_v43 = vld [vmem:[%s1532_s1 + $0x1b0] ss:$8 sps:$4 sm:$0xff]   ;;  %v1154_v45 = vld [vmem:[%s1532_s1 + $0x80] ss:$8 sps:$4 sm:$0xff]  }
  0x15   : > { %798 = vmatprep.mubr.bf16.mxu0 %v212_v33  ;;  %v1119_v44 = vld [vmem:[%s1532_s1 + $0x1c4] ss:$8 sps:$4 sm:$0xff]   ;;  %v1158_v46 = vld [vmem:[%s1532_s1 + $0x94] ss:$8 sps:$4 sm:$0xff]   ;;  %v1123_v47 = vld [vmem:[%s1532_s1 + $0x1c0] ss:$8 sps:$4 sm:$0xff]  }
  0x16   : > { %v1125_v48 = vld [vmem:[%s1532_s1 + $0x1d4] ss:$8 sps:$4 sm:$0xff]   ;;  %v1160_v49 = vld [vmem:[%s1532_s1 + $0x90] ss:$8 sps:$4 sm:$0xff]   ;;  %v1164_v50 = vld [vmem:[%s1532_s1 + $0xa4] ss:$8 sps:$4 sm:$0xff]  }
  0x17   : > { %775 = vmatpush1.bf16.msra.mxu0 %v1088_v11  ;;  %730 = vmatpush1.bf16.msra.mxu1 %v1124_v22  ;;  %v1129_v51 = vld [vmem:[%s1532_s1 + $0x1d0] ss:$8 sps:$4 sm:$0xff]   ;;  %v1131_v52 = vld [vmem:[%s1532_s1 + $0x1e4] ss:$8 sps:$4 sm:$0xff]   ;;  %v1166_v53 = vld [vmem:[%s1532_s1 + $0xa0] ss:$8 sps:$4 sm:$0xff]  }
  0x18   : > { %776 = vmatprep.subr.bf16.mxu0 %v1089_v12  ;;  %731 = vmatprep.subr.bf16.mxu1 %v1127_v23  ;;  %v1170_v54 = vld [vmem:[%s1532_s1 + $0xb4] ss:$8 sps:$4 sm:$0xff]   ;;  %v1135_v55 = vld [vmem:[%s1532_s1 + $0x1e0] ss:$8 sps:$4 sm:$0xff]   ;;  %v1172_v57 = vld [vmem:[%s1532_s1 + $0xb0] ss:$8 sps:$4 sm:$0xff]  }
  0x19   : > { %v1137_v56 = vld [vmem:[%s1532_s1 + $0x1f4] ss:$8 sps:$4 sm:$0xff]   ;;  %v198_v58 = vld [vmem:[%s1330_s24 + $0x8] sm:$0xff]  ;;  %v1141_v62 = vld [vmem:[%s1532_s1 + $0x1f0] ss:$8 sps:$4 sm:$0xff]  }
  0x1a   : > { %v204_v59 = vld [vmem:[%s1330_s24 + $0x38] sm:$0xff]  ;;  %v1176_v60 = vld [vmem:[%s1532_s1 + $0xc4] ss:$8 sps:$4 sm:$0xff]   ;;  %v1178_v2 = vld [vmem:[%s1532_s1 + $0xc0] ss:$8 sps:$4 sm:$0xff]  }
  0x1b   : > { %777 = vmatpush1.bf16.msra.mxu0 %v1091_v15  ;;  %732 = vmatpush1.bf16.msra.mxu1 %v1130_v26  ;;  %v210_v61 = vpack.c.bf16 %v204_v59, %v198_v58  ;;  %v1145_v63 = vld [vmem:[%s1532_s1 + $0x204] ss:$8 sps:$4 sm:$0xff]   ;;  %v208_v4 = vld [vmem:[%s1330_s24 + $0x58] sm:$0xff]  ;;  %v1143_v7 = vld [vmem:[%s1532_s1 + $0x200] ss:$8 sps:$4 sm:$0xff]  }
  0x1c   : > { %778 = vmatprep.subr.bf16.mxu0 %v1092_v16  ;;  %733 = vmatprep.subr.bf16.mxu1 %v1133_v27  ;;  %v205_v1 = vld [vmem:[%s1330_s24 + $0x40] sm:$0xff]  ;;  %v202_v3 = vld [vmem:[%s1330_s24 + $0x28] sm:$0xff]  ;;  %v1182_v5 = vld [vmem:[%s1532_s1 + $0xd4] ss:$8 sps:$4 sm:$0xff]  }
  0x1d   : > { %755 = vmatprep.mubr.bf16.mxu1 %v210_v61  ;;  %v211_v6 = vpack.c.bf16 %v205_v1, %v199_v0  ;;  %v214_v8 = vpack.c.bf16 %v208_v4, %v202_v3  ;;  %v1151_v9 = vld [vmem:[%s1532_s1 + $0x214] ss:$8 sps:$4 sm:$0xff]   ;;  %v1184_v10 = vld [vmem:[%s1532_s1 + $0xd0] ss:$8 sps:$4 sm:$0xff]   ;;  %v1188_v11 = vld [vmem:[%s1532_s1 + $0xe4] ss:$8 sps:$4 sm:$0xff]  }
  0x1e   : > { %v1149_v12 = vld [vmem:[%s1532_s1 + $0x210] ss:$8 sps:$4 sm:$0xff]   ;;  %v1157_v13 = vld [vmem:[%s1532_s1 + $0x224] ss:$8 sps:$4 sm:$0xff]   ;;  %v1190_v14 = vld [vmem:[%s1532_s1 + $0xe0] ss:$8 sps:$4 sm:$0xff]  }
  0x1f   : > { %779 = vmatpush1.bf16.msra.mxu0 %v1094_v20  ;;  %734 = vmatpush1.bf16.msra.mxu1 %v1136_v32  ;;  %v1194_v15 = vld [vmem:[%s1532_s1 + $0xf4] ss:$8 sps:$4 sm:$0xff]   ;;  %v1155_v16 = vld [vmem:[%s1532_s1 + $0x220] ss:$8 sps:$4 sm:$0xff]   ;;  %v1196_v18 = vld [vmem:[%s1532_s1 + $0xf0] ss:$8 sps:$4 sm:$0xff]  }
  0x20   : > { %780 = vmatprep.subr.bf16.mxu0 %v1095_v21  ;;  %735 = vmatprep.subr.bf16.mxu1 %v1139_v34  ;;  %v1163_v17 = vld [vmem:[%s1532_s1 + $0x234] ss:$8 sps:$4 sm:$0xff]   ;;  %v197_v19 = vld [vmem:[%s1330_s24] sm:$0xff]  ;;  %v1161_v21 = vld [vmem:[%s1532_s1 + $0x230] ss:$8 sps:$4 sm:$0xff]  }
  0x21   : > { %v203_v20 = vld [vmem:[%s1330_s24 + $0x30] sm:$0xff]  ;;  %v1169_v23 = vld [vmem:[%s1532_s1 + $0x244] ss:$8 sps:$4 sm:$0xff]   ;;  %v1191_v32 = vld [vmem:[%s1532_s1 + $0x280] ss:$8 sps:$4 sm:$0xff]  }
  0x22   : > { %v209_v22 = vpack.c.bf16 %v203_v20, %v197_v19  ;;  %v1173_v26 = vld [vmem:[%s1532_s1 + $0x250] ss:$8 sps:$4 sm:$0xff]   ;;  %v1181_v27 = vld [vmem:[%s1532_s1 + $0x264] ss:$8 sps:$4 sm:$0xff]   ;;  %v1187_v29 = vld [vmem:[%s1532_s1 + $0x274] ss:$8 sps:$4 sm:$0xff]  }
  0x23   : > { %781 = vmatpush1.bf16.msra.mxu0 %v1097_v24  ;;  %736 = vmatpush1.bf16.msra.mxu1 %v1142_v37  ;;  %v1167_v24 = vld [vmem:[%s1532_s1 + $0x240] ss:$8 sps:$4 sm:$0xff]   ;;  %v1185_v30 = vld [vmem:[%s1532_s1 + $0x270] ss:$8 sps:$4 sm:$0xff]   ;;  %v1199_v33 = vld [vmem:[%s1532_s1 + $0x294] ss:$8 sps:$4 sm:$0xff]  }
  0x24   : > { %782 = vmatprep.subr.bf16.mxu0 %v1098_v25  ;;  %737 = vmatprep.subr.bf16.mxu1 %v1146_v38  ;;  %v1175_v25 = vld [vmem:[%s1532_s1 + $0x254] ss:$8 sps:$4 sm:$0xff]   ;;  %v1197_v34 = vld [vmem:[%s1532_s1 + $0x290] ss:$8 sps:$4 sm:$0xff]   ;;  %v854_v38 = vlaneseq }
  0x27   : > { %783 = vmatpush1.bf16.msra.mxu0 %v1100_v28  ;;  %738 = vmatpush1.bf16.msra.mxu1 %v1148_v41  ;;  %v1179_v28 = vld [vmem:[%s1532_s1 + $0x260] ss:$8 sps:$4 sm:$0xff]  }
  0x28   : > { %784 = vmatprep.subr.bf16.mxu0 %v1101_v31  ;;  %739 = vmatprep.subr.bf16.mxu1 %v1152_v42  ;;  %v1193_v31 = vld [vmem:[%s1532_s1 + $0x284] ss:$8 sps:$4 sm:$0xff]   ;;  %v852_v41 = vld [vmem:[%s1533_s2] sm:$0x3] }
  0x2b   : > { %785 = vmatpush1.bf16.msra.mxu0 %v1105_v35  ;;  %740 = vmatpush1.bf16.msra.mxu1 %v1154_v45  ;;  %v201_v35 = vld [vmem:[%s1330_s24 + $0x20] sm:$0xff] }
  0x2c   : > { %786 = vmatprep.subr.bf16.mxu0 %v1107_v36  ;;  %741 = vmatprep.subr.bf16.mxu1 %v1158_v46  ;;  %v207_v36 = vld [vmem:[%s1330_s24 + $0x50] sm:$0xff]  ;;  %s1208_s24 = smov 16  }
  0x2d   : > { %v213_v37 = vpack.c.bf16 %v207_v36, %v201_v35 }
  0x2f   : > { %787 = vmatpush1.bf16.msra.mxu0 %v1111_v39  ;;  %742 = vmatpush1.bf16.msra.mxu1 %v1160_v49  ;;  %v855_v39 = vshrl.u32 %v854_v38, 7 }
  0x30   : > { %788 = vmatprep.subr.bf16.mxu0 %v1113_v40  ;;  %743 = vmatprep.subr.bf16.mxu1 %v1164_v50 }
  0x31   : > { %v856_v40 = vsub.s32 0, %v855_v39  ;;  %v860_v49 = vsub.s32 1, %v855_v39  ;;  %vm903_vm2 = vcmp.eq.s32.totalorder %v855_v39, 0 }
  0x33   : > { %789 = vmatpush1.bf16.msra.mxu0 %v1117_v43  ;;  %744 = vmatpush1.bf16.msra.mxu1 %v1166_v53  ;;  %v857_v42 = vrot.slane %v852_v41, %v856_v40  ;;  %v868_v43 = vld [vmem:[%s1534_s3] sm:$0x3] }
  0x34   : > { %790 = vmatprep.subr.bf16.mxu0 %v1119_v44  ;;  %745 = vmatprep.subr.bf16.mxu1 %v1170_v54  ;;  %v873_v44 = vrot.slane %v868_v43, %v856_v40 }
  0x37   : > { %791 = vmatpush1.bf16.msra.mxu0 %v1123_v47  ;;  %746 = vmatpush1.bf16.msra.mxu1 %v1172_v57 }
  0x38   : > { %792 = vmatprep.subr.bf16.mxu0 %v1125_v48  ;;  %747 = vmatprep.subr.bf16.mxu1 %v1176_v60 }
  0x3b   : > { %793 = vmatpush1.bf16.msra.mxu0 %v1129_v51  ;;  %748 = vmatpush1.bf16.msra.mxu1 %v1178_v2  ;;  %v861_v51 = vrot.slane %v852_v41, %v860_v49 }
  0x3c   : > { %794 = vmatprep.subr.bf16.mxu0 %v1131_v52  ;;  %749 = vmatprep.subr.bf16.mxu1 %v1182_v5 }
  0x3f   : > { %795 = vmatpush1.bf16.msra.mxu0 %v1135_v55  ;;  %750 = vmatpush1.bf16.msra.mxu1 %v1184_v10  ;;  %v889_v10 = vand.u32 127, %v854_v38 }
  0x40   : > { %796 = vmatprep.subr.bf16.mxu0 %v1137_v56  ;;  %751 = vmatprep.subr.bf16.mxu1 %v1188_v11  ;;  %v877_v56 = vrot.slane %v868_v43, %v860_v49 }
  0x41   : > { %vm890_vm1 = vcmp.lt.s32.totalorder %v889_v10, 16 }
  0x43   : > { %797 = vmatpush1.bf16.msra.mxu0 %v1141_v62  ;;  %752 = vmatpush1.bf16.msra.mxu1 %v1190_v14 }
  0x44   : > { %809 = vmatprep.subr.bf16.mxu0 %v1145_v63  ;;  %753 = vmatprep.subr.bf16.mxu1 %v1194_v15 }
  0x46   : > { %799 = vmatmul.mubr.bf16.vlgmr.msra.gmra.mrb[0].mxu0 %v211_v6 }
  0x47   : > { %810 = vmatpush1.bf16.msra.mxu0 %v1143_v7  ;;  %1053 = vmatprep.mubr.msk.bf16.mxu0 %vm719_vm0, %v214_v8 }
  0x48   : > { %811 = vmatprep.subr.bf16.mxu0 %v1151_v9  ;;  %754 = vmatpush1.bf16.msra.mxu1 %v1196_v18 }
  0x4b   : > { %812 = vmatpush1.bf16.msra.mxu0 %v1149_v12  ;;  %756 = vmatmul.mubr.bf16.vlgmr.msra.gmra.mrb[0].mxu1 %v209_v22 }
  0x4c   : > { %813 = vmatprep.subr.bf16.mxu0 %v1157_v13 }
  0x4f   : > { %814 = vmatpush1.bf16.msra.mxu0 %v1155_v16 }
  0x50   : > { %815 = vmatprep.subr.bf16.mxu0 %v1163_v17 }
  0x53   : > { %816 = vmatpush1.bf16.msra.mxu0 %v1161_v21 }
  0x54   : > { %817 = vmatprep.subr.bf16.mxu0 %v1169_v23 }
  0x57   : > { %818 = vmatpush1.bf16.msra.mxu0 %v1167_v24 }
  0x58   : > { %819 = vmatprep.subr.bf16.mxu0 %v1175_v25 }
  0x5b   : > { %820 = vmatpush1.bf16.msra.mxu0 %v1173_v26 }
  0x5c   : > { %821 = vmatprep.subr.bf16.mxu0 %v1181_v27 }
  0x5f   : > { %822 = vmatpush1.bf16.msra.mxu0 %v1179_v28 }
  0x60   : > { %823 = vmatprep.subr.bf16.mxu0 %v1187_v29 }
  0x63   : > { %824 = vmatpush1.bf16.msra.mxu0 %v1185_v30 }
  0x64   : > { %825 = vmatprep.subr.bf16.mxu0 %v1193_v31 }
  0x67   : > { %826 = vmatpush1.bf16.msra.mxu0 %v1191_v32 }
  0x68   : > { %827 = vmatprep.subr.bf16.mxu0 %v1199_v33 }
  0x6b   : > { %828 = vmatpush1.bf16.msra.mxu0 %v1197_v34 }
  0x6e   : > { %842 = vmatmul.mubr.bf16.vlgmr.msra.gmra.mrb[0].mxu0 %v213_v37 }
 0x11e   : > { %v757_v45 = vpop.f32.mrb[0].mxu1 }
 0x11f   : > { %v759_v46 = vpop.f32.mrb[1].mxu1 }
 0x120   : > { %v761_v47 = vpop.f32.mrb[2].mxu1 }
 0x121   : > { %v763_v48 = vpop.f32.mrb[3].mxu1 }
 0x141   : > { %v843_v50 = vpop.f32.mrb[0].mxu0 }
 0x142   : > { %v1056_v52 = vadd.f32 %v843_v50, %v757_v45  ;;  %v845_v53 = vpop.f32.mrb[1].mxu0 }
 0x143   : > { %v1057_v54 = vadd.f32 %v845_v53, %v759_v46  ;;  %v847_v55 = vpop.f32.mrb[2].mxu0 }
 0x144   : > { %v864_v57 = vmul.f32 %v1056_v52, %v857_v42  ;;  %v1058_v58 = vadd.f32 %v847_v55, %v761_v47  ;;  %v849_v59 = vpop.f32.mrb[3].mxu0 }
 0x145   : > { %v865_v60 = vmul.f32 %v1057_v54, %v861_v51  ;;  %v1059_v61 = vadd.f32 %v849_v59, %v763_v48 }
 0x146   : > { %v880_v62 = vadd.f32 %v873_v44, %v864_v57  ;;  %v866_v63 = vmul.f32 %v1058_v58, %v857_v42 }
 0x147   : > { %v867_v0 = vmul.f32 %v1059_v61, %v861_v51  ;;  %v881_v1 = vadd.f32 %v877_v56, %v865_v60 }
 0x148   : > { %v884_v2 = vmax.f32 %v880_v62, 0.0  ;;  %v882_v3 = vadd.f32 %v873_v44, %v866_v63 }
 0x149   : > { %v883_v4 = vadd.f32 %v877_v56, %v867_v0  ;;  %v885_v5 = vmax.f32 %v881_v1, 0.0 }
 0x14a   : > { %v886_v6 = vmax.f32 %v882_v3, 0.0 }
 0x14b   : > { %v887_v7 = vmax.f32 %v883_v4, 0.0  ;;  %v897_v8 = vmax.f32 %v884_v2, %v885_v5 }
 0x14d   : > { %893 = vrot.lane.b32.xlu0 %v887_v7, %s1208_s24  ;;  %v898_v9 = vmax.f32 %v886_v6, %v887_v7 }
 0x151   : > { %891 = vrot.lane.b32.xlu0 %v885_v5, %s1208_s24 }
 0x1bf   : > { %v894_v11 = vpop.permute.xlu0 %893 }
 0x1c0   : > { %v896_v12 = vsel %vm890_vm1, -1e+30, %v894_v11 }
 0x1c1   : > { %v900_v13 = vmax.f32 %v898_v9, %v896_v12 }
 0x1c3   : > { %v904_v14 = vrot.slane %v900_v13, 7  ;;  %v892_v15 = vpop.permute.xlu0 %891 }
 0x1c4   : > { %v895_v16 = vsel %vm890_vm1, -1e+30, %v892_v15 }
 0x1c5   : > { %v905_v17 = vsel %vm903_vm2, -1e+30, %v904_v14  ;;  %v899_v18 = vmax.f32 %v897_v8, %v895_v16 }
 0x1c7   : > { %v906_v19 = vmax.f32 %v899_v18, %v900_v13 }
 0x1c9   : > { %v907_v20 = vmax.f32 %v906_v19, %v905_v17 }
 0x1cb   : > { %908 = vst [vmem:[%s195_s7] sm:$0xff] %v907_v20 }
 0x1cc PF: > { %s14_s15 = sadd.s32 1, %s1206_s15  }
 0x1cd   : > { %p11_p4 = scmp.ge.s32.totalorder %s14_s15, 4  }
 0x1cf   :  { %13 = sbr.rel (!%p11_p4) target bundleno = 1 (0x1), region = 66 }

// kernel: densenet_forward.14
= control target key start
LH: loop header
LB: loop body
LE: loop exit
PB: predicated region body
PF: predicated region fallthrough
CT: control target
= control target key end

     0   :  { %s1412_s24 = smov 0   ;;  %s1640_s0 = inlined_call_operand.vmem [shape: f32[2,8,128], index: 0, kind: input, shape index: {}]   ;;  %s1641_s1 = inlined_call_operand.vmem [shape: f32[1,128], index: 1, kind: input, shape index: {}]   ;;  %s1642_s2 = inlined_call_operand.vmem [shape: f32[1,128], index: 2, kind: input, shape index: {}]   ;;  %s1643_s3 = inlined_call_operand.vmem [shape: bf16[128,256], index: 3, kind: input, shape index: {}]   ;;  %s1644_s4 = inlined_call_operand.vmem [shape: f32[1,256], index: 4, kind: input, shape index: {}]   ;;  %s1645_s5 = inlined_call_operand.vmem [shape: f32[1,256], index: 5, kind: input, shape index: {}]   ;;  %s1646_s6 = inlined_call_operand.vmem [shape: bf16[3,256,64], index: 6, kind: input, shape index: {}]   ;;  %s1647_s7 = inlined_call_operand.vmem [shape: f32[2,8,64], index: 7, kind: output, shape index: {}]  }
   0x1 LB: > { %s1075_s25 = sadd.s32 4294967295, %s1368_s24   ;;  %p1079_p0 = scmp.ge.s32.totalorder %s1368_s24, 1  ;;  %s1368_s24 = sphi %s1412_s24, %s17_s24  }
   0x2   : > { %p236_p1 = scmp.lt.s32.totalorder %s1368_s24, 3 }
   0x4   : > { %p237_p2 = pnand %p1079_p0, %p236_p1 }
   0x5   : > { %v1290_v0 = vld [vmem:[%s1643_s3 + $0x4] ss:$8 sps:$4 sm:$0xff] (!%p237_p2)   ;;  %p266_p3 = scmp.lt.s32.totalorder (!%p237_p2), %s1075_s25, 1  ;;  %v1292_v1 = vld [vmem:[%s1643_s3] ss:$8 sps:$4 sm:$0xff] (!%p237_p2)   ;;  %v1370_v2 = vmov (!%p237_p2), 0   ;;  %v433_v58 = vlaneseq (!%p237_p2) }
   0x6   : > { %240 = sbr.rel (%p237_p2) target bundleno = 527 (0x20f), region = 48  ;;  %422 = vmatprep.mubr.bf16.mxu0 (!%p237_p2), %v1370_v2  ;;  %390 = vmatprep.subr.bf16.mxu0 (!%p237_p2), %v1290_v0  ;;  %v1293_v3 = vld [vmem:[%s1643_s3 + $0x14] ss:$8 sps:$4 sm:$0xff] (!%p237_p2)   ;;  %v1295_v4 = vld [vmem:[%s1643_s3 + $0x10] ss:$8 sps:$4 sm:$0xff] (!%p237_p2)   ;;  %v1317_v15 = vld [vmem:[%s1646_s6 + $0xc0] sm:$0xff] (!%p237_p2)  }
   0x7   : > { %391 = vmatpush1.bf16.msra.mxu0 (!%p237_p2), %v1292_v1  ;;  %v1296_v5 = vld [vmem:[%s1643_s3 + $0x24] ss:$8 sps:$4 sm:$0xff] (!%p237_p2)   ;;  %v1298_v6 = vld [vmem:[%s1643_s3 + $0x20] ss:$8 sps:$4 sm:$0xff] (!%p237_p2)   ;;  %v1299_v7 = vld [vmem:[%s1643_s3 + $0x34] ss:$8 sps:$4 sm:$0xff] (!%p237_p2)   ;;  %1214 = vmatprep.subr.bf16.mxu1 (!%p237_p2), %v1317_v15 }
   0x8   : > { %392 = vmatprep.subr.bf16.mxu0 (!%p237_p2), %v1293_v3  ;;  %v1301_v9 = vld [vmem:[%s1643_s3 + $0x30] ss:$8 sps:$4 sm:$0xff] (!%p237_p2)   ;;  %v1082_v10 = vld [vmem:[%s1641_s1] ss:$0 sm:$0xff] (!%p237_p2)  ;;  %v1302_v11 = vld [vmem:[%s1643_s3 + $0x44] ss:$8 sps:$4 sm:$0xff] (!%p237_p2)  }
   0x9   : > { %v1304_v12 = vld [vmem:[%s1643_s3 + $0x40] ss:$8 sps:$4 sm:$0xff] (!%p237_p2)   ;;  %v1305_v16 = vld [vmem:[%s1643_s3 + $0x54] ss:$8 sps:$4 sm:$0xff] (!%p237_p2)   ;;  %v1307_v19 = vld [vmem:[%s1643_s3 + $0x50] ss:$8 sps:$4 sm:$0xff] (!%p237_p2)  }
   0xa   : > { %v1083_v14 = vld [vmem:[%s1642_s2] ss:$0 sm:$0xff] (!%p237_p2)  ;;  %v1321_v20 = vld [vmem:[%s1646_s6 + $0xc8] sm:$0xff] (!%p237_p2)   ;;  %v1311_v25 = vld [vmem:[%s1643_s3 + $0x74] ss:$8 sps:$4 sm:$0xff] (!%p237_p2)   ;;  %v1371_v42 = vmov (!%p237_p2), 0.0  }
   0xb   : > { %393 = vmatpush1.bf16.msra.mxu0 (!%p237_p2), %v1295_v4  ;;  %v1319_v18 = vld [vmem:[%s1646_s6 + $0x80] sm:$0xff] (!%p237_p2)   ;;  %v1323_v24 = vld [vmem:[%s1646_s6 + $0x88] sm:$0xff] (!%p237_p2)   ;;  %v1313_v26 = vld [vmem:[%s1643_s3 + $0x70] ss:$8 sps:$4 sm:$0xff] (!%p237_p2)   ;;  %461 = vst [vmem:[#allocation2] sm:$0xff] (!%p237_p2), %v1371_v42  ;;  %v434_v59 = vshrl.u32 (!%p237_p2), %v433_v58, 7 }
   0xc   : > { %394 = vmatprep.subr.bf16.mxu0 (!%p237_p2), %v1296_v5  ;;  %1215 = vmatpush3.bf16.msra.mxu1 (!%p237_p2), %v1319_v18  ;;  %v1308_v21 = vld [vmem:[%s1643_s3 + $0x64] ss:$8 sps:$4 sm:$0xff] (!%p237_p2)   ;;  %v1310_v22 = vld [vmem:[%s1643_s3 + $0x60] ss:$8 sps:$4 sm:$0xff] (!%p237_p2)   ;;  %v1320_v32 = vld [vmem:[%s1646_s6 + $0x50] sm:$0xff] (!%p237_p2)   ;;  %462 = vst [vmem:[#allocation2 + $0x8] sm:$0xff] (!%p237_p2), %v1371_v42 }
   0xd   : > { %s1649_s25 = smov (!%p266_p3, %s1075_s25), 1  ;;  %1216 = vmatprep.subr.bf16.mxu1 %v1321_v20  ;;  %v1314_v27 = vld [vmem:[%s1646_s6 + $0x40] sm:$0xff]   ;;  %v1316_v30 = vld [vmem:[%s1646_s6 + $0x48] sm:$0xff]   ;;  %v1322_v33 = vld [vmem:[%s1646_s6 + $0x10] sm:$0xff]   ;;  %463 = vst [vmem:[#allocation2 + $0x10] sm:$0x3] %v1371_v42 }
   0xe   : > { %s1080_s13 = sshll.u32 %s1649_s25, 3  ;;  %v1315_v28 = vld [vmem:[%s1646_s6] sm:$0xff]   ;;  %v1318_v31 = vld [vmem:[%s1646_s6 + $0x8] sm:$0xff]   ;;  %v1324_v34 = vld [vmem:[%s1646_s6 + $0x58] sm:$0xff]   ;;  %464 = vst [vmem:[#allocation2 + $0x18] sm:$0x3] %v1371_v42 }
   0xf   : > { %s269_s18 = scalar_lea.vmem %s1640_s0, %s1080_s13  ;;  %395 = vmatpush1.bf16.msra.mxu0 %v1298_v6  ;;  %v1325_v35 = vld [vmem:[%s1646_s6 + $0xd0] sm:$0xff]   ;;  %v1326_v36 = vld [vmem:[%s1646_s6 + $0x18] sm:$0xff]   ;;  %v1328_v38 = vld [vmem:[%s1646_s6 + $0x60] sm:$0xff]   ;;  %v435_v60 = vsub.s32 0, %v434_v59  ;;  %v439_v62 = vsub.s32 1, %v434_v59  ;;  %s273_s27 = scalar_lea.vmem %s1647_s7, %s1080_s13  ;;  %vm1020_vm0 = vcmask 523264  }
  0x10   : > { %v275_v8 = vld [vmem:[%s269_s18] sm:$0xff]  ;;  %396 = vmatprep.subr.bf16.mxu0 %v1299_v7  ;;  %1217 = vmatpush3.bf16.msra.mxu1 %v1323_v24  ;;  %v1327_v37 = vld [vmem:[%s1646_s6 + $0x90] sm:$0xff]   ;;  %v1329_v39 = vld [vmem:[%s1646_s6 + $0xd8] sm:$0xff]  }
  0x11   : > { %v283_v13 = vmul.f32 %v1082_v10, %v275_v8  ;;  %1218 = vmatprep.subr.bf16.mxu1 %v1325_v35  ;;  %v1330_v40 = vld [vmem:[%s1646_s6 + $0x20] sm:$0xff]   ;;  %v1331_v41 = vld [vmem:[%s1646_s6 + $0x98] sm:$0xff]   ;;  %v1332_v43 = vld [vmem:[%s1646_s6 + $0x68] sm:$0xff]  }
  0x12   : > { %v1333_v44 = vld [vmem:[%s1646_s6 + $0xe0] sm:$0xff]   ;;  %v1334_v45 = vld [vmem:[%s1646_s6 + $0x28] sm:$0xff]   ;;  %v1336_v47 = vld [vmem:[%s1646_s6 + $0x70] sm:$0xff]  }
  0x13   : > { %397 = vmatpush1.bf16.msra.mxu0 %v1301_v9  ;;  %v291_v17 = vadd.f32 %v1083_v14, %v283_v13  ;;  %v1335_v46 = vld [vmem:[%s1646_s6 + $0xa0] sm:$0xff]   ;;  %v1337_v48 = vld [vmem:[%s1646_s6 + $0xe8] sm:$0xff]   ;;  %v1338_v49 = vld [vmem:[%s1646_s6 + $0x30] sm:$0xff]  }
  0x14   : > { %398 = vmatprep.subr.bf16.mxu0 %v1302_v11  ;;  %1219 = vmatpush3.bf16.msra.mxu1 %v1327_v37  ;;  %v1339_v50 = vld [vmem:[%s1646_s6 + $0xa8] sm:$0xff]   ;;  %v1340_v51 = vld [vmem:[%s1646_s6 + $0x78] sm:$0xff]   ;;  %v1341_v52 = vld [vmem:[%s1646_s6 + $0xf0] sm:$0xff]  }
  0x15   : > { %v292_v23 = vmax.f32 %v291_v17, 0.0  ;;  %1220 = vmatprep.subr.bf16.mxu1 %v1329_v39  ;;  %v1342_v53 = vld [vmem:[%s1646_s6 + $0x38] sm:$0xff]   ;;  %v1343_v54 = vld [vmem:[%s1646_s6 + $0xb0] sm:$0xff]   ;;  %v1346_v57 = vld [vmem:[%s1646_s6 + $0x140] sm:$0xff]  }
  0x16   : > { %v1344_v55 = vld [vmem:[%s1646_s6 + $0xf8] sm:$0xff]   ;;  %v431_v61 = vld [vmem:[%s1644_s4] sm:$0x3]  ;;  %v1351_v42 = vld [vmem:[%s1646_s6 + $0x110] sm:$0xff]  }
  0x17   : > { %399 = vmatpush1.bf16.msra.mxu0 %v1304_v12  ;;  %v293_v29 = vpack.c.bf16 %v292_v23, %v292_v23  ;;  %v1345_v56 = vld [vmem:[%s1646_s6 + $0xb8] sm:$0xff]   ;;  %v445_v63 = vld [vmem:[%s1645_s5] sm:$0x3]  ;;  %v436_v0 = vrot.slane %v431_v61, %v435_v60  ;;  %v440_v1 = vrot.slane %v431_v61, %v439_v62 }
  0x18   : > { %400 = vmatprep.subr.bf16.mxu0 %v1305_v16  ;;  %1221 = vmatpush3.bf16.msra.mxu1 %v1331_v41  ;;  %v450_v2 = vrot.slane %v445_v63, %v435_v60  ;;  %v454_v4 = vrot.slane %v445_v63, %v439_v62  ;;  %v1350_v41 = vld [vmem:[%s1646_s6 + $0x150] sm:$0xff]  }
  0x19   : > { %1222 = vmatprep.subr.bf16.mxu1 %v1333_v44  ;;  %v1353_v44 = vld [vmem:[%s1646_s6 + $0x118] sm:$0xff]  }
  0x1b   : > { %401 = vmatpush1.bf16.msra.mxu0 %v1307_v19 }
  0x1c   : > { %402 = vmatprep.subr.bf16.mxu0 %v1308_v21  ;;  %1223 = vmatpush3.bf16.msra.mxu1 %v1335_v46  ;;  %v1355_v46 = vld [vmem:[%s1646_s6 + $0x120] sm:$0xff]  }
  0x1d   : > { %1224 = vmatprep.subr.bf16.mxu1 %v1337_v48  ;;  %v1357_v48 = vld [vmem:[%s1646_s6 + $0x128] sm:$0xff]  }
  0x1f   : > { %403 = vmatpush1.bf16.msra.mxu0 %v1310_v22 }
  0x20   : > { %404 = vmatprep.subr.bf16.mxu0 %v1311_v25  ;;  %1225 = vmatpush3.bf16.msra.mxu1 %v1339_v50  ;;  %v1359_v50 = vld [vmem:[%s1646_s6 + $0x130] sm:$0xff]  }
  0x21   : > { %1226 = vmatprep.subr.bf16.mxu1 %v1341_v52 }
  0x23   : > { %405 = vmatpush1.bf16.msra.mxu0 %v1313_v26 }
  0x24   : > { %1236 = vmatprep.subr.bf16.mxu0 %v1314_v27  ;;  %1227 = vmatpush3.bf16.msra.mxu1 %v1343_v54  ;;  %v1361_v54 = vld [vmem:[%s1646_s6 + $0x138] sm:$0xff]  }
  0x25   : > { %1228 = vmatprep.subr.bf16.mxu1 %v1344_v55 }
  0x26   : > { %423 = vmatmul.mubr.bf16.vlgmr.msra.gmra.mrb[0].mxu0 %v293_v29 }
  0x27   : > { %1237 = vmatpush3.bf16.msra.mxu0 %v1315_v28 }
  0x28   : > { %1238 = vmatprep.subr.bf16.mxu0 %v1316_v30  ;;  %1229 = vmatpush3.bf16.msra.mxu1 %v1345_v56 }
  0x29   : > { %1258 = vmatprep.subr.bf16.mxu1 %v1346_v57 }
  0x2b   : > { %1239 = vmatpush3.bf16.msra.mxu0 %v1318_v31 }
  0x2c   : > { %1240 = vmatprep.subr.bf16.mxu0 %v1320_v32 }
  0x2f   : > { %1241 = vmatpush3.bf16.msra.mxu0 %v1322_v33 }
  0x30   : > { %1242 = vmatprep.subr.bf16.mxu0 %v1324_v34 }
  0x33   : > { %1243 = vmatpush3.bf16.msra.mxu0 %v1326_v36  ;;  %v1347_v36 = vld [vmem:[%s1646_s6 + $0x100] sm:$0xff]  }
  0x34   : > { %1244 = vmatprep.subr.bf16.mxu0 %v1328_v38  ;;  %v1348_v38 = vld [vmem:[%s1646_s6 + $0x148] sm:$0xff]  }
  0x37   : > { %1245 = vmatpush3.bf16.msra.mxu0 %v1330_v40  ;;  %v1349_v40 = vld [vmem:[%s1646_s6 + $0x108] sm:$0xff]  }
  0x38   : > { %1246 = vmatprep.subr.bf16.mxu0 %v1332_v43  ;;  %v1352_v43 = vld [vmem:[%s1646_s6 + $0x158] sm:$0xff]  }
  0x3b   : > { %1247 = vmatpush3.bf16.msra.mxu0 %v1334_v45  ;;  %v1354_v45 = vld [vmem:[%s1646_s6 + $0x160] sm:$0xff]  }
  0x3c   : > { %1248 = vmatprep.subr.bf16.mxu0 %v1336_v47  ;;  %v1356_v47 = vld [vmem:[%s1646_s6 + $0x168] sm:$0xff]  }
  0x3f   : > { %1249 = vmatpush3.bf16.msra.mxu0 %v1338_v49  ;;  %v1358_v49 = vld [vmem:[%s1646_s6 + $0x170] sm:$0xff]  }
  0x40   : > { %1250 = vmatprep.subr.bf16.mxu0 %v1340_v51  ;;  %v1360_v51 = vld [vmem:[%s1646_s6 + $0x178] sm:$0xff]  }
  0x43   : > { %1251 = vmatpush3.bf16.msra.mxu0 %v1342_v53 }
  0xf9   : > { %v424_v3 = vpop.f32.mrb[0].mxu0 }
  0xfa   : > { %v443_v5 = vmul.f32 %v436_v0, %v424_v3  ;;  %v426_v6 = vpop.f32.mrb[1].mxu0 }
  0xfb   : > { %v444_v7 = vmul.f32 %v440_v1, %v426_v6  ;;  %v428_v8 = vpop.f32.mrb[2].mxu0 }
  0xfc   : > { %v457_v9 = vadd.f32 %v450_v2, %v443_v5  ;;  %v429_v10 = vpop.f32.mrb[3].mxu0 }
  0xfd   : > { %v458_v11 = vadd.f32 %v454_v4, %v444_v7 }
  0xfe   : > { %v459_v12 = vmax.f32 %v457_v9, 0.0 }
  0xff   : > { %v460_v13 = vmax.f32 %v458_v11, 0.0 }
 0x100   : > { %v467_v14 = vrot.slane %v459_v12, 7 }
 0x101   : > { %v468_v15 = vrot.slane %v460_v13, 7 }
 0x102   : > { %471 = vst [vmem:[#allocation2] sm:$0xfe] %v467_v14  ;;  %473 = vst [vmem:[#allocation2 + $0x10] sm:$0x1] %v467_v14 }
 0x103   : > { %472 = vst [vmem:[#allocation2 + $0x8] sm:$0xfe] %v468_v15  ;;  %474 = vst [vmem:[#allocation2 + $0x18] sm:$0x1] %v468_v15 }
 0x109   : > { %v475_v16 = vld [vmem:[#allocation2] sm:$0xff]  ;;  %v513_v18 = vld [vmem:[#allocation2 + $0x10] sm:$0x1] }
 0x10a   : > { %v511_v17 = vld [vmem:[#allocation2] sm:$0xfe]  ;;  %v476_v19 = vld [vmem:[#allocation2 + $0x8] sm:$0xff]  ;;  %v514_v21 = vld [vmem:[#allocation2 + $0x18] sm:$0x1]  ;;  %v477_v25 = vpack.c.bf16 %v475_v16, %v475_v16 }
 0x10b   : > { %v512_v20 = vld [vmem:[#allocation2 + $0x8] sm:$0xfe]  ;;  %v515_v22 = vpack.c.bf16 %v513_v18, %v511_v17  ;;  %v478_v23 = vpack.c.bf16 %v476_v19, %v476_v19  ;;  %v841_v28 = vld [vmem:[#allocation2 + $0x18] sm:$0x3]  ;;  %v838_v52 = vld [vmem:[#allocation2] sm:$0xfc] }
 0x10c   : > { %v516_v24 = vpack.c.bf16 %v514_v21, %v512_v20  ;;  %v839_v27 = vld [vmem:[#allocation2 + $0x8] sm:$0xfc]  ;;  %v840_v53 = vld [vmem:[#allocation2 + $0x10] sm:$0x3] }
 0x10d   : > { %v553_v26 = vshll.u32 %v515_v22, 16  ;;  %830 = vmatprep.mubr.bf16.mxu0 %v478_v23  ;;  %v843_v33 = vpack.c.bf16 %v841_v28, %v839_v27  ;;  %v551_v34 = vshrl.u32 %v515_v22, 16  ;;  %v842_v55 = vpack.c.bf16 %v840_v53, %v838_v52 }
 0x10e   : > { %v560_v29 = vshll.u32 %v516_v24, 16  ;;  %831 = vmatmul.mubr.bf16.vlgmr.msra.gmra.mrb[4].mxu0 %v477_v25  ;;  %v558_v31 = vshrl.u32 %v516_v24, 16 }
 0x10f   : > { %v555_v30 = vrot.slane %v553_v26, 1  ;;  %v880_v39 = vrot.slane %v843_v33, 1  ;;  %v879_v56 = vrot.slane %v842_v55, 1 }
 0x110   : > { %v562_v32 = vrot.slane %v560_v29, 1 }
 0x111   : > { %v556_v37 = vor.u32 %v555_v30, %v551_v34 }
 0x112   : > { %v563_v35 = vor.u32 %v562_v32, %v558_v31 }
 0x114   : > { %694 = vmatprep.mubr.bf16.mxu1 %v563_v35 }
 0x115   : > { %695 = vmatmul.mubr.bf16.vlgmr.msra.gmra.mrb[0].mxu1 %v556_v37 }
 0x116   : > { %1259 = vmatpush3.bf16.msra.mxu1 %v1347_v36  ;;  %1011 = vmatprep.mubr.bf16.mxu1 %v880_v39 }
 0x117   : > { %1260 = vmatprep.subr.bf16.mxu1 %v1348_v38 }
 0x11a   : > { %1261 = vmatpush3.bf16.msra.mxu1 %v1349_v40 }
 0x11b   : > { %1262 = vmatprep.subr.bf16.mxu1 %v1350_v41 }
 0x11e   : > { %1263 = vmatpush3.bf16.msra.mxu1 %v1351_v42 }
 0x11f   : > { %1264 = vmatprep.subr.bf16.mxu1 %v1352_v43 }
 0x122   : > { %1265 = vmatpush3.bf16.msra.mxu1 %v1353_v44 }
 0x123   : > { %1266 = vmatprep.subr.bf16.mxu1 %v1354_v45 }
 0x126   : > { %1267 = vmatpush3.bf16.msra.mxu1 %v1355_v46 }
 0x127   : > { %1268 = vmatprep.subr.bf16.mxu1 %v1356_v47 }
 0x12a   : > { %1269 = vmatpush3.bf16.msra.mxu1 %v1357_v48 }
 0x12b   : > { %1270 = vmatprep.subr.bf16.mxu1 %v1358_v49 }
 0x12e   : > { %1271 = vmatpush3.bf16.msra.mxu1 %v1359_v50 }
 0x12f   : > { %1272 = vmatprep.subr.bf16.mxu1 %v1360_v51 }
 0x132   : > { %1273 = vmatpush3.bf16.msra.mxu1 %v1361_v54 }
 0x135   : > { %1012 = vmatmul.mubr.bf16.vlgmr.msra.gmra.mrb[4].mxu1 %v879_v56 }
 0x1e1   : > { %v1252_v57 = vpop.f32.mrb[4].mxu0 }
 0x1e2   : > { %v1253_v58 = vpop.f32.mrb[5].mxu0 }
 0x1e3   : > { %v1254_v59 = vadd.f32 %v1253_v58, %v1252_v57  ;;  %v1255_v60 = vpop.f32.mrb[6].mxu0 }
 0x1e4   : > { %v1256_v61 = vpop.f32.mrb[7].mxu0 }
 0x1e8   : > { %v1230_v62 = vpop.f32.mrb[0].mxu1 }
 0x1e9   : > { %v1231_v63 = vpop.f32.mrb[1].mxu1 }
 0x1ea   : > { %v1232_v0 = vadd.f32 %v1231_v63, %v1230_v62  ;;  %v1233_v1 = vpop.f32.mrb[2].mxu1 }
 0x1eb   : > { %v1234_v2 = vpop.f32.mrb[3].mxu1 }
 0x1ec   : > { %v833_v3 = vadd.f32 %v1254_v59, %v1232_v0 }
 0x208   : > { %v1274_v4 = vpop.f32.mrb[4].mxu1 }
 0x209   : > { %v1275_v5 = vpop.f32.mrb[5].mxu1 }
 0x20a   : > { %v1276_v6 = vadd.f32 %v1275_v5, %v1274_v4  ;;  %v1277_v7 = vpop.f32.mrb[6].mxu1 }
 0x20b   : > { %v1278_v8 = vpop.f32.mrb[7].mxu1 }
 0x20c   : > { %v1019_v9 = vadd.f32 %v1276_v6, %v833_v3 }
 0x20e   : > { %1021 = vst.msk [vmem:[%s273_s27] sm:$0xff] %vm1020_vm0, %v1019_v9 }
 0x20f PF: > { %s17_s24 = sadd.s32 1, %s1368_s24  }
 0x210   : > { %p14_p4 = scmp.ge.s32.totalorder %s17_s24, 4  }
 0x212   :  { %16 = sbr.rel (!%p14_p4) target bundleno = 1 (0x1), region = 80 }

// kernel: densenet_forward.15
= control target key start
LH: loop header
LB: loop body
LE: loop exit
PB: predicated region body
PF: predicated region fallthrough
CT: control target
= control target key end

     0   :  { %s1500_s24 = smov 0   ;;  %s1763_s0 = inlined_call_operand.vmem [shape: f32[2,8,192], index: 0, kind: input, shape index: {}]   ;;  %s1764_s1 = inlined_call_operand.vmem [shape: f32[1,192], index: 1, kind: input, shape index: {}]   ;;  %s1765_s2 = inlined_call_operand.vmem [shape: f32[1,192], index: 2, kind: input, shape index: {}]   ;;  %s1766_s3 = inlined_call_operand.vmem [shape: bf16[192,256], index: 3, kind: input, shape index: {}]   ;;  %s1767_s4 = inlined_call_operand.vmem [shape: f32[1,256], index: 4, kind: input, shape index: {}]   ;;  %s1768_s5 = inlined_call_operand.vmem [shape: f32[1,256], index: 5, kind: input, shape index: {}]   ;;  %s1769_s6 = inlined_call_operand.vmem [shape: bf16[3,256,64], index: 6, kind: input, shape index: {}]   ;;  %s1770_s7 = inlined_call_operand.vmem [shape: f32[2,8,64], index: 7, kind: output, shape index: {}]  }
   0x1 LB: > { %s1144_s25 = sadd.s32 4294967295, %s1457_s24   ;;  %p1148_p0 = scmp.ge.s32.totalorder %s1457_s24, 1  ;;  %s1457_s24 = sphi %s1500_s24, %s17_s24  }
   0x2   : > { %p237_p1 = scmp.lt.s32.totalorder %s1457_s24, 3 }
   0x4   : > { %p238_p2 = pnand %p1148_p0, %p237_p1 }
   0x5   : > { %v1367_v0 = vld [vmem:[%s1766_s3 + $0x4] ss:$8 sps:$4 sm:$0xff] (!%p238_p2)   ;;  %v1369_v1 = vld [vmem:[%s1766_s3] ss:$8 sps:$4 sm:$0xff] (!%p238_p2)   ;;  %v1370_v2 = vld [vmem:[%s1766_s3 + $0x14] ss:$8 sps:$4 sm:$0xff] (!%p238_p2)   ;;  %v282_v5 = vlaneseq (!%p238_p2) }
   0x6   : > { %241 = sbr.rel (%p238_p2) target bundleno = 545 (0x221), region = 48  ;;  %460 = vmatprep.subr.bf16.mxu0 (!%p238_p2), %v1367_v0  ;;  %p268_p3 = scmp.lt.s32.totalorder (!%p238_p2), %s1144_s25, 1  ;;  %v1372_v3 = vld [vmem:[%s1766_s3 + $0x10] ss:$8 sps:$4 sm:$0xff] (!%p238_p2)   ;;  %v1373_v4 = vld [vmem:[%s1766_s3 + $0x24] ss:$8 sps:$4 sm:$0xff] (!%p238_p2)  }
   0x7   : > { %461 = vmatpush1.bf16.msra.mxu0 (!%p238_p2), %v1369_v1  ;;  %v1375_v6 = vld [vmem:[%s1766_s3 + $0x20] ss:$8 sps:$4 sm:$0xff] (!%p238_p2)   ;;  %v1376_v7 = vld [vmem:[%s1766_s3 + $0x34] ss:$8 sps:$4 sm:$0xff] (!%p238_p2)   ;;  %v283_v8 = vshrl.u32 (!%p238_p2), %v282_v5, 7  ;;  %vm456_vm0 = vcmask (!%p238_p2), 523264  }
   0x8   : > { %462 = vmatprep.subr.bf16.mxu0 (!%p238_p2), %v1370_v2  ;;  %v1378_v9 = vld [vmem:[%s1766_s3 + $0x30] ss:$8 sps:$4 sm:$0xff] (!%p238_p2)   ;;  %v1379_v10 = vld [vmem:[%s1766_s3 + $0x44] ss:$8 sps:$4 sm:$0xff] (!%p238_p2)   ;;  %v1381_v13 = vld [vmem:[%s1766_s3 + $0x40] ss:$8 sps:$4 sm:$0xff] (!%p238_p2)  }
   0x9   : > { %v1541_v11 = vsub.s32 (!%p238_p2), 0, %v283_v8  ;;  %v1543_v12 = vsub.s32 (!%p238_p2), 1, %v283_v8  ;;  %v1382_v14 = vld [vmem:[%s1766_s3 + $0x54] ss:$8 sps:$4 sm:$0xff] (!%p238_p2)   ;;  %v280_v17 = vld [vmem:[%s1764_s1] sm:$0x3] (!%p238_p2) }
   0xa   : > { %v294_v20 = vld [vmem:[%s1765_s2] sm:$0x3] (!%p238_p2)  ;;  %v1384_v21 = vld [vmem:[%s1766_s3 + $0x50] ss:$8 sps:$4 sm:$0xff] (!%p238_p2)   ;;  %v1385_v24 = vld [vmem:[%s1766_s3 + $0x64] ss:$8 sps:$4 sm:$0xff] (!%p238_p2)  }
   0xb   : > { %463 = vmatpush1.bf16.msra.mxu0 (!%p238_p2), %v1372_v3  ;;  %v285_v18 = vrot.slane (!%p238_p2), %v280_v17, %v1541_v11  ;;  %v289_v19 = vrot.slane (!%p238_p2), %v280_v17, %v1543_v12  ;;  %v299_v22 = vrot.slane (!%p238_p2), %v294_v20, %v1541_v11  ;;  %v303_v23 = vrot.slane (!%p238_p2), %v294_v20, %v1543_v12  ;;  %v1405_v27 = vld [vmem:[%s1769_s6 + $0xc0] sm:$0xff] (!%p238_p2)   ;;  %v1388_v32 = vld [vmem:[%s1766_s3 + $0x74] ss:$8 sps:$4 sm:$0xff] (!%p238_p2)   ;;  %v1409_v34 = vld [vmem:[%s1769_s6 + $0xc8] sm:$0xff] (!%p238_p2)  }
   0xc   : > { %464 = vmatprep.subr.bf16.mxu0 (!%p238_p2), %v1373_v4  ;;  %v1406_v29 = vld [vmem:[%s1769_s6 + $0x80] sm:$0xff] (!%p238_p2)   ;;  %1292 = vmatprep.subr.bf16.mxu1 (!%p238_p2), %v1405_v27  ;;  %v1390_v35 = vld [vmem:[%s1766_s3 + $0x70] ss:$8 sps:$4 sm:$0xff] (!%p238_p2)   ;;  %v1410_v37 = vld [vmem:[%s1769_s6 + $0x88] sm:$0xff] (!%p238_p2)   ;;  %v1459_v61 = vmov (!%p238_p2), 0.0  }
   0xd   : > { %s1772_s25 = smov (!%p268_p3, %s1144_s25), 1  ;;  %v1387_v30 = vld [vmem:[%s1766_s3 + $0x60] ss:$8 sps:$4 sm:$0xff]   ;;  %1293 = vmatpush3.bf16.msra.mxu1 %v1406_v29  ;;  %v1391_v38 = vld [vmem:[%s1766_s3 + $0x84] ss:$8 sps:$4 sm:$0xff]   ;;  %v1411_v52 = vld [vmem:[%s1769_s6 + $0x150] sm:$0xff]  }
   0xe   : > { %s1291_s17 = sshll.u32 %s1772_s25, 4  ;;  %1294 = vmatprep.subr.bf16.mxu1 %v1409_v34  ;;  %v1393_v40 = vld [vmem:[%s1766_s3 + $0x80] ss:$8 sps:$4 sm:$0xff]   ;;  %v1394_v41 = vld [vmem:[%s1766_s3 + $0x94] ss:$8 sps:$4 sm:$0xff]   ;;  %531 = vst [vmem:[#allocation2] sm:$0xff] %v1459_v61 }
   0xf   : > { %465 = vmatpush1.bf16.msra.mxu0 %v1375_v6  ;;  %s272_s26 = scalar_lea.vmem %s1763_s0, %s1291_s17  ;;  %v1396_v42 = vld [vmem:[%s1766_s3 + $0x90] ss:$8 sps:$4 sm:$0xff]   ;;  %v1397_v43 = vld [vmem:[%s1766_s3 + $0xa4] ss:$8 sps:$4 sm:$0xff]   ;;  %v1399_v44 = vld [vmem:[%s1766_s3 + $0xa0] ss:$8 sps:$4 sm:$0xff]  }
  0x10   : > { %466 = vmatprep.subr.bf16.mxu0 %v1376_v7  ;;  %v278_v15 = vld [vmem:[%s272_s26] sm:$0xff]  ;;  %v279_v16 = vld [vmem:[%s272_s26 + $0x8] sm:$0xff]  ;;  %v1400_v45 = vld [vmem:[%s1766_s3 + $0xb4] ss:$8 sps:$4 sm:$0xff]   ;;  %533 = vst [vmem:[#allocation2 + $0x10] sm:$0x3] %v1459_v61 }
  0x11   : > { %v293_v25 = vmul.f32 %v289_v19, %v279_v16  ;;  %v292_v26 = vmul.f32 %v285_v18, %v278_v15  ;;  %1295 = vmatpush3.bf16.msra.mxu1 %v1410_v37  ;;  %v1402_v46 = vld [vmem:[%s1766_s3 + $0xb0] ss:$8 sps:$4 sm:$0xff]   ;;  %v1403_v47 = vld [vmem:[%s1769_s6 + $0x140] sm:$0xff]   ;;  %v1407_v50 = vld [vmem:[%s1769_s6 + $0x148] sm:$0xff]   ;;  %532 = vst [vmem:[#allocation2 + $0x8] sm:$0xff] %v1459_v61  ;;  %s1151_s12 = sshll.u32 %s1772_s25, 3 }
  0x12   : > { %v1404_v48 = vld [vmem:[%s1769_s6 + $0x100] sm:$0xff]   ;;  %v1408_v51 = vld [vmem:[%s1769_s6 + $0x108] sm:$0xff]   ;;  %v1412_v53 = vld [vmem:[%s1769_s6 + $0x110] sm:$0xff]   ;;  %534 = vst [vmem:[#allocation2 + $0x18] sm:$0x3] %v1459_v61  ;;  %s276_s15 = scalar_lea.vmem %s1770_s7, %s1151_s12 }
  0x13   : > { %467 = vmatpush1.bf16.msra.mxu0 %v1378_v9  ;;  %v307_v28 = vadd.f32 %v303_v23, %v293_v25  ;;  %v306_v31 = vadd.f32 %v299_v22, %v292_v26  ;;  %v1413_v54 = vld [vmem:[%s1769_s6 + $0xd0] sm:$0xff]   ;;  %v1415_v56 = vld [vmem:[%s1769_s6 + $0x158] sm:$0xff]   ;;  %v1419_v60 = vld [vmem:[%s1769_s6 + $0x160] sm:$0xff]  }
  0x14   : > { %468 = vmatprep.subr.bf16.mxu0 %v1379_v10  ;;  %v1414_v55 = vld [vmem:[%s1769_s6 + $0x90] sm:$0xff]   ;;  %1296 = vmatprep.subr.bf16.mxu1 %v1413_v54  ;;  %v1416_v57 = vld [vmem:[%s1769_s6 + $0x118] sm:$0xff]   ;;  %v1420_v62 = vld [vmem:[%s1769_s6 + $0x120] sm:$0xff]  }
  0x15   : > { %v309_v33 = vmax.f32 %v307_v28, 0.0  ;;  %v308_v39 = vmax.f32 %v306_v31, 0.0  ;;  %1297 = vmatpush3.bf16.msra.mxu1 %v1414_v55  ;;  %v1417_v58 = vld [vmem:[%s1769_s6 + $0xd8] sm:$0xff]   ;;  %v1421_v63 = vld [vmem:[%s1769_s6 + $0xe0] sm:$0xff]   ;;  %v1423_v1 = vld [vmem:[%s1769_s6 + $0x168] sm:$0xff]  }
  0x16   : > { %v1418_v59 = vld [vmem:[%s1769_s6 + $0x98] sm:$0xff]   ;;  %1298 = vmatprep.subr.bf16.mxu1 %v1417_v58  ;;  %v1422_v0 = vld [vmem:[%s1769_s6 + $0xa0] sm:$0xff]   ;;  %v1424_v2 = vld [vmem:[%s1769_s6 + $0x128] sm:$0xff]  }
  0x17   : > { %469 = vmatpush1.bf16.msra.mxu0 %v1381_v13  ;;  %v311_v36 = vpack.c.bf16 %v309_v33, %v309_v33  ;;  %v310_v49 = vpack.c.bf16 %v308_v39, %v308_v39  ;;  %v1425_v3 = vld [vmem:[%s1769_s6 + $0xe8] sm:$0xff]   ;;  %v1427_v5 = vld [vmem:[%s1769_s6 + $0x170] sm:$0xff]   ;;  %v1431_v8 = vld [vmem:[%s1769_s6 + $0x178] sm:$0xff]  }
  0x18   : > { %470 = vmatprep.subr.bf16.mxu0 %v1382_v14  ;;  %v1426_v4 = vld [vmem:[%s1769_s6 + $0xa8] sm:$0xff]   ;;  %v1428_v6 = vld [vmem:[%s1769_s6 + $0x130] sm:$0xff]   ;;  %v1432_v10 = vld [vmem:[%s1769_s6 + $0x138] sm:$0xff]  }
  0x19   : > { %1176 = vmatprep.mubr.msk.bf16.mxu0 %vm456_vm0, %v311_v36  ;;  %1299 = vmatpush3.bf16.msra.mxu1 %v1418_v59  ;;  %v1429_v7 = vld [vmem:[%s1769_s6 + $0xf0] sm:$0xff]   ;;  %v1433_v13 = vld [vmem:[%s1769_s6 + $0xf8] sm:$0xff]   ;;  %v1435_v15 = vld [vmem:[%s1769_s6 + $0x40] sm:$0xff]  }
  0x1a   : > { %1300 = vmatprep.subr.bf16.mxu1 %v1421_v63  ;;  %v1430_v9 = vld [vmem:[%s1769_s6 + $0xb0] sm:$0xff]   ;;  %v1434_v14 = vld [vmem:[%s1769_s6 + $0xb8] sm:$0xff]   ;;  %v501_v16 = vld [vmem:[%s1767_s4] sm:$0x3] }
  0x1b   : > { %471 = vmatpush1.bf16.msra.mxu0 %v1384_v21  ;;  %v515_v17 = vld [vmem:[%s1768_s5] sm:$0x3]  ;;  %v506_v18 = vrot.slane %v501_v16, %v1541_v11  ;;  %v510_v19 = vrot.slane %v501_v16, %v1543_v12  ;;  %v1438_v58 = vld [vmem:[%s1769_s6 + $0x8] sm:$0xff]   ;;  %v1439_v59 = vld [vmem:[%s1769_s6 + $0x50] sm:$0xff]  }
  0x1c   : > { %472 = vmatprep.subr.bf16.mxu0 %v1385_v24  ;;  %v520_v20 = vrot.slane %v515_v17, %v1541_v11  ;;  %v524_v22 = vrot.slane %v515_v17, %v1543_v12  ;;  %v1436_v54 = vld [vmem:[%s1769_s6] sm:$0xff]   ;;  %v1441_v61 = vld [vmem:[%s1769_s6 + $0x58] sm:$0xff]  }
  0x1d   : > { %1301 = vmatpush3.bf16.msra.mxu1 %v1422_v0  ;;  %v1443_v63 = vld [vmem:[%s1769_s6 + $0x60] sm:$0xff]  }
  0x1e   : > { %1302 = vmatprep.subr.bf16.mxu1 %v1425_v3  ;;  %v1444_v0 = vld [vmem:[%s1769_s6 + $0x20] sm:$0xff]   ;;  %v1447_v3 = vld [vmem:[%s1769_s6 + $0x70] sm:$0xff]  }
  0x1f   : > { %473 = vmatpush1.bf16.msra.mxu0 %v1387_v30 }
  0x20   : > { %474 = vmatprep.subr.bf16.mxu0 %v1388_v32 }
  0x21   : > { %1303 = vmatpush3.bf16.msra.mxu1 %v1426_v4  ;;  %v1448_v4 = vld [vmem:[%s1769_s6 + $0x30] sm:$0xff]  }
  0x22   : > { %1304 = vmatprep.subr.bf16.mxu1 %v1429_v7 }
  0x23   : > { %475 = vmatpush1.bf16.msra.mxu0 %v1390_v35 }
  0x24   : > { %476 = vmatprep.subr.bf16.mxu0 %v1391_v38 }
  0x25   : > { %1305 = vmatpush3.bf16.msra.mxu1 %v1430_v9 }
  0x26   : > { %1306 = vmatprep.subr.bf16.mxu1 %v1433_v13 }
  0x27   : > { %477 = vmatpush1.bf16.msra.mxu0 %v1393_v40 }
  0x28   : > { %478 = vmatprep.subr.bf16.mxu0 %v1394_v41 }
  0x29   : > { %1307 = vmatpush3.bf16.msra.mxu1 %v1434_v14 }
  0x2a   : > { %1314 = vmatprep.subr.bf16.mxu1 %v1435_v15 }
  0x2b   : > { %479 = vmatpush1.bf16.msra.mxu0 %v1396_v42 }
  0x2c   : > { %480 = vmatprep.subr.bf16.mxu0 %v1397_v43 }
  0x2f   : > { %481 = vmatpush1.bf16.msra.mxu0 %v1399_v44 }
  0x30   : > { %482 = vmatprep.subr.bf16.mxu0 %v1400_v45 }
  0x33   : > { %483 = vmatpush1.bf16.msra.mxu0 %v1402_v46 }
  0x34   : > { %1336 = vmatprep.subr.bf16.mxu0 %v1403_v47 }
  0x36   : > { %493 = vmatmul.mubr.bf16.vlgmr.msra.gmra.mrb[0].mxu0 %v310_v49 }
  0x37   : > { %1337 = vmatpush3.bf16.msra.mxu0 %v1404_v48 }
  0x38   : > { %1338 = vmatprep.subr.bf16.mxu0 %v1407_v50 }
  0x3b   : > { %1339 = vmatpush3.bf16.msra.mxu0 %v1408_v51 }
  0x3c   : > { %1340 = vmatprep.subr.bf16.mxu0 %v1411_v52 }
  0x3f   : > { %1341 = vmatpush3.bf16.msra.mxu0 %v1412_v53 }
  0x40   : > { %1342 = vmatprep.subr.bf16.mxu0 %v1415_v56  ;;  %v1437_v56 = vld [vmem:[%s1769_s6 + $0x48] sm:$0xff]  }
  0x43   : > { %1343 = vmatpush3.bf16.msra.mxu0 %v1416_v57 }
  0x44   : > { %1344 = vmatprep.subr.bf16.mxu0 %v1419_v60  ;;  %v1440_v60 = vld [vmem:[%s1769_s6 + $0x10] sm:$0xff]  }
  0x47   : > { %1345 = vmatpush3.bf16.msra.mxu0 %v1420_v62  ;;  %v1442_v62 = vld [vmem:[%s1769_s6 + $0x18] sm:$0xff]  }
  0x48   : > { %1346 = vmatprep.subr.bf16.mxu0 %v1423_v1  ;;  %v1445_v1 = vld [vmem:[%s1769_s6 + $0x68] sm:$0xff]  }
  0x4b   : > { %1347 = vmatpush3.bf16.msra.mxu0 %v1424_v2  ;;  %v1446_v2 = vld [vmem:[%s1769_s6 + $0x28] sm:$0xff]  }
  0x4c   : > { %1348 = vmatprep.subr.bf16.mxu0 %v1427_v5  ;;  %v1449_v5 = vld [vmem:[%s1769_s6 + $0x78] sm:$0xff]  }
  0x4f   : > { %1349 = vmatpush3.bf16.msra.mxu0 %v1428_v6  ;;  %v1450_v6 = vld [vmem:[%s1769_s6 + $0x38] sm:$0xff]  }
  0x50   : > { %1350 = vmatprep.subr.bf16.mxu0 %v1431_v8 }
  0x53   : > { %1351 = vmatpush3.bf16.msra.mxu0 %v1432_v10 }
 0x109   : > { %v494_v21 = vpop.f32.mrb[0].mxu0 }
 0x10a   : > { %v513_v23 = vmul.f32 %v506_v18, %v494_v21  ;;  %v496_v24 = vpop.f32.mrb[1].mxu0 }
 0x10b   : > { %v514_v25 = vmul.f32 %v510_v19, %v496_v24  ;;  %v498_v26 = vpop.f32.mrb[2].mxu0 }
 0x10c   : > { %v527_v27 = vadd.f32 %v520_v20, %v513_v23  ;;  %v499_v28 = vpop.f32.mrb[3].mxu0 }
 0x10d   : > { %v528_v29 = vadd.f32 %v524_v22, %v514_v25 }
 0x10e   : > { %v529_v30 = vmax.f32 %v527_v27, 0.0 }
 0x10f   : > { %v530_v31 = vmax.f32 %v528_v29, 0.0 }
 0x110   : > { %v537_v32 = vrot.slane %v529_v30, 7 }
 0x111   : > { %v538_v33 = vrot.slane %v530_v31, 7 }
 0x112   : > { %541 = vst [vmem:[#allocation2] sm:$0xfe] %v537_v32  ;;  %543 = vst [vmem:[#allocation2 + $0x10] sm:$0x1] %v537_v32 }
 0x113   : > { %542 = vst [vmem:[#allocation2 + $0x8] sm:$0xfe] %v538_v33  ;;  %544 = vst [vmem:[#allocation2 + $0x18] sm:$0x1] %v538_v33 }
 0x119   : > { %v908_v34 = vld [vmem:[#allocation2] sm:$0xfc]  ;;  %v910_v11 = vld [vmem:[#allocation2 + $0x10] sm:$0x3] }
 0x11a   : > { %v581_v35 = vld [vmem:[#allocation2] sm:$0xfe]  ;;  %v909_v36 = vld [vmem:[#allocation2 + $0x8] sm:$0xfc]  ;;  %v911_v12 = vld [vmem:[#allocation2 + $0x18] sm:$0x3]  ;;  %v912_v37 = vpack.c.bf16 %v910_v11, %v908_v34 }
 0x11b   : > { %v582_v38 = vld [vmem:[#allocation2 + $0x8] sm:$0xfe]  ;;  %v913_v39 = vpack.c.bf16 %v911_v12, %v909_v36  ;;  %v584_v40 = vld [vmem:[#allocation2 + $0x18] sm:$0x1]  ;;  %v583_v41 = vld [vmem:[#allocation2 + $0x10] sm:$0x1] }
 0x11c   : > { %v586_v42 = vpack.c.bf16 %v584_v40, %v582_v38  ;;  %v585_v43 = vpack.c.bf16 %v583_v41, %v581_v35  ;;  %v949_v45 = vrot.slane %v912_v37, 1  ;;  %v546_v52 = vld [vmem:[#allocation2 + $0x8] sm:$0xff]  ;;  %v545_v7 = vld [vmem:[#allocation2] sm:$0xff] }
 0x11d   : > { %v950_v44 = vrot.slane %v913_v39, 1  ;;  %v548_v57 = vpack.c.bf16 %v546_v52, %v546_v52  ;;  %v547_v8 = vpack.c.bf16 %v545_v7, %v545_v7 }
 0x11e   : > { %v630_v46 = vshll.u32 %v586_v42, 16  ;;  %v623_v47 = vshll.u32 %v585_v43, 16  ;;  %v628_v48 = vshrl.u32 %v586_v42, 16  ;;  %v621_v51 = vshrl.u32 %v585_v43, 16 }
 0x11f   : > { %1081 = vmatprep.mubr.bf16.mxu0 %v950_v44 }
 0x120   : > { %1082 = vmatmul.mubr.bf16.vlgmr.msra.gmra.mrb[4].mxu0 %v949_v45  ;;  %v632_v49 = vrot.slane %v630_v46, 1  ;;  %v625_v50 = vrot.slane %v623_v47, 1 }
 0x122   : > { %v633_v53 = vor.u32 %v632_v49, %v628_v48  ;;  %v626_v55 = vor.u32 %v625_v50, %v621_v51 }
 0x124   : > { %764 = vmatprep.mubr.bf16.mxu1 %v633_v53 }
 0x125   : > { %765 = vmatmul.mubr.bf16.vlgmr.msra.gmra.mrb[0].mxu1 %v626_v55 }
 0x126   : > { %1315 = vmatpush3.bf16.msra.mxu1 %v1436_v54  ;;  %900 = vmatprep.mubr.bf16.mxu1 %v548_v57 }
 0x127   : > { %1316 = vmatprep.subr.bf16.mxu1 %v1437_v56 }
 0x12a   : > { %1317 = vmatpush3.bf16.msra.mxu1 %v1438_v58 }
 0x12b   : > { %1318 = vmatprep.subr.bf16.mxu1 %v1439_v59 }
 0x12e   : > { %1319 = vmatpush3.bf16.msra.mxu1 %v1440_v60 }
 0x12f   : > { %1320 = vmatprep.subr.bf16.mxu1 %v1441_v61 }
 0x132   : > { %1321 = vmatpush3.bf16.msra.mxu1 %v1442_v62 }
 0x133   : > { %1322 = vmatprep.subr.bf16.mxu1 %v1443_v63 }
 0x136   : > { %1323 = vmatpush3.bf16.msra.mxu1 %v1444_v0 }
 0x137   : > { %1324 = vmatprep.subr.bf16.mxu1 %v1445_v1 }
 0x13a   : > { %1325 = vmatpush3.bf16.msra.mxu1 %v1446_v2 }
 0x13b   : > { %1326 = vmatprep.subr.bf16.mxu1 %v1447_v3 }
 0x13e   : > { %1327 = vmatpush3.bf16.msra.mxu1 %v1448_v4 }
 0x13f   : > { %1328 = vmatprep.subr.bf16.mxu1 %v1449_v5 }
 0x142   : > { %1329 = vmatpush3.bf16.msra.mxu1 %v1450_v6 }
 0x145   : > { %901 = vmatmul.mubr.bf16.vlgmr.msra.gmra.mrb[4].mxu1 %v547_v8 }
 0x1f3   : > { %v1352_v9 = vpop.f32.mrb[4].mxu0 }
 0x1f4   : > { %v1353_v10 = vpop.f32.mrb[5].mxu0 }
 0x1f5   : > { %v1354_v13 = vadd.f32 %v1353_v10, %v1352_v9  ;;  %v1355_v14 = vpop.f32.mrb[6].mxu0 }
 0x1f6   : > { %v1356_v15 = vpop.f32.mrb[7].mxu0 }
 0x1f8   : > { %v1308_v16 = vpop.f32.mrb[0].mxu1 }
 0x1f9   : > { %v1309_v17 = vpop.f32.mrb[1].mxu1 }
 0x1fa   : > { %v1310_v18 = vadd.f32 %v1309_v17, %v1308_v16  ;;  %v1311_v19 = vpop.f32.mrb[2].mxu1 }
 0x1fb   : > { %v1312_v20 = vpop.f32.mrb[3].mxu1 }
 0x218   : > { %v1330_v21 = vpop.f32.mrb[4].mxu1 }
 0x219   : > { %v1331_v22 = vpop.f32.mrb[5].mxu1 }
 0x21a   : > { %v1332_v23 = vadd.f32 %v1331_v22, %v1330_v21  ;;  %v1333_v24 = vpop.f32.mrb[6].mxu1 }
 0x21b   : > { %v1334_v25 = vpop.f32.mrb[7].mxu1 }
 0x21c   : > { %v903_v26 = vadd.f32 %v1332_v23, %v1310_v18 }
 0x21e   : > { %v1089_v27 = vadd.f32 %v1354_v13, %v903_v26 }
 0x220   : > { %1090 = vst.msk [vmem:[%s276_s15] sm:$0xff] %vm456_vm0, %v1089_v27 }
 0x221 PF: > { %s17_s24 = sadd.s32 1, %s1457_s24  }
 0x222   : > { %p14_p4 = scmp.ge.s32.totalorder %s17_s24, 4  }
 0x224   :  { %16 = sbr.rel (!%p14_p4) target bundleno = 1 (0x1), region = 80 }

// kernel: densenet_forward.16
= control target key start
LH: loop header
LB: loop body
LE: loop exit
PB: predicated region body
PF: predicated region fallthrough
CT: control target
= control target key end

     0   :  { %s810_s15 = smov 0   ;;  %s937_s0 = inlined_call_operand.vmem [shape: f32[2,4,512], index: 0, kind: input, shape index: {}]   ;;  %s938_s1 = inlined_call_operand.vmem [shape: f32[1,512], index: 1, kind: input, shape index: {}]   ;;  %s939_s2 = inlined_call_operand.vmem [shape: f32[1,512], index: 2, kind: input, shape index: {}]   ;;  %s940_s3 = inlined_call_operand.vmem [shape: bf16[512,64], index: 3, kind: input, shape index: {}]   ;;  %s941_s4 = inlined_call_operand.vmem [shape: f32[2,4,64], index: 4, kind: output, shape index: {}]  }
   0x1 LB: > { %s650_s16 = sadd.s32 4294967295, %s783_s15   ;;  %p654_p0 = scmp.ge.s32.totalorder %s783_s15, 1  ;;  %s783_s15 = sphi %s810_s15, %s14_s15  }
   0x2   : > { %p162_p1 = scmp.lt.s32.totalorder %s783_s15, 3 }
   0x4   : > { %p163_p2 = pnand %p654_p0, %p162_p1 }
   0x5   : > { %v745_v0 = vld [vmem:[%s940_s3 + $0x40] sm:$0xff] (!%p163_p2)   ;;  %v749_v4 = vld [vmem:[%s940_s3 + $0x48] sm:$0xff] (!%p163_p2)   ;;  %v753_v8 = vld [vmem:[%s940_s3 + $0x50] sm:$0xff] (!%p163_p2)   ;;  %p187_p3 = scmp.lt.s32.totalorder (!%p163_p2), %s650_s16, 1  ;;  %v201_v20 = vlaneseq (!%p163_p2)  ;;  %vm595_vm0 = vcmask (!%p163_p2), 519168  }
   0x6   : > { %166 = sbr.rel (%p163_p2) target bundleno = 258 (0x102), region = 36  ;;  %v746_v1 = vld [vmem:[%s940_s3 + $0xc0] sm:$0xff] (!%p163_p2)   ;;  %693 = vmatprep.subr.bf16.mxu0 (!%p163_p2), %v745_v0  ;;  %v750_v5 = vld [vmem:[%s940_s3 + $0xc8] sm:$0xff] (!%p163_p2)   ;;  %v754_v9 = vld [vmem:[%s940_s3 + $0xd0] sm:$0xff] (!%p163_p2)  }
   0x7   : > { %v747_v2 = vld [vmem:[%s940_s3] sm:$0xff] (!%p163_p2)   ;;  %715 = vmatprep.subr.bf16.mxu1 (!%p163_p2), %v746_v1  ;;  %v751_v6 = vld [vmem:[%s940_s3 + $0x8] sm:$0xff] (!%p163_p2)   ;;  %v755_v10 = vld [vmem:[%s940_s3 + $0x10] sm:$0xff] (!%p163_p2)   ;;  %v202_v25 = vshrl.u32 (!%p163_p2), %v201_v20, 7 }
   0x8   : > { %v748_v3 = vld [vmem:[%s940_s3 + $0x80] sm:$0xff] (!%p163_p2)   ;;  %694 = vmatpush3.bf16.msra.mxu0 (!%p163_p2), %v747_v2  ;;  %v752_v7 = vld [vmem:[%s940_s3 + $0x88] sm:$0xff] (!%p163_p2)   ;;  %v756_v11 = vld [vmem:[%s940_s3 + $0x90] sm:$0xff] (!%p163_p2)  }
   0x9   : > { %716 = vmatpush3.bf16.msra.mxu1 (!%p163_p2), %v748_v3  ;;  %695 = vmatprep.subr.bf16.mxu0 (!%p163_p2), %v749_v4  ;;  %v757_v12 = vld [vmem:[%s940_s3 + $0x58] sm:$0xff] (!%p163_p2)   ;;  %v761_v16 = vld [vmem:[%s940_s3 + $0x60] sm:$0xff] (!%p163_p2)   ;;  %v765_v21 = vld [vmem:[%s940_s3 + $0x68] sm:$0xff] (!%p163_p2)   ;;  %v203_v30 = vsub.s32 (!%p163_p2), 0, %v202_v25  ;;  %v207_v32 = vsub.s32 (!%p163_p2), 1, %v202_v25  ;;  %v211_v34 = vsub.s32 (!%p163_p2), 2, %v202_v25 }
   0xa   : > { %717 = vmatprep.subr.bf16.mxu1 (!%p163_p2), %v750_v5  ;;  %v758_v13 = vld [vmem:[%s940_s3 + $0xd8] sm:$0xff] (!%p163_p2)   ;;  %v762_v17 = vld [vmem:[%s940_s3 + $0xe0] sm:$0xff] (!%p163_p2)   ;;  %v766_v22 = vld [vmem:[%s940_s3 + $0xe8] sm:$0xff] (!%p163_p2)   ;;  %v215_v36 = vsub.s32 (!%p163_p2), 3, %v202_v25 }
   0xb   : > { %v759_v14 = vld [vmem:[%s940_s3 + $0x18] sm:$0xff] (!%p163_p2)   ;;  %v763_v18 = vld [vmem:[%s940_s3 + $0x20] sm:$0xff] (!%p163_p2)   ;;  %v767_v23 = vld [vmem:[%s940_s3 + $0x28] sm:$0xff] (!%p163_p2)  }
   0xc   : > { %696 = vmatpush3.bf16.msra.mxu0 (!%p163_p2), %v751_v6  ;;  %v760_v15 = vld [vmem:[%s940_s3 + $0x98] sm:$0xff] (!%p163_p2)   ;;  %v764_v19 = vld [vmem:[%s940_s3 + $0xa0] sm:$0xff] (!%p163_p2)   ;;  %v768_v24 = vld [vmem:[%s940_s3 + $0xa8] sm:$0xff] (!%p163_p2)  }
   0xd   : > { %718 = vmatpush3.bf16.msra.mxu1 %v752_v7  ;;  %697 = vmatprep.subr.bf16.mxu0 %v753_v8  ;;  %s943_s16 = smov (!%p187_p3, %s650_s16), 1  ;;  %v769_v26 = vld [vmem:[%s940_s3 + $0x70] sm:$0xff]   ;;  %v773_v31 = vld [vmem:[%s940_s3 + $0x78] sm:$0xff]   ;;  %v199_v38 = vld [vmem:[%s938_s1] sm:$0xf] }
   0xe   : > { %719 = vmatprep.subr.bf16.mxu1 %v754_v9  ;;  %v770_v27 = vld [vmem:[%s940_s3 + $0xf0] sm:$0xff]   ;;  %s692_s23 = sshll.u32 %s943_s16, 4  ;;  %v774_v33 = vld [vmem:[%s940_s3 + $0xf8] sm:$0xff]   ;;  %v223_v39 = vld [vmem:[%s939_s2] sm:$0xf]  ;;  %v204_v40 = vrot.slane %v199_v38, %v203_v30  ;;  %v208_v41 = vrot.slane %v199_v38, %v207_v32  ;;  %v212_v45 = vrot.slane %v199_v38, %v211_v34  ;;  %v216_v46 = vrot.slane %v199_v38, %v215_v36  ;;  %s657_s17 = sshll.u32 %s943_s16, 2 }
   0xf   : > { %v771_v28 = vld [vmem:[%s940_s3 + $0x30] sm:$0xff]   ;;  %v775_v35 = vld [vmem:[%s940_s3 + $0x38] sm:$0xff]   ;;  %s191_s10 = scalar_lea.vmem %s937_s0, %s692_s23  ;;  %v228_v42 = vrot.slane %v223_v39, %v203_v30  ;;  %v232_v43 = vrot.slane %v223_v39, %v207_v32  ;;  %v236_v47 = vrot.slane %v223_v39, %v211_v34  ;;  %v240_v48 = vrot.slane %v223_v39, %v215_v36  ;;  %s195_s20 = scalar_lea.vmem %s941_s4, %s657_s17 }
  0x10   : > { %698 = vmatpush3.bf16.msra.mxu0 %v755_v10  ;;  %v772_v29 = vld [vmem:[%s940_s3 + $0xb0] sm:$0xff]   ;;  %v776_v37 = vld [vmem:[%s940_s3 + $0xb8] sm:$0xff]   ;;  %v197_v44 = vld [vmem:[%s191_s10] sm:$0xff]  ;;  %v217_v49 = vcombine.low %v204_v40, %v208_v41  ;;  %v218_v52 = vcombine.low %v212_v45, %v216_v46 }
  0x11   : > { %720 = vmatpush3.bf16.msra.mxu1 %v756_v11  ;;  %699 = vmatprep.subr.bf16.mxu0 %v757_v12  ;;  %v241_v50 = vcombine.low %v228_v42, %v232_v43  ;;  %v198_v51 = vld [vmem:[%s191_s10 + $0x8] sm:$0xff]  ;;  %v242_v53 = vcombine.low %v236_v47, %v240_v48 }
  0x12   : > { %721 = vmatprep.subr.bf16.mxu1 %v758_v13  ;;  %v221_v54 = vmul.f32 %v217_v49, %v197_v44  ;;  %v222_v55 = vmul.f32 %v218_v52, %v198_v51 }
  0x14   : > { %700 = vmatpush3.bf16.msra.mxu0 %v759_v14  ;;  %v245_v56 = vadd.f32 %v241_v50, %v221_v54  ;;  %v246_v57 = vadd.f32 %v242_v53, %v222_v55 }
  0x15   : > { %722 = vmatpush3.bf16.msra.mxu1 %v760_v15  ;;  %701 = vmatprep.subr.bf16.mxu0 %v761_v16 }
  0x16   : > { %723 = vmatprep.subr.bf16.mxu1 %v762_v17  ;;  %v247_v58 = vmax.f32 %v245_v56, 0.0  ;;  %v248_v59 = vmax.f32 %v246_v57, 0.0 }
  0x18   : > { %702 = vmatpush3.bf16.msra.mxu0 %v763_v18  ;;  %v251_v60 = vcombine.high %v247_v58, %v247_v58  ;;  %v252_v61 = vcombine.high %v248_v59, %v248_v59  ;;  %v255_v62 = vpack.c.bf16 %v247_v58, %v247_v58  ;;  %v257_v0 = vpack.c.bf16 %v248_v59, %v248_v59 }
  0x19   : > { %724 = vmatpush3.bf16.msra.mxu1 %v764_v19  ;;  %703 = vmatprep.subr.bf16.mxu0 %v765_v21 }
  0x1a   : > { %725 = vmatprep.subr.bf16.mxu1 %v766_v22  ;;  %v256_v63 = vpack.c.bf16 %v251_v60, %v251_v60  ;;  %v258_v1 = vpack.c.bf16 %v252_v61, %v252_v61 }
  0x1c   : > { %704 = vmatpush3.bf16.msra.mxu0 %v767_v23  ;;  %547 = vmatprep.mubr.bf16.mxu0 %v256_v63 }
  0x1d   : > { %726 = vmatpush3.bf16.msra.mxu1 %v768_v24  ;;  %705 = vmatprep.subr.bf16.mxu0 %v769_v26 }
  0x1e   : > { %727 = vmatprep.subr.bf16.mxu1 %v770_v27  ;;  %587 = vmatprep.mubr.bf16.mxu1 %v258_v1 }
  0x20   : > { %706 = vmatpush3.bf16.msra.mxu0 %v771_v28 }
  0x21   : > { %728 = vmatpush3.bf16.msra.mxu1 %v772_v29  ;;  %707 = vmatprep.subr.bf16.mxu0 %v773_v31 }
  0x22   : > { %729 = vmatprep.subr.bf16.mxu1 %v774_v33 }
  0x24   : > { %708 = vmatpush3.bf16.msra.mxu0 %v775_v35 }
  0x25   : > { %730 = vmatpush3.bf16.msra.mxu1 %v776_v37 }
  0x27   : > { %548 = vmatmul.mubr.bf16.vlgmr.msra.gmra.mrb[0].mxu0 %v255_v62 }
  0x28   : > { %588 = vmatmul.mubr.bf16.vlgmr.msra.gmra.mrb[0].mxu1 %v257_v0 }
  0xfa   : > { %v709_v2 = vpop.f32.mrb[0].mxu0 }
  0xfb   : > { %v731_v3 = vpop.f32.mrb[0].mxu1  ;;  %v710_v4 = vpop.f32.mrb[1].mxu0 }
  0xfc   : > { %v711_v5 = vadd.f32 %v710_v4, %v709_v2  ;;  %v732_v6 = vpop.f32.mrb[1].mxu1  ;;  %v712_v7 = vpop.f32.mrb[2].mxu0 }
  0xfd   : > { %v733_v8 = vadd.f32 %v732_v6, %v731_v3  ;;  %v734_v9 = vpop.f32.mrb[2].mxu1  ;;  %v713_v10 = vpop.f32.mrb[3].mxu0 }
  0xfe   : > { %v735_v11 = vpop.f32.mrb[3].mxu1 }
  0xff   : > { %v590_v12 = vadd.f32 %v733_v8, %v711_v5 }
 0x101   : > { %596 = vst.msk [vmem:[%s195_s20] sm:$0xf] %vm595_vm0, %v590_v12 }
 0x102 PF: > { %s14_s15 = sadd.s32 1, %s783_s15  }
 0x103   : > { %p11_p4 = scmp.ge.s32.totalorder %s14_s15, 4  }
 0x105   :  { %13 = sbr.rel (!%p11_p4) target bundleno = 1 (0x1), region = 66 }

// kernel: densenet_forward.17
= control target key start
LH: loop header
LB: loop body
LE: loop exit
PB: predicated region body
PF: predicated region fallthrough
CT: control target
= control target key end

     0   :  { %s1036_s24 = smov 0   ;;  %s1193_s0 = inlined_call_operand.vmem [shape: f32[2,4,64], index: 0, kind: input, shape index: {}]   ;;  %s1194_s1 = inlined_call_operand.vmem [shape: f32[1,64], index: 1, kind: input, shape index: {}]   ;;  %s1195_s2 = inlined_call_operand.vmem [shape: f32[1,64], index: 2, kind: input, shape index: {}]   ;;  %s1196_s3 = inlined_call_operand.vmem [shape: bf16[64,128], index: 3, kind: input, shape index: {}]   ;;  %s1197_s4 = inlined_call_operand.vmem [shape: f32[1,128], index: 4, kind: input, shape index: {}]   ;;  %s1198_s5 = inlined_call_operand.vmem [shape: f32[1,128], index: 5, kind: input, shape index: {}]   ;;  %s1199_s6 = inlined_call_operand.vmem [shape: bf16[3,128,32], index: 6, kind: input, shape index: {}]   ;;  %s1200_s7 = inlined_call_operand.vmem [shape: f32[2,4,32], index: 7, kind: output, shape index: {}]  }
   0x1 LB: > { %s765_s25 = sadd.s32 4294967295, %s992_s24   ;;  %p769_p0 = scmp.ge.s32.totalorder %s992_s24, 1  ;;  %s992_s24 = sphi %s1036_s24, %s17_s24  }
   0x2   : > { %p236_p1 = scmp.lt.s32.totalorder %s992_s24, 3 }
   0x4   : > { %p237_p2 = pnand %p769_p0, %p236_p1 }
   0x5   : > { %v958_v0 = vld [vmem:[%s1196_s3] sm:$0xff] (!%p237_p2)   ;;  %v994_v1 = vmov (!%p237_p2), 0.0   ;;  %v959_v2 = vld [vmem:[%s1196_s3 + $0x8] sm:$0xff] (!%p237_p2)   ;;  %vm995_vm0 = vmmov (!%p237_p2), 0   ;;  %p266_p3 = scmp.lt.s32.totalorder (!%p237_p2), %s765_s25, 1  ;;  %v960_v5 = vld [vmem:[%s1196_s3 + $0x10] sm:$0xff] (!%p237_p2)  }
   0x6   : > { %240 = sbr.rel (%p237_p2) target bundleno = 501 (0x1f5), region = 48  ;;  %871 = vmatprep.subr.bf16.mxu0 (!%p237_p2), %v994_v1  ;;  %387 = vst [vmem:[#allocation2] sm:$0x3f] (!%p237_p2), %v994_v1  ;;  %903 = vmatprep.subr.bf16.mxu1 (!%p237_p2), %v994_v1  ;;  %v772_v3 = vld [vmem:[%s1194_s1] ss:$0 sm:$0xff] (!%p237_p2)  ;;  %v964_v6 = vld [vmem:[%s1199_s6 + $0x8] sm:$0xff] (!%p237_p2)  }
   0x7   : > { %872 = vmatpush3.bf16.msra.mxu0 (!%p237_p2), %v958_v0  ;;  %879 = vmatprep.mubr.msk.bf16.mxu0 (!%p237_p2), %vm995_vm0, %v994_v1  ;;  %v962_v4 = vld [vmem:[%s1199_s6] sm:$0xff] (!%p237_p2)   ;;  %v961_v9 = vld [vmem:[%s1196_s3 + $0x18] sm:$0xff] (!%p237_p2)   ;;  %v966_v11 = vld [vmem:[%s1199_s6 + $0x10] sm:$0xff] (!%p237_p2)   ;;  %vm326_vm1 = vcmask (!%p237_p2), 523264   ;;  %vm710_vm2 = vcmask (!%p237_p2), 257024  }
   0x8   : > { %873 = vmatprep.subr.bf16.mxu0 (!%p237_p2), %v994_v1  ;;  %919 = vmatprep.mubr.msk.bf16.mxu1 (!%p237_p2), %vm995_vm0, %v994_v1  ;;  %v773_v8 = vld [vmem:[%s1195_s2] ss:$0 sm:$0xff] (!%p237_p2)  ;;  %v968_v15 = vld [vmem:[%s1199_s6 + $0x18] sm:$0xff] (!%p237_p2)   ;;  %v965_v17 = vld [vmem:[%s1199_s6 + $0x48] sm:$0xff] (!%p237_p2)  }
   0x9   : > { %904 = vmatpush3.bf16.msra.mxu1 (!%p237_p2), %v962_v4  ;;  %v963_v13 = vld [vmem:[%s1199_s6 + $0x40] sm:$0xff] (!%p237_p2)   ;;  %v967_v18 = vld [vmem:[%s1199_s6 + $0x50] sm:$0xff] (!%p237_p2)   ;;  %v969_v19 = vld [vmem:[%s1199_s6 + $0x58] sm:$0xff] (!%p237_p2)  }
   0xa   : > { %905 = vmatprep.subr.bf16.mxu1 (!%p237_p2), %v994_v1  ;;  %v970_v20 = vld [vmem:[%s1199_s6 + $0x20] sm:$0xff] (!%p237_p2)   ;;  %v972_v22 = vld [vmem:[%s1199_s6 + $0x28] sm:$0xff] (!%p237_p2)   ;;  %v974_v24 = vld [vmem:[%s1199_s6 + $0x30] sm:$0xff] (!%p237_p2)  }
   0xb   : > { %874 = vmatpush3.bf16.msra.mxu0 (!%p237_p2), %v959_v2  ;;  %v971_v21 = vld [vmem:[%s1199_s6 + $0x60] sm:$0xff] (!%p237_p2)   ;;  %v973_v23 = vld [vmem:[%s1199_s6 + $0x68] sm:$0xff] (!%p237_p2)   ;;  %v975_v25 = vld [vmem:[%s1199_s6 + $0x70] sm:$0xff] (!%p237_p2)  }
   0xc   : > { %875 = vmatprep.subr.bf16.mxu0 (!%p237_p2), %v994_v1  ;;  %v976_v26 = vld [vmem:[%s1199_s6 + $0x38] sm:$0xff] (!%p237_p2)   ;;  %v779_v28 = vld [vmem:[%s1197_s4] ss:$0 sm:$0xff] (!%p237_p2)  ;;  %v979_v42 = vld [vmem:[%s1199_s6 + $0x88] sm:$0xff] (!%p237_p2)  }
   0xd   : > { %s1202_s25 = smov (!%p266_p3, %s765_s25), 1  ;;  %906 = vmatpush3.bf16.msra.mxu1 %v964_v6  ;;  %v977_v27 = vld [vmem:[%s1199_s6 + $0x78] sm:$0xff]   ;;  %v780_v30 = vld [vmem:[%s1198_s5] ss:$0 sm:$0xff]  ;;  %v980_v43 = vld [vmem:[%s1199_s6 + $0x90] sm:$0xff]  }
   0xe   : > { %s770_s13 = sshll.u32 %s1202_s25, 2  ;;  %907 = vmatprep.subr.bf16.mxu1 %v994_v1  ;;  %v978_v39 = vld [vmem:[%s1199_s6 + $0x80] sm:$0xff]   ;;  %v981_v44 = vld [vmem:[%s1199_s6 + $0x98] sm:$0xff]   ;;  %v983_v46 = vld [vmem:[%s1199_s6 + $0xa8] sm:$0xff]  }
   0xf   : > { %s269_s16 = scalar_lea.vmem %s1193_s0, %s770_s13  ;;  %876 = vmatpush3.bf16.msra.mxu0 %v960_v5  ;;  %v982_v45 = vld [vmem:[%s1199_s6 + $0xa0] sm:$0xff]   ;;  %v984_v47 = vld [vmem:[%s1199_s6 + $0xb0] sm:$0xff]   ;;  %v985_v48 = vld [vmem:[%s1199_s6 + $0xb8] sm:$0xff]   ;;  %s273_s12 = scalar_lea.vmem %s1200_s7, %s770_s13 }
  0x10   : > { %v275_v7 = vld [vmem:[%s269_s16] sm:$0xf]  ;;  %877 = vmatprep.subr.bf16.mxu0 %v994_v1 }
  0x11   : > { %v283_v10 = vmul.f32 %v772_v3, %v275_v7  ;;  %908 = vmatpush3.bf16.msra.mxu1 %v966_v11 }
  0x12   : > { %909 = vmatprep.subr.bf16.mxu1 %v994_v1 }
  0x13   : > { %v291_v12 = vadd.f32 %v773_v8, %v283_v10  ;;  %878 = vmatpush3.bf16.msra.mxu0 %v961_v9 }
  0x14   : > { %883 = vmatprep.subr.bf16.mxu0 %v994_v1 }
  0x15   : > { %v292_v14 = vmax.f32 %v291_v12, 0.0  ;;  %910 = vmatpush3.bf16.msra.mxu1 %v968_v15 }
  0x16   : > { %911 = vmatprep.subr.bf16.mxu1 %v994_v1 }
  0x17   : > { %v293_v16 = vpack.c.bf16 %v292_v14, %v292_v14 }
  0x19   : > { %880 = vmatmul.mubr.msk.bf16.vlgmr.msra.gmra.mrb[0].mxu0 %vm326_vm1, %v293_v16  ;;  %912 = vmatpush3.bf16.msra.mxu1 %v970_v20 }
  0x1a   : > { %884 = vmatpush3.bf16.msra.mxu0 %v963_v13  ;;  %899 = vmatprep.mubr.msk.bf16.mxu0 %vm995_vm0, %v994_v1 }
  0x1b   : > { %885 = vmatprep.subr.bf16.mxu0 %v994_v1  ;;  %913 = vmatprep.subr.bf16.mxu1 %v994_v1 }
  0x1d   : > { %914 = vmatpush3.bf16.msra.mxu1 %v972_v22 }
  0x1e   : > { %886 = vmatpush3.bf16.msra.mxu0 %v965_v17  ;;  %915 = vmatprep.subr.bf16.mxu1 %v994_v1 }
  0x1f   : > { %887 = vmatprep.subr.bf16.mxu0 %v994_v1 }
  0x21   : > { %916 = vmatpush3.bf16.msra.mxu1 %v974_v24 }
  0x22   : > { %888 = vmatpush3.bf16.msra.mxu0 %v967_v18  ;;  %917 = vmatprep.subr.bf16.mxu1 %v994_v1 }
  0x23   : > { %889 = vmatprep.subr.bf16.mxu0 %v994_v1 }
  0x25   : > { %918 = vmatpush3.bf16.msra.mxu1 %v976_v26 }
  0x26   : > { %890 = vmatpush3.bf16.msra.mxu0 %v969_v19  ;;  %923 = vmatprep.subr.bf16.mxu1 %v994_v1 }
  0x27   : > { %891 = vmatprep.subr.bf16.mxu0 %v994_v1 }
  0x2a   : > { %892 = vmatpush3.bf16.msra.mxu0 %v971_v21 }
  0x2b   : > { %893 = vmatprep.subr.bf16.mxu0 %v994_v1 }
  0x2e   : > { %894 = vmatpush3.bf16.msra.mxu0 %v973_v23 }
  0x2f   : > { %895 = vmatprep.subr.bf16.mxu0 %v994_v1 }
  0x32   : > { %896 = vmatpush3.bf16.msra.mxu0 %v975_v25 }
  0x33   : > { %897 = vmatprep.subr.bf16.mxu0 %v994_v1 }
  0x36   : > { %898 = vmatpush3.bf16.msra.mxu0 %v977_v27 }
  0xec   : > { %v364_v29 = vpop.f32.mrb[0].mxu0 }
  0xed   : > { %v377_v31 = vmul.f32 %v779_v28, %v364_v29  ;;  %v881_v32 = vpop.f32.mrb[1].mxu0 }
  0xee   : > { %v367_v33 = vpop.f32.mrb[2].mxu0 }
  0xef   : > { %v385_v34 = vadd.f32 %v780_v30, %v377_v31  ;;  %v882_v35 = vpop.f32.mrb[3].mxu0 }
  0xf1   : > { %v386_v36 = vmax.f32 %v385_v34, 0.0 }
  0xf3   : > { %388 = vst [vmem:[#allocation2 + $0x1] sm:$0xf] %v386_v36 }
  0xfa   : > { %v407_v37 = vld [vmem:[#allocation2 + $0x1] sm:$0xf] }
  0xfb   : > { %v389_v38 = vld [vmem:[#allocation2] sm:$0xf]  ;;  %v408_v40 = vpack.c.bf16 %v407_v37, %v407_v37 }
  0xfc   : > { %v390_v41 = vpack.c.bf16 %v389_v38, %v389_v38  ;;  %v602_v49 = vld [vmem:[#allocation2 + $0x2] sm:$0xf] }
  0xfd   : > { %900 = vmatmul.mubr.bf16.vlgmr.msra.gmra.mrb[4].mxu0 %v408_v40  ;;  %v603_v50 = vpack.c.bf16 %v602_v49, %v602_v49 }
  0xfe   : > { %920 = vmatmul.mubr.bf16.vlgmr.msra.gmra.mrb[0].mxu1 %v390_v41 }
  0xff   : > { %924 = vmatpush3.bf16.msra.mxu1 %v978_v39  ;;  %939 = vmatprep.mubr.msk.bf16.mxu1 %vm995_vm0, %v994_v1 }
 0x100   : > { %925 = vmatprep.subr.bf16.mxu1 %v994_v1 }
 0x103   : > { %926 = vmatpush3.bf16.msra.mxu1 %v979_v42 }
 0x104   : > { %927 = vmatprep.subr.bf16.mxu1 %v994_v1 }
 0x107   : > { %928 = vmatpush3.bf16.msra.mxu1 %v980_v43 }
 0x108   : > { %929 = vmatprep.subr.bf16.mxu1 %v994_v1 }
 0x10b   : > { %930 = vmatpush3.bf16.msra.mxu1 %v981_v44 }
 0x10c   : > { %931 = vmatprep.subr.bf16.mxu1 %v994_v1 }
 0x10f   : > { %932 = vmatpush3.bf16.msra.mxu1 %v982_v45 }
 0x110   : > { %933 = vmatprep.subr.bf16.mxu1 %v994_v1 }
 0x113   : > { %934 = vmatpush3.bf16.msra.mxu1 %v983_v46 }
 0x114   : > { %935 = vmatprep.subr.bf16.mxu1 %v994_v1 }
 0x117   : > { %936 = vmatpush3.bf16.msra.mxu1 %v984_v47 }
 0x118   : > { %937 = vmatprep.subr.bf16.mxu1 %v994_v1 }
 0x11b   : > { %938 = vmatpush3.bf16.msra.mxu1 %v985_v48 }
 0x11e   : > { %940 = vmatmul.mubr.bf16.vlgmr.msra.gmra.mrb[0].mxu1 %v603_v50 }
 0x1d0   : > { %v508_v51 = vpop.f32.mrb[4].mxu0 }
 0x1d1   : > { %v901_v52 = vpop.f32.mrb[5].mxu0 }
 0x1d2   : > { %v511_v53 = vpop.f32.mrb[6].mxu0 }
 0x1d3   : > { %v902_v54 = vpop.f32.mrb[7].mxu0 }
 0x1f1   : > { %v703_v55 = vpop.f32.mrb[0].mxu1 }
 0x1f2   : > { %v943_v56 = vadd.f32 %v703_v55, %v508_v51  ;;  %v941_v57 = vpop.f32.mrb[1].mxu1 }
 0x1f3   : > { %v706_v58 = vpop.f32.mrb[2].mxu1 }
 0x1f4   : > { %711 = vst.msk [vmem:[%s273_s12] sm:$0xf] %vm710_vm2, %v943_v56  ;;  %v942_v59 = vpop.f32.mrb[3].mxu1 }
 0x1f5 PF: > { %s17_s24 = sadd.s32 1, %s992_s24  }
 0x1f6   : > { %p14_p4 = scmp.ge.s32.totalorder %s17_s24, 4  }
 0x1f8   :  { %16 = sbr.rel (!%p14_p4) target bundleno = 1 (0x1), region = 80 }

// kernel: densenet_forward.18
= control target key start
LH: loop header
LB: loop body
LE: loop exit
PB: predicated region body
PF: predicated region fallthrough
CT: control target
= control target key end

     0   :  { %s1062_s24 = smov 0   ;;  %s1227_s0 = inlined_call_operand.vmem [shape: f32[2,4,96], index: 0, kind: input, shape index: {}]   ;;  %s1228_s1 = inlined_call_operand.vmem [shape: f32[1,96], index: 1, kind: input, shape index: {}]   ;;  %s1229_s2 = inlined_call_operand.vmem [shape: f32[1,96], index: 2, kind: input, shape index: {}]   ;;  %s1230_s3 = inlined_call_operand.vmem [shape: bf16[96,128], index: 3, kind: input, shape index: {}]   ;;  %s1231_s4 = inlined_call_operand.vmem [shape: f32[1,128], index: 4, kind: input, shape index: {}]   ;;  %s1232_s5 = inlined_call_operand.vmem [shape: f32[1,128], index: 5, kind: input, shape index: {}]   ;;  %s1233_s6 = inlined_call_operand.vmem [shape: bf16[3,128,32], index: 6, kind: input, shape index: {}]   ;;  %s1234_s7 = inlined_call_operand.vmem [shape: f32[2,4,32], index: 7, kind: output, shape index: {}]  }
   0x1 LB: > { %s781_s25 = sadd.s32 4294967295, %s1018_s24   ;;  %p785_p0 = scmp.ge.s32.totalorder %s1018_s24, 1  ;;  %s1018_s24 = sphi %s1062_s24, %s17_s24  }
   0x2   : > { %p236_p1 = scmp.lt.s32.totalorder %s1018_s24, 3 }
   0x4   : > { %p237_p2 = pnand %p785_p0, %p236_p1 }
   0x5   : > { %v982_v0 = vld [vmem:[%s1230_s3] sm:$0xff] (!%p237_p2)   ;;  %v1020_v1 = vmov (!%p237_p2), 0.0   ;;  %v983_v2 = vld [vmem:[%s1230_s3 + $0x8] sm:$0xff] (!%p237_p2)   ;;  %vm1021_vm0 = vmmov (!%p237_p2), 0   ;;  %p266_p3 = scmp.lt.s32.totalorder (!%p237_p2), %s781_s25, 1  ;;  %v984_v3 = vld [vmem:[%s1230_s3 + $0x10] sm:$0xff] (!%p237_p2)  }
   0x6   : > { %240 = sbr.rel (%p237_p2) target bundleno = 506 (0x1fa), region = 48  ;;  %891 = vmatprep.subr.bf16.mxu0 (!%p237_p2), %v1020_v1  ;;  %403 = vst [vmem:[#allocation2] sm:$0x3f] (!%p237_p2), %v1020_v1  ;;  %927 = vmatprep.subr.bf16.mxu1 (!%p237_p2), %v1020_v1  ;;  %v788_v4 = vld [vmem:[%s1228_s1] ss:$0 sm:$0xff] (!%p237_p2)  ;;  %v990_v9 = vld [vmem:[%s1233_s6 + $0x8] sm:$0xff] (!%p237_p2)  }
   0x7   : > { %892 = vmatpush3.bf16.msra.mxu0 (!%p237_p2), %v982_v0  ;;  %903 = vmatprep.mubr.msk.bf16.mxu0 (!%p237_p2), %vm1021_vm0, %v1020_v1  ;;  %v988_v5 = vld [vmem:[%s1233_s6] sm:$0xff] (!%p237_p2)   ;;  %v985_v10 = vld [vmem:[%s1230_s3 + $0x18] sm:$0xff] (!%p237_p2)   ;;  %v992_v12 = vld [vmem:[%s1233_s6 + $0x10] sm:$0xff] (!%p237_p2)   ;;  %vm342_vm1 = vcmask (!%p237_p2), 785408   ;;  %vm726_vm2 = vcmask (!%p237_p2), 257024  }
   0x8   : > { %893 = vmatprep.subr.bf16.mxu0 (!%p237_p2), %v1020_v1  ;;  %943 = vmatprep.mubr.msk.bf16.mxu1 (!%p237_p2), %vm1021_vm0, %v1020_v1  ;;  %v789_v7 = vld [vmem:[%s1229_s2] ss:$0 sm:$0xff] (!%p237_p2)  ;;  %v994_v15 = vld [vmem:[%s1233_s6 + $0x18] sm:$0xff] (!%p237_p2)   ;;  %v987_v16 = vld [vmem:[%s1230_s3 + $0x28] sm:$0xff] (!%p237_p2)  }
   0x9   : > { %928 = vmatpush3.bf16.msra.mxu1 (!%p237_p2), %v988_v5  ;;  %v986_v13 = vld [vmem:[%s1230_s3 + $0x20] sm:$0xff] (!%p237_p2)   ;;  %v991_v19 = vld [vmem:[%s1233_s6 + $0x48] sm:$0xff] (!%p237_p2)   ;;  %v993_v20 = vld [vmem:[%s1233_s6 + $0x50] sm:$0xff] (!%p237_p2)  }
   0xa   : > { %929 = vmatprep.subr.bf16.mxu1 (!%p237_p2), %v1020_v1  ;;  %v989_v17 = vld [vmem:[%s1233_s6 + $0x40] sm:$0xff] (!%p237_p2)   ;;  %v995_v21 = vld [vmem:[%s1233_s6 + $0x58] sm:$0xff] (!%p237_p2)   ;;  %v998_v24 = vld [vmem:[%s1233_s6 + $0x28] sm:$0xff] (!%p237_p2)  }
   0xb   : > { %894 = vmatpush3.bf16.msra.mxu0 (!%p237_p2), %v983_v2  ;;  %v996_v22 = vld [vmem:[%s1233_s6 + $0x20] sm:$0xff] (!%p237_p2)   ;;  %v999_v25 = vld [vmem:[%s1233_s6 + $0x68] sm:$0xff] (!%p237_p2)   ;;  %v1000_v26 = vld [vmem:[%s1233_s6 + $0x30] sm:$0xff] (!%p237_p2)  }
   0xc   : > { %895 = vmatprep.subr.bf16.mxu0 (!%p237_p2), %v1020_v1  ;;  %v997_v23 = vld [vmem:[%s1233_s6 + $0x60] sm:$0xff] (!%p237_p2)   ;;  %v1001_v27 = vld [vmem:[%s1233_s6 + $0x70] sm:$0xff] (!%p237_p2)   ;;  %v1002_v28 = vld [vmem:[%s1233_s6 + $0x38] sm:$0xff] (!%p237_p2)  }
   0xd   : > { %s1236_s25 = smov (!%p266_p3, %s781_s25), 1  ;;  %930 = vmatpush3.bf16.msra.mxu1 %v990_v9  ;;  %v1003_v29 = vld [vmem:[%s1233_s6 + $0x78] sm:$0xff]   ;;  %v797_v30 = vld [vmem:[%s1231_s4] ss:$0 sm:$0xff]  ;;  %v1005_v44 = vld [vmem:[%s1233_s6 + $0x88] sm:$0xff]  }
   0xe   : > { %s786_s9 = sshll.u32 %s1236_s25, 2  ;;  %931 = vmatprep.subr.bf16.mxu1 %v1020_v1  ;;  %v798_v32 = vld [vmem:[%s1232_s5] ss:$0 sm:$0xff]  ;;  %v1006_v45 = vld [vmem:[%s1233_s6 + $0x90] sm:$0xff]   ;;  %v1007_v46 = vld [vmem:[%s1233_s6 + $0x98] sm:$0xff]  }
   0xf   : > { %s269_s16 = scalar_lea.vmem %s1227_s0, %s786_s9  ;;  %896 = vmatpush3.bf16.msra.mxu0 %v984_v3  ;;  %v1004_v41 = vld [vmem:[%s1233_s6 + $0x80] sm:$0xff]   ;;  %v1009_v48 = vld [vmem:[%s1233_s6 + $0xa8] sm:$0xff]   ;;  %v1010_v49 = vld [vmem:[%s1233_s6 + $0xb0] sm:$0xff]   ;;  %s273_s17 = scalar_lea.vmem %s1234_s7, %s786_s9 }
  0x10   : > { %v275_v6 = vld [vmem:[%s269_s16] sm:$0xf]  ;;  %897 = vmatprep.subr.bf16.mxu0 %v1020_v1  ;;  %v1011_v50 = vld [vmem:[%s1233_s6 + $0xb8] sm:$0xff]  }
  0x11   : > { %v283_v8 = vmul.f32 %v788_v4, %v275_v6  ;;  %932 = vmatpush3.bf16.msra.mxu1 %v992_v12  ;;  %v1008_v47 = vld [vmem:[%s1233_s6 + $0xa0] sm:$0xff]  }
  0x12   : > { %933 = vmatprep.subr.bf16.mxu1 %v1020_v1 }
  0x13   : > { %v291_v11 = vadd.f32 %v789_v7, %v283_v8  ;;  %898 = vmatpush3.bf16.msra.mxu0 %v985_v10 }
  0x14   : > { %899 = vmatprep.subr.bf16.mxu0 %v1020_v1 }
  0x15   : > { %v292_v14 = vmax.f32 %v291_v11, 0.0  ;;  %934 = vmatpush3.bf16.msra.mxu1 %v994_v15 }
  0x16   : > { %935 = vmatprep.subr.bf16.mxu1 %v1020_v1 }
  0x17   : > { %900 = vmatpush3.bf16.msra.mxu0 %v986_v13  ;;  %v293_v18 = vpack.c.bf16 %v292_v14, %v292_v14 }
  0x18   : > { %901 = vmatprep.subr.bf16.mxu0 %v1020_v1 }
  0x19   : > { %936 = vmatpush3.bf16.msra.mxu1 %v996_v22 }
  0x1a   : > { %937 = vmatprep.subr.bf16.mxu1 %v1020_v1 }
  0x1b   : > { %902 = vmatpush3.bf16.msra.mxu0 %v987_v16 }
  0x1c   : > { %907 = vmatprep.subr.bf16.mxu0 %v1020_v1 }
  0x1d   : > { %938 = vmatpush3.bf16.msra.mxu1 %v998_v24 }
  0x1e   : > { %904 = vmatmul.mubr.msk.bf16.vlgmr.msra.gmra.mrb[0].mxu0 %vm342_vm1, %v293_v18  ;;  %939 = vmatprep.subr.bf16.mxu1 %v1020_v1 }
  0x1f   : > { %908 = vmatpush3.bf16.msra.mxu0 %v989_v17  ;;  %923 = vmatprep.mubr.msk.bf16.mxu0 %vm1021_vm0, %v1020_v1 }
  0x20   : > { %909 = vmatprep.subr.bf16.mxu0 %v1020_v1 }
  0x21   : > { %940 = vmatpush3.bf16.msra.mxu1 %v1000_v26 }
  0x22   : > { %941 = vmatprep.subr.bf16.mxu1 %v1020_v1 }
  0x23   : > { %910 = vmatpush3.bf16.msra.mxu0 %v991_v19 }
  0x24   : > { %911 = vmatprep.subr.bf16.mxu0 %v1020_v1 }
  0x25   : > { %942 = vmatpush3.bf16.msra.mxu1 %v1002_v28 }
  0x26   : > { %947 = vmatprep.subr.bf16.mxu1 %v1020_v1 }
  0x27   : > { %912 = vmatpush3.bf16.msra.mxu0 %v993_v20 }
  0x28   : > { %913 = vmatprep.subr.bf16.mxu0 %v1020_v1 }
  0x2b   : > { %914 = vmatpush3.bf16.msra.mxu0 %v995_v21 }
  0x2c   : > { %915 = vmatprep.subr.bf16.mxu0 %v1020_v1 }
  0x2f   : > { %916 = vmatpush3.bf16.msra.mxu0 %v997_v23 }
  0x30   : > { %917 = vmatprep.subr.bf16.mxu0 %v1020_v1 }
  0x33   : > { %918 = vmatpush3.bf16.msra.mxu0 %v999_v25 }
  0x34   : > { %919 = vmatprep.subr.bf16.mxu0 %v1020_v1 }
  0x37   : > { %920 = vmatpush3.bf16.msra.mxu0 %v1001_v27 }
  0x38   : > { %921 = vmatprep.subr.bf16.mxu0 %v1020_v1 }
  0x3b   : > { %922 = vmatpush3.bf16.msra.mxu0 %v1003_v29 }
  0xf1   : > { %v380_v31 = vpop.f32.mrb[0].mxu0 }
  0xf2   : > { %v393_v33 = vmul.f32 %v797_v30, %v380_v31  ;;  %v905_v34 = vpop.f32.mrb[1].mxu0 }
  0xf3   : > { %v383_v35 = vpop.f32.mrb[2].mxu0 }
  0xf4   : > { %v401_v36 = vadd.f32 %v798_v32, %v393_v33  ;;  %v906_v37 = vpop.f32.mrb[3].mxu0 }
  0xf6   : > { %v402_v38 = vmax.f32 %v401_v36, 0.0 }
  0xf8   : > { %404 = vst [vmem:[#allocation2 + $0x1] sm:$0xf] %v402_v38 }
  0xff   : > { %v423_v39 = vld [vmem:[#allocation2 + $0x1] sm:$0xf] }
 0x100   : > { %v405_v40 = vld [vmem:[#allocation2] sm:$0xf]  ;;  %v424_v42 = vpack.c.bf16 %v423_v39, %v423_v39 }
 0x101   : > { %v406_v43 = vpack.c.bf16 %v405_v40, %v405_v40  ;;  %v618_v51 = vld [vmem:[#allocation2 + $0x2] sm:$0xf] }
 0x102   : > { %924 = vmatmul.mubr.bf16.vlgmr.msra.gmra.mrb[4].mxu0 %v424_v42  ;;  %v619_v52 = vpack.c.bf16 %v618_v51, %v618_v51 }
 0x103   : > { %944 = vmatmul.mubr.bf16.vlgmr.msra.gmra.mrb[0].mxu1 %v406_v43 }
 0x104   : > { %948 = vmatpush3.bf16.msra.mxu1 %v1004_v41  ;;  %963 = vmatprep.mubr.msk.bf16.mxu1 %vm1021_vm0, %v1020_v1 }
 0x105   : > { %949 = vmatprep.subr.bf16.mxu1 %v1020_v1 }
 0x108   : > { %950 = vmatpush3.bf16.msra.mxu1 %v1005_v44 }
 0x109   : > { %951 = vmatprep.subr.bf16.mxu1 %v1020_v1 }
 0x10c   : > { %952 = vmatpush3.bf16.msra.mxu1 %v1006_v45 }
 0x10d   : > { %953 = vmatprep.subr.bf16.mxu1 %v1020_v1 }
 0x110   : > { %954 = vmatpush3.bf16.msra.mxu1 %v1007_v46 }
 0x111   : > { %955 = vmatprep.subr.bf16.mxu1 %v1020_v1 }
 0x114   : > { %956 = vmatpush3.bf16.msra.mxu1 %v1008_v47 }
 0x115   : > { %957 = vmatprep.subr.bf16.mxu1 %v1020_v1 }
 0x118   : > { %958 = vmatpush3.bf16.msra.mxu1 %v1009_v48 }
 0x119   : > { %959 = vmatprep.subr.bf16.mxu1 %v1020_v1 }
 0x11c   : > { %960 = vmatpush3.bf16.msra.mxu1 %v1010_v49 }
 0x11d   : > { %961 = vmatprep.subr.bf16.mxu1 %v1020_v1 }
 0x120   : > { %962 = vmatpush3.bf16.msra.mxu1 %v1011_v50 }
 0x123   : > { %964 = vmatmul.mubr.bf16.vlgmr.msra.gmra.mrb[0].mxu1 %v619_v52 }
 0x1d5   : > { %v524_v53 = vpop.f32.mrb[4].mxu0 }
 0x1d6   : > { %v925_v54 = vpop.f32.mrb[5].mxu0 }
 0x1d7   : > { %v527_v55 = vpop.f32.mrb[6].mxu0 }
 0x1d8   : > { %v926_v56 = vpop.f32.mrb[7].mxu0 }
 0x1f6   : > { %v719_v57 = vpop.f32.mrb[0].mxu1 }
 0x1f7   : > { %v967_v58 = vadd.f32 %v719_v57, %v524_v53  ;;  %v965_v59 = vpop.f32.mrb[1].mxu1 }
 0x1f8   : > { %v722_v60 = vpop.f32.mrb[2].mxu1 }
 0x1f9   : > { %727 = vst.msk [vmem:[%s273_s17] sm:$0xf] %vm726_vm2, %v967_v58  ;;  %v966_v61 = vpop.f32.mrb[3].mxu1 }
 0x1fa PF: > { %s17_s24 = sadd.s32 1, %s1018_s24  }
 0x1fb   : > { %p14_p4 = scmp.ge.s32.totalorder %s17_s24, 4  }
 0x1fd   :  { %16 = sbr.rel (!%p14_p4) target bundleno = 1 (0x1), region = 80 }

// kernel: densenet_forward.19
= control target key start
LH: loop header
LB: loop body
LE: loop exit
PB: predicated region body
PF: predicated region fallthrough
CT: control target
= control target key end

     0   :  { %s583_s15 = smov 0   ;;  %s658_s0 = inlined_call_operand.vmem [shape: f32[2,2,256], index: 0, kind: input, shape index: {}]   ;;  %s659_s1 = inlined_call_operand.vmem [shape: f32[1,256], index: 1, kind: input, shape index: {}]   ;;  %s660_s2 = inlined_call_operand.vmem [shape: f32[1,256], index: 2, kind: input, shape index: {}]   ;;  %s661_s3 = inlined_call_operand.vmem [shape: bf16[256,32], index: 3, kind: input, shape index: {}]   ;;  %s662_s4 = inlined_call_operand.vmem [shape: f32[2,2,32], index: 4, kind: output, shape index: {}]  }
   0x1 LB: > { %s475_s16 = sadd.s32 4294967295, %s555_s15   ;;  %p479_p0 = scmp.ge.s32.totalorder %s555_s15, 1  ;;  %s555_s15 = sphi %s583_s15, %s14_s15  }
   0x2   : > { %p162_p1 = scmp.lt.s32.totalorder %s555_s15, 3 }
   0x4   : > { %p163_p2 = pnand %p479_p0, %p162_p1 }
   0x5   : > { %v533_v0 = vld [vmem:[%s661_s3 + $0x40] sm:$0xff] (!%p163_p2)   ;;  %v535_v2 = vld [vmem:[%s661_s3 + $0x48] sm:$0xff] (!%p163_p2)   ;;  %v537_v4 = vld [vmem:[%s661_s3 + $0x50] sm:$0xff] (!%p163_p2)   ;;  %v200_v5 = vlaneseq (!%p163_p2)  ;;  %p187_p3 = scmp.lt.s32.totalorder (!%p163_p2), %s475_s16, 1  ;;  %v557_v18 = vmov (!%p163_p2), 1983009808  }
   0x6   : > { %166 = sbr.rel (%p163_p2) target bundleno = 254 (0xfe), region = 36  ;;  %v534_v1 = vld [vmem:[%s661_s3] sm:$0xff] (!%p163_p2)   ;;  %502 = vmatprep.subr.bf16.mxu0 (!%p163_p2), %v533_v0  ;;  %v536_v3 = vld [vmem:[%s661_s3 + $0x8] sm:$0xff] (!%p163_p2)   ;;  %v538_v6 = vld [vmem:[%s661_s3 + $0x10] sm:$0xff] (!%p163_p2)   ;;  %v210_v19 = vunpack.c.l.s4 (!%p163_p2), %v557_v18  ;;  %vm420_vm0 = vcmask (!%p163_p2), 254976  }
   0x7   : > { %503 = vmatpush3.bf16.msra.mxu0 (!%p163_p2), %v534_v1  ;;  %v539_v7 = vld [vmem:[%s661_s3 + $0x58] sm:$0xff] (!%p163_p2)   ;;  %v201_v8 = vshrl.u32 (!%p163_p2), %v200_v5, 7  ;;  %v541_v10 = vld [vmem:[%s661_s3 + $0x60] sm:$0xff] (!%p163_p2)   ;;  %v543_v14 = vld [vmem:[%s661_s3 + $0x68] sm:$0xff] (!%p163_p2)  }
   0x8   : > { %504 = vmatprep.subr.bf16.mxu0 (!%p163_p2), %v535_v2  ;;  %v540_v9 = vld [vmem:[%s661_s3 + $0x18] sm:$0xff] (!%p163_p2)   ;;  %v542_v13 = vld [vmem:[%s661_s3 + $0x20] sm:$0xff] (!%p163_p2)   ;;  %v544_v23 = vld [vmem:[%s661_s3 + $0x28] sm:$0xff] (!%p163_p2)   ;;  %v211_v25 = vunpack.c.0.s8 (!%p163_p2), %v210_v19 }
   0x9   : > { %v202_v11 = vsub.s32 (!%p163_p2), 0, %v201_v8  ;;  %v206_v12 = vsub.s32 (!%p163_p2), 1, %v201_v8  ;;  %v198_v15 = vld [vmem:[%s659_s1] sm:$0x3] (!%p163_p2)  ;;  %v545_v26 = vld [vmem:[%s661_s3 + $0x70] sm:$0xff] (!%p163_p2)   ;;  %v547_v33 = vld [vmem:[%s661_s3 + $0x78] sm:$0xff] (!%p163_p2)  }
   0xa   : > { %v218_v20 = vld [vmem:[%s660_s2] sm:$0x3] (!%p163_p2)  ;;  %v214_v28 = vsub.s32 (!%p163_p2), %v211_v25, %v201_v8  ;;  %v546_v30 = vld [vmem:[%s661_s3 + $0x30] sm:$0xff] (!%p163_p2)   ;;  %v548_v35 = vld [vmem:[%s661_s3 + $0x38] sm:$0xff] (!%p163_p2)  }
   0xb   : > { %505 = vmatpush3.bf16.msra.mxu0 (!%p163_p2), %v536_v3  ;;  %v203_v16 = vrot.slane (!%p163_p2), %v198_v15, %v202_v11  ;;  %v207_v17 = vrot.slane (!%p163_p2), %v198_v15, %v206_v12  ;;  %v223_v21 = vrot.slane (!%p163_p2), %v218_v20, %v202_v11  ;;  %v227_v22 = vrot.slane (!%p163_p2), %v218_v20, %v206_v12 }
   0xc   : > { %506 = vmatprep.subr.bf16.mxu0 (!%p163_p2), %v537_v4 }
   0xd   : > { %s664_s16 = smov (!%p187_p3, %s475_s16), 1  ;;  %v208_v24 = vcombine.low %v203_v16, %v207_v17  ;;  %v228_v27 = vcombine.low %v223_v21, %v227_v22 }
   0xe   : > { %s501_s13 = sshll.u32 %s664_s16, 2  ;;  %s482_s7 = sshll.u32 %s664_s16, 1 }
   0xf   : > { %507 = vmatpush3.bf16.msra.mxu0 %v538_v6  ;;  %s191_s24 = scalar_lea.vmem %s658_s0, %s501_s13  ;;  %v215_v31 = vrot.slane %v208_v24, %v214_v28  ;;  %v235_v32 = vrot.slane %v228_v27, %v214_v28  ;;  %s195_s10 = scalar_lea.vmem %s662_s4, %s482_s7 }
  0x10   : > { %508 = vmatprep.subr.bf16.mxu0 %v539_v7  ;;  %v197_v29 = vld [vmem:[%s191_s24] sm:$0xf] }
  0x11   : > { %v217_v34 = vmul.f32 %v215_v31, %v197_v29 }
  0x13   : > { %509 = vmatpush3.bf16.msra.mxu0 %v540_v9  ;;  %v237_v36 = vadd.f32 %v235_v32, %v217_v34 }
  0x14   : > { %510 = vmatprep.subr.bf16.mxu0 %v541_v10 }
  0x15   : > { %v238_v37 = vmax.f32 %v237_v36, 0.0 }
  0x17   : > { %511 = vmatpush3.bf16.msra.mxu0 %v542_v13  ;;  %v246_v38 = vrot.slane %v238_v37, %v214_v28 }
  0x18   : > { %512 = vmatprep.subr.bf16.mxu0 %v543_v14 }
  0x19   : > { %v247_v39 = vcombine.high %v246_v38, %v246_v38  ;;  %v250_v40 = vpack.c.bf16 %v246_v38, %v246_v38 }
  0x1b   : > { %513 = vmatpush3.bf16.msra.mxu0 %v544_v23  ;;  %v251_v41 = vpack.c.bf16 %v247_v39, %v247_v39 }
  0x1c   : > { %514 = vmatprep.subr.bf16.mxu0 %v545_v26 }
  0x1d   : > { %412 = vmatprep.mubr.bf16.mxu0 %v251_v41 }
  0x1f   : > { %515 = vmatpush3.bf16.msra.mxu0 %v546_v30 }
  0x20   : > { %516 = vmatprep.subr.bf16.mxu0 %v547_v33 }
  0x23   : > { %517 = vmatpush3.bf16.msra.mxu0 %v548_v35 }
  0x26   : > { %413 = vmatmul.mubr.bf16.vlgmr.msra.gmra.mrb[0].mxu0 %v250_v40 }
  0xf9   : > { %v518_v42 = vpop.f32.mrb[0].mxu0 }
  0xfa   : > { %v519_v43 = vpop.f32.mrb[1].mxu0 }
  0xfb   : > { %v520_v44 = vadd.f32 %v519_v43, %v518_v42  ;;  %v521_v45 = vpop.f32.mrb[2].mxu0 }
  0xfc   : > { %v522_v46 = vpop.f32.mrb[3].mxu0 }
  0xfd   : > { %421 = vst.msk [vmem:[%s195_s10] sm:$0x3] %vm420_vm0, %v520_v44 }
  0xfe PF: > { %s14_s15 = sadd.s32 1, %s555_s15  }
  0xff   : > { %p11_p4 = scmp.ge.s32.totalorder %s14_s15, 4  }
 0x101   :  { %13 = sbr.rel (!%p11_p4) target bundleno = 1 (0x1), region = 66 }

// kernel: densenet_forward.20
= control target key start
LH: loop header
LB: loop body
LE: loop exit
PB: predicated region body
PF: predicated region fallthrough
CT: control target
= control target key end

     0   :  { %s853_s24 = smov 0   ;;  %s957_s0 = inlined_call_operand.vmem [shape: f32[2,2,32], index: 0, kind: input, shape index: {}]   ;;  %s958_s1 = inlined_call_operand.vmem [shape: f32[1,32], index: 1, kind: input, shape index: {}]   ;;  %s959_s2 = inlined_call_operand.vmem [shape: f32[1,32], index: 2, kind: input, shape index: {}]   ;;  %s960_s3 = inlined_call_operand.vmem [shape: bf16[32,64], index: 3, kind: input, shape index: {}]   ;;  %s961_s4 = inlined_call_operand.vmem [shape: f32[1,64], index: 4, kind: input, shape index: {}]   ;;  %s962_s5 = inlined_call_operand.vmem [shape: f32[1,64], index: 5, kind: input, shape index: {}]   ;;  %s963_s6 = inlined_call_operand.vmem [shape: bf16[3,64,16], index: 6, kind: input, shape index: {}]   ;;  %s964_s7 = inlined_call_operand.vmem [shape: f32[2,2,16], index: 7, kind: output, shape index: {}]  }
   0x1 LB: > { %s665_s25 = sadd.s32 4294967295, %s809_s24   ;;  %p669_p0 = scmp.ge.s32.totalorder %s809_s24, 1  ;;  %s809_s24 = sphi %s853_s24, %s17_s24  }
   0x2   : > { %p236_p1 = scmp.lt.s32.totalorder %s809_s24, 3 }
   0x4   : > { %p237_p2 = pnand %p669_p0, %p236_p1 }
   0x5   : > { %v789_v0 = vld [vmem:[%s960_s3] sm:$0xff] (!%p237_p2)   ;;  %v811_v1 = vmov (!%p237_p2), 0.0   ;;  %v790_v2 = vld [vmem:[%s960_s3 + $0x8] sm:$0xff] (!%p237_p2)   ;;  %vm812_vm0 = vmmov (!%p237_p2), 0   ;;  %p266_p3 = scmp.lt.s32.totalorder (!%p237_p2), %s665_s25, 1  ;;  %vm310_vm1 = vcmask (!%p237_p2), 261120  }
   0x6   : > { %240 = sbr.rel (%p237_p2) target bundleno = 485 (0x1e5), region = 48  ;;  %730 = vmatprep.subr.bf16.mxu0 (!%p237_p2), %v811_v1  ;;  %750 = vmatprep.subr.bf16.mxu1 (!%p237_p2), %v811_v1  ;;  %v672_v3 = vld [vmem:[%s958_s1] ss:$0 sm:$0xff] (!%p237_p2)  ;;  %v793_v12 = vld [vmem:[%s963_s6 + $0x8] sm:$0xff] (!%p237_p2)   ;;  %vm371_vm2 = vcmask (!%p237_p2), 519168   ;;  %v795_v14 = vld [vmem:[%s963_s6 + $0x10] sm:$0xff] (!%p237_p2)  }
   0x7   : > { %731 = vmatpush3.bf16.msra.mxu0 (!%p237_p2), %v789_v0  ;;  %734 = vmatprep.mubr.msk.bf16.mxu0 (!%p237_p2), %vm812_vm0, %v811_v1  ;;  %v673_v4 = vld [vmem:[%s959_s2] ss:$0 sm:$0xff] (!%p237_p2)  ;;  %v794_v13 = vld [vmem:[%s963_s6 + $0x28] sm:$0xff] (!%p237_p2)   ;;  %372 = vst.msk [vmem:[#allocation2] sm:$0xf] (!%p237_p2), %vm371_vm2, %v811_v1  ;;  %v796_v15 = vld [vmem:[%s963_s6 + $0x30] sm:$0xff] (!%p237_p2)  }
   0x8   : > { %732 = vmatprep.subr.bf16.mxu0 (!%p237_p2), %v811_v1  ;;  %758 = vmatprep.mubr.msk.bf16.mxu1 (!%p237_p2), %vm812_vm0, %v811_v1  ;;  %v791_v10 = vld [vmem:[%s963_s6] sm:$0xff] (!%p237_p2)   ;;  %v797_v16 = vld [vmem:[%s963_s6 + $0x18] sm:$0xff] (!%p237_p2)   ;;  %vm373_vm3 = vcmask (!%p237_p2), 517120   ;;  %vm420_vm4 = vcmask (!%p237_p2), 523264   ;;  %v800_v32 = vld [vmem:[%s963_s6 + $0x48] sm:$0xff] (!%p237_p2)   ;;  %vm610_vm5 = vcmask (!%p237_p2), 123904  }
   0x9   : > { %v792_v11 = vld [vmem:[%s963_s6 + $0x20] sm:$0xff] (!%p237_p2)   ;;  %751 = vmatpush3.bf16.msra.mxu1 (!%p237_p2), %v791_v10  ;;  %v798_v17 = vld [vmem:[%s963_s6 + $0x38] sm:$0xff] (!%p237_p2)   ;;  %v801_v33 = vld [vmem:[%s963_s6 + $0x50] sm:$0xff] (!%p237_p2)  }
   0xa   : > { %752 = vmatprep.subr.bf16.mxu1 (!%p237_p2), %v811_v1  ;;  %v677_v18 = vld [vmem:[%s961_s4] ss:$0 sm:$0xff] (!%p237_p2)  ;;  %v802_v34 = vld [vmem:[%s963_s6 + $0x58] sm:$0xff] (!%p237_p2)  }
   0xb   : > { %733 = vmatpush3.bf16.msra.mxu0 (!%p237_p2), %v790_v2  ;;  %v678_v20 = vld [vmem:[%s962_s5] ss:$0 sm:$0xff] (!%p237_p2) }
   0xc   : > { %738 = vmatprep.subr.bf16.mxu0 (!%p237_p2), %v811_v1  ;;  %v799_v29 = vld [vmem:[%s963_s6 + $0x40] sm:$0xff] (!%p237_p2)  }
   0xd   : > { %s966_s25 = smov (!%p266_p3, %s665_s25), 1  ;;  %753 = vmatpush3.bf16.msra.mxu1 %v793_v12 }
   0xe   : > { %s670_s9 = sshll.u32 %s966_s25, 1  ;;  %754 = vmatprep.subr.bf16.mxu1 %v811_v1 }
   0xf   : > { %s269_s14 = scalar_lea.vmem %s957_s0, %s670_s9  ;;  %s273_s27 = scalar_lea.vmem %s964_s7, %s670_s9 }
  0x10   : > { %v275_v5 = vld [vmem:[%s269_s14] sm:$0x3] }
  0x11   : > { %v283_v6 = vmul.f32 %v672_v3, %v275_v5  ;;  %755 = vmatpush3.bf16.msra.mxu1 %v795_v14 }
  0x12   : > { %756 = vmatprep.subr.bf16.mxu1 %v811_v1 }
  0x13   : > { %v291_v7 = vadd.f32 %v673_v4, %v283_v6 }
  0x15   : > { %v292_v8 = vmax.f32 %v291_v7, 0.0  ;;  %757 = vmatpush3.bf16.msra.mxu1 %v797_v16 }
  0x16   : > { %762 = vmatprep.subr.bf16.mxu1 %v811_v1 }
  0x17   : > { %v293_v9 = vpack.c.bf16 %v292_v8, %v292_v8 }
  0x19   : > { %735 = vmatmul.mubr.msk.bf16.vlgmr.msra.gmra.mrb[0].mxu0 %vm310_vm1, %v293_v9 }
  0x1a   : > { %746 = vmatprep.mubr.msk.bf16.mxu0 %vm812_vm0, %v811_v1  ;;  %739 = vmatpush3.bf16.msra.mxu0 %v792_v11 }
  0x1b   : > { %740 = vmatprep.subr.bf16.mxu0 %v811_v1 }
  0x1e   : > { %741 = vmatpush3.bf16.msra.mxu0 %v794_v13 }
  0x1f   : > { %742 = vmatprep.subr.bf16.mxu0 %v811_v1 }
  0x22   : > { %743 = vmatpush3.bf16.msra.mxu0 %v796_v15 }
  0x23   : > { %744 = vmatprep.subr.bf16.mxu0 %v811_v1 }
  0x26   : > { %745 = vmatpush3.bf16.msra.mxu0 %v798_v17 }
  0xec   : > { %v348_v19 = vpop.f32.mrb[0].mxu0 }
  0xed   : > { %v361_v21 = vmul.f32 %v677_v18, %v348_v19  ;;  %v736_v22 = vpop.f32.mrb[1].mxu0 }
  0xee   : > { %v351_v23 = vpop.f32.mrb[2].mxu0 }
  0xef   : > { %v369_v24 = vadd.f32 %v678_v20, %v361_v21  ;;  %v737_v25 = vpop.f32.mrb[3].mxu0 }
  0xf1   : > { %v370_v26 = vmax.f32 %v369_v24, 0.0 }
  0xf3   : > { %374 = vst.msk [vmem:[#allocation2 + $0x1] sm:$0x3] %vm373_vm3, %v370_v26 }
  0xfa   : > { %v385_v27 = vld [vmem:[#allocation2 + $0x1] sm:$0x3] }
  0xfb   : > { %v375_v28 = vld [vmem:[#allocation2] sm:$0x3]  ;;  %v386_v30 = vpack.c.bf16 %v385_v27, %v385_v27  ;;  %v531_v35 = vld [vmem:[#allocation2 + $0x2] sm:$0x3] }
  0xfc   : > { %v376_v31 = vpack.c.bf16 %v375_v28, %v375_v28  ;;  %v532_v36 = vpack.c.bf16 %v531_v35, %v531_v35 }
  0xfd   : > { %747 = vmatmul.mubr.msk.bf16.vlgmr.msra.gmra.mrb[4].mxu0 %vm420_vm4, %v386_v30 }
  0xfe   : > { %759 = vmatmul.mubr.msk.bf16.vlgmr.msra.gmra.mrb[0].mxu1 %vm420_vm4, %v376_v31 }
  0xff   : > { %763 = vmatpush3.bf16.msra.mxu1 %v799_v29  ;;  %770 = vmatprep.mubr.msk.bf16.mxu1 %vm812_vm0, %v811_v1 }
 0x100   : > { %764 = vmatprep.subr.bf16.mxu1 %v811_v1 }
 0x103   : > { %765 = vmatpush3.bf16.msra.mxu1 %v800_v32 }
 0x104   : > { %766 = vmatprep.subr.bf16.mxu1 %v811_v1 }
 0x107   : > { %767 = vmatpush3.bf16.msra.mxu1 %v801_v33 }
 0x108   : > { %768 = vmatprep.subr.bf16.mxu1 %v811_v1 }
 0x10b   : > { %769 = vmatpush3.bf16.msra.mxu1 %v802_v34 }
 0x10e   : > { %771 = vmatmul.mubr.msk.bf16.vlgmr.msra.gmra.mrb[0].mxu1 %vm420_vm4, %v532_v36 }
 0x1d0   : > { %v458_v37 = vpop.f32.mrb[4].mxu0 }
 0x1d1   : > { %v748_v38 = vpop.f32.mrb[5].mxu0 }
 0x1d2   : > { %v461_v39 = vpop.f32.mrb[6].mxu0 }
 0x1d3   : > { %v749_v40 = vpop.f32.mrb[7].mxu0 }
 0x1e1   : > { %v603_v41 = vpop.f32.mrb[0].mxu1 }
 0x1e2   : > { %v774_v42 = vadd.f32 %v603_v41, %v458_v37  ;;  %v772_v43 = vpop.f32.mrb[1].mxu1 }
 0x1e3   : > { %v606_v44 = vpop.f32.mrb[2].mxu1 }
 0x1e4   : > { %611 = vst.msk [vmem:[%s273_s27] sm:$0x3] %vm610_vm5, %v774_v42  ;;  %v773_v45 = vpop.f32.mrb[3].mxu1 }
 0x1e5 PF: > { %s17_s24 = sadd.s32 1, %s809_s24  }
 0x1e6   : > { %p14_p4 = scmp.ge.s32.totalorder %s17_s24, 4  }
 0x1e8   :  { %16 = sbr.rel (!%p14_p4) target bundleno = 1 (0x1), region = 80 }

// kernel: densenet_forward.22
= control target key start
LH: loop header
LB: loop body
LE: loop exit
PB: predicated region body
PF: predicated region fallthrough
CT: control target
= control target key end

     0   :  { %s443_s15 = smov 0   ;;  %s494_s0 = inlined_call_operand.vmem [shape: f32[2,1,128], index: 0, kind: input, shape index: {}]   ;;  %s495_s1 = inlined_call_operand.vmem [shape: f32[1,128], index: 1, kind: input, shape index: {}]   ;;  %s496_s2 = inlined_call_operand.vmem [shape: f32[1,128], index: 2, kind: input, shape index: {}]   ;;  %s497_s3 = inlined_call_operand.vmem [shape: bf16[128,16], index: 3, kind: input, shape index: {}]   ;;  %s498_s4 = inlined_call_operand.vmem [shape: f32[2,1,16], index: 4, kind: output, shape index: {}]  }
   0x1 LB: > { %s346_s16 = sadd.s32 4294967295, %s414_s15   ;;  %p350_p0 = scmp.ge.s32.totalorder %s414_s15, 1  ;;  %s414_s15 = sphi %s443_s15, %s14_s15  }
   0x2   : > { %p160_p1 = scmp.lt.s32.totalorder %s414_s15, 3 }
   0x4   : > { %p161_p2 = pnand %p350_p0, %p160_p1 }
   0x5   : > { %v400_v0 = vld [vmem:[%s497_s3] sm:$0xff] (!%p161_p2)   ;;  %v416_v1 = vmov (!%p161_p2), 0.0   ;;  %v401_v2 = vld [vmem:[%s497_s3 + $0x8] sm:$0xff] (!%p161_p2)   ;;  %vm417_vm0 = vmmov (!%p161_p2), 0   ;;  %p182_p3 = scmp.lt.s32.totalorder (!%p161_p2), %s346_s16, 1  ;;  %v402_v3 = vld [vmem:[%s497_s3 + $0x10] sm:$0xff] (!%p161_p2)  }
   0x6   : > { %164 = sbr.rel (%p161_p2) target bundleno = 253 (0xfd), region = 36  ;;  %370 = vmatprep.subr.bf16.mxu0 (!%p161_p2), %v416_v1  ;;  %386 = vmatprep.mubr.msk.bf16.mxu0 (!%p161_p2), %vm417_vm0, %v416_v1  ;;  %v403_v4 = vld [vmem:[%s497_s3 + $0x18] sm:$0xff] (!%p161_p2)   ;;  %v404_v5 = vld [vmem:[%s497_s3 + $0x20] sm:$0xff] (!%p161_p2)   ;;  %v405_v9 = vld [vmem:[%s497_s3 + $0x28] sm:$0xff] (!%p161_p2)   ;;  %vm300_vm1 = vcmask (!%p161_p2), 122880  }
   0x7   : > { %371 = vmatpush3.bf16.msra.mxu0 (!%p161_p2), %v400_v0  ;;  %v190_v7 = vld [vmem:[%s495_s1] sm:$0x1] (!%p161_p2)  ;;  %v406_v12 = vld [vmem:[%s497_s3 + $0x30] sm:$0xff] (!%p161_p2)   ;;  %v407_v14 = vld [vmem:[%s497_s3 + $0x38] sm:$0xff] (!%p161_p2)  }
   0x8   : > { %372 = vmatprep.subr.bf16.mxu0 (!%p161_p2), %v416_v1  ;;  %v192_v10 = vld [vmem:[%s496_s2] sm:$0x1] (!%p161_p2) }
   0xb   : > { %373 = vmatpush3.bf16.msra.mxu0 (!%p161_p2), %v401_v2 }
   0xc   : > { %374 = vmatprep.subr.bf16.mxu0 (!%p161_p2), %v416_v1 }
   0xd   : > { %s500_s16 = smov (!%p182_p3, %s346_s16), 1 }
   0xe   : > { %s184_s27 = scalar_lea.vmem %s494_s0, %s500_s16  ;;  %s187_s18 = scalar_lea.vmem %s498_s4, %s500_s16 }
   0xf   : > { %375 = vmatpush3.bf16.msra.mxu0 %v402_v3  ;;  %v189_v6 = vld [vmem:[%s184_s27] sm:$0x1] }
  0x10   : > { %376 = vmatprep.subr.bf16.mxu0 %v416_v1  ;;  %v191_v8 = vmul.f32 %v190_v7, %v189_v6 }
  0x12   : > { %v193_v11 = vadd.f32 %v192_v10, %v191_v8 }
  0x13   : > { %377 = vmatpush3.bf16.msra.mxu0 %v403_v4 }
  0x14   : > { %378 = vmatprep.subr.bf16.mxu0 %v416_v1  ;;  %v194_v13 = vmax.f32 %v193_v11, 0.0 }
  0x16   : > { %v195_v15 = vpack.c.bf16 %v194_v13, %v194_v13 }
  0x17   : > { %379 = vmatpush3.bf16.msra.mxu0 %v404_v5 }
  0x18   : > { %380 = vmatprep.subr.bf16.mxu0 %v416_v1 }
  0x1b   : > { %381 = vmatpush3.bf16.msra.mxu0 %v405_v9 }
  0x1c   : > { %382 = vmatprep.subr.bf16.mxu0 %v416_v1 }
  0x1f   : > { %383 = vmatpush3.bf16.msra.mxu0 %v406_v12 }
  0x20   : > { %384 = vmatprep.subr.bf16.mxu0 %v416_v1 }
  0x23   : > { %385 = vmatpush3.bf16.msra.mxu0 %v407_v14 }
  0x26   : > { %387 = vmatmul.mubr.bf16.vlgmr.msra.gmra.mrb[0].mxu0 %v195_v15 }
  0xf9   : > { %v294_v16 = vpop.f32.mrb[0].mxu0 }
  0xfa   : > { %301 = vst.msk [vmem:[%s187_s18] sm:$0x1] %vm300_vm1, %v294_v16  ;;  %v388_v17 = vpop.f32.mrb[1].mxu0 }
  0xfb   : > { %v297_v18 = vpop.f32.mrb[2].mxu0 }
  0xfc   : > { %v389_v19 = vpop.f32.mrb[3].mxu0 }
  0xfd PF: > { %s14_s15 = sadd.s32 1, %s414_s15  }
  0xfe   : > { %p11_p4 = scmp.ge.s32.totalorder %s14_s15, 4  }
 0x100   :  { %13 = sbr.rel (!%p11_p4) target bundleno = 1 (0x1), region = 66 }

// kernel: densenet_forward.21
= control target key start
LH: loop header
LB: loop body
LE: loop exit
PB: predicated region body
PF: predicated region fallthrough
CT: control target
= control target key end

     0   :  { %s866_s24 = smov 0   ;;  %s974_s0 = inlined_call_operand.vmem [shape: f32[2,2,48], index: 0, kind: input, shape index: {}]   ;;  %s975_s1 = inlined_call_operand.vmem [shape: f32[1,48], index: 1, kind: input, shape index: {}]   ;;  %s976_s2 = inlined_call_operand.vmem [shape: f32[1,48], index: 2, kind: input, shape index: {}]   ;;  %s977_s3 = inlined_call_operand.vmem [shape: bf16[48,64], index: 3, kind: input, shape index: {}]   ;;  %s978_s4 = inlined_call_operand.vmem [shape: f32[1,64], index: 4, kind: input, shape index: {}]   ;;  %s979_s5 = inlined_call_operand.vmem [shape: f32[1,64], index: 5, kind: input, shape index: {}]   ;;  %s980_s6 = inlined_call_operand.vmem [shape: bf16[3,64,16], index: 6, kind: input, shape index: {}]   ;;  %s981_s7 = inlined_call_operand.vmem [shape: f32[2,2,16], index: 7, kind: output, shape index: {}]  }
   0x1 LB: > { %s673_s25 = sadd.s32 4294967295, %s822_s24   ;;  %p677_p0 = scmp.ge.s32.totalorder %s822_s24, 1  ;;  %s822_s24 = sphi %s866_s24, %s17_s24  }
   0x2   : > { %p236_p1 = scmp.lt.s32.totalorder %s822_s24, 3 }
   0x4   : > { %p237_p2 = pnand %p677_p0, %p236_p1 }
   0x5   : > { %v801_v0 = vld [vmem:[%s977_s3] sm:$0xff] (!%p237_p2)   ;;  %v824_v1 = vmov (!%p237_p2), 0.0   ;;  %v802_v2 = vld [vmem:[%s977_s3 + $0x8] sm:$0xff] (!%p237_p2)   ;;  %vm825_vm0 = vmmov (!%p237_p2), 0   ;;  %p266_p3 = scmp.lt.s32.totalorder (!%p237_p2), %s673_s25, 1  ;;  %v803_v4 = vld [vmem:[%s977_s3 + $0x10] sm:$0xff] (!%p237_p2)  }
   0x6   : > { %240 = sbr.rel (%p237_p2) target bundleno = 485 (0x1e5), region = 48  ;;  %740 = vmatprep.subr.bf16.mxu0 (!%p237_p2), %v824_v1  ;;  %762 = vmatprep.subr.bf16.mxu1 (!%p237_p2), %v824_v1  ;;  %v680_v3 = vld [vmem:[%s975_s1] ss:$0 sm:$0xff] (!%p237_p2)  ;;  %vm318_vm1 = vcmask (!%p237_p2), 392192   ;;  %v806_v13 = vld [vmem:[%s980_s6 + $0x8] sm:$0xff] (!%p237_p2)   ;;  %vm379_vm2 = vcmask (!%p237_p2), 519168  }
   0x7   : > { %741 = vmatpush3.bf16.msra.mxu0 (!%p237_p2), %v801_v0  ;;  %746 = vmatprep.mubr.msk.bf16.mxu0 (!%p237_p2), %vm825_vm0, %v824_v1  ;;  %v681_v5 = vld [vmem:[%s976_s2] ss:$0 sm:$0xff] (!%p237_p2)  ;;  %v807_v14 = vld [vmem:[%s980_s6 + $0x28] sm:$0xff] (!%p237_p2)   ;;  %380 = vst.msk [vmem:[#allocation2] sm:$0xf] (!%p237_p2), %vm379_vm2, %v824_v1  ;;  %v808_v15 = vld [vmem:[%s980_s6 + $0x10] sm:$0xff] (!%p237_p2)  }
   0x8   : > { %742 = vmatprep.subr.bf16.mxu0 (!%p237_p2), %v824_v1  ;;  %770 = vmatprep.mubr.msk.bf16.mxu1 (!%p237_p2), %vm825_vm0, %v824_v1  ;;  %v804_v11 = vld [vmem:[%s980_s6] sm:$0xff] (!%p237_p2)   ;;  %v809_v16 = vld [vmem:[%s980_s6 + $0x30] sm:$0xff] (!%p237_p2)   ;;  %v810_v17 = vld [vmem:[%s980_s6 + $0x18] sm:$0xff] (!%p237_p2)   ;;  %vm381_vm3 = vcmask (!%p237_p2), 517120   ;;  %vm428_vm4 = vcmask (!%p237_p2), 523264   ;;  %vm618_vm5 = vcmask (!%p237_p2), 123904  }
   0x9   : > { %v805_v12 = vld [vmem:[%s980_s6 + $0x20] sm:$0xff] (!%p237_p2)   ;;  %763 = vmatpush3.bf16.msra.mxu1 (!%p237_p2), %v804_v11  ;;  %v811_v18 = vld [vmem:[%s980_s6 + $0x38] sm:$0xff] (!%p237_p2)   ;;  %v813_v33 = vld [vmem:[%s980_s6 + $0x48] sm:$0xff] (!%p237_p2)  }
   0xa   : > { %764 = vmatprep.subr.bf16.mxu1 (!%p237_p2), %v824_v1  ;;  %v686_v19 = vld [vmem:[%s978_s4] ss:$0 sm:$0xff] (!%p237_p2)  ;;  %v814_v34 = vld [vmem:[%s980_s6 + $0x50] sm:$0xff] (!%p237_p2)   ;;  %v815_v35 = vld [vmem:[%s980_s6 + $0x58] sm:$0xff] (!%p237_p2)  }
   0xb   : > { %743 = vmatpush3.bf16.msra.mxu0 (!%p237_p2), %v802_v2  ;;  %v687_v21 = vld [vmem:[%s979_s5] ss:$0 sm:$0xff] (!%p237_p2) }
   0xc   : > { %744 = vmatprep.subr.bf16.mxu0 (!%p237_p2), %v824_v1  ;;  %v812_v30 = vld [vmem:[%s980_s6 + $0x40] sm:$0xff] (!%p237_p2)  }
   0xd   : > { %s983_s25 = smov (!%p266_p3, %s673_s25), 1  ;;  %765 = vmatpush3.bf16.msra.mxu1 %v806_v13 }
   0xe   : > { %s678_s11 = sshll.u32 %s983_s25, 1  ;;  %766 = vmatprep.subr.bf16.mxu1 %v824_v1 }
   0xf   : > { %s269_s16 = scalar_lea.vmem %s974_s0, %s678_s11  ;;  %745 = vmatpush3.bf16.msra.mxu0 %v803_v4  ;;  %s273_s29 = scalar_lea.vmem %s981_s7, %s678_s11 }
  0x10   : > { %v275_v6 = vld [vmem:[%s269_s16] sm:$0x3]  ;;  %750 = vmatprep.subr.bf16.mxu0 %v824_v1 }
  0x11   : > { %v283_v7 = vmul.f32 %v680_v3, %v275_v6  ;;  %767 = vmatpush3.bf16.msra.mxu1 %v808_v15 }
  0x12   : > { %768 = vmatprep.subr.bf16.mxu1 %v824_v1 }
  0x13   : > { %v291_v8 = vadd.f32 %v681_v5, %v283_v7 }
  0x15   : > { %v292_v9 = vmax.f32 %v291_v8, 0.0  ;;  %769 = vmatpush3.bf16.msra.mxu1 %v810_v17 }
  0x16   : > { %774 = vmatprep.subr.bf16.mxu1 %v824_v1 }
  0x17   : > { %v293_v10 = vpack.c.bf16 %v292_v9, %v292_v9 }
  0x19   : > { %747 = vmatmul.mubr.msk.bf16.vlgmr.msra.gmra.mrb[0].mxu0 %vm318_vm1, %v293_v10 }
  0x1a   : > { %758 = vmatprep.mubr.msk.bf16.mxu0 %vm825_vm0, %v824_v1  ;;  %751 = vmatpush3.bf16.msra.mxu0 %v805_v12 }
  0x1b   : > { %752 = vmatprep.subr.bf16.mxu0 %v824_v1 }
  0x1e   : > { %753 = vmatpush3.bf16.msra.mxu0 %v807_v14 }
  0x1f   : > { %754 = vmatprep.subr.bf16.mxu0 %v824_v1 }
  0x22   : > { %755 = vmatpush3.bf16.msra.mxu0 %v809_v16 }
  0x23   : > { %756 = vmatprep.subr.bf16.mxu0 %v824_v1 }
  0x26   : > { %757 = vmatpush3.bf16.msra.mxu0 %v811_v18 }
  0xec   : > { %v356_v20 = vpop.f32.mrb[0].mxu0 }
  0xed   : > { %v369_v22 = vmul.f32 %v686_v19, %v356_v20  ;;  %v748_v23 = vpop.f32.mrb[1].mxu0 }
  0xee   : > { %v359_v24 = vpop.f32.mrb[2].mxu0 }
  0xef   : > { %v377_v25 = vadd.f32 %v687_v21, %v369_v22  ;;  %v749_v26 = vpop.f32.mrb[3].mxu0 }
  0xf1   : > { %v378_v27 = vmax.f32 %v377_v25, 0.0 }
  0xf3   : > { %382 = vst.msk [vmem:[#allocation2 + $0x1] sm:$0x3] %vm381_vm3, %v378_v27 }
  0xfa   : > { %v393_v28 = vld [vmem:[#allocation2 + $0x1] sm:$0x3] }
  0xfb   : > { %v383_v29 = vld [vmem:[#allocation2] sm:$0x3]  ;;  %v394_v31 = vpack.c.bf16 %v393_v28, %v393_v28  ;;  %v539_v36 = vld [vmem:[#allocation2 + $0x2] sm:$0x3] }
  0xfc   : > { %v384_v32 = vpack.c.bf16 %v383_v29, %v383_v29  ;;  %v540_v37 = vpack.c.bf16 %v539_v36, %v539_v36 }
  0xfd   : > { %759 = vmatmul.mubr.msk.bf16.vlgmr.msra.gmra.mrb[4].mxu0 %vm428_vm4, %v394_v31 }
  0xfe   : > { %771 = vmatmul.mubr.msk.bf16.vlgmr.msra.gmra.mrb[0].mxu1 %vm428_vm4, %v384_v32 }
  0xff   : > { %775 = vmatpush3.bf16.msra.mxu1 %v812_v30  ;;  %782 = vmatprep.mubr.msk.bf16.mxu1 %vm825_vm0, %v824_v1 }
 0x100   : > { %776 = vmatprep.subr.bf16.mxu1 %v824_v1 }
 0x103   : > { %777 = vmatpush3.bf16.msra.mxu1 %v813_v33 }
 0x104   : > { %778 = vmatprep.subr.bf16.mxu1 %v824_v1 }
 0x107   : > { %779 = vmatpush3.bf16.msra.mxu1 %v814_v34 }
 0x108   : > { %780 = vmatprep.subr.bf16.mxu1 %v824_v1 }
 0x10b   : > { %781 = vmatpush3.bf16.msra.mxu1 %v815_v35 }
 0x10e   : > { %783 = vmatmul.mubr.msk.bf16.vlgmr.msra.gmra.mrb[0].mxu1 %vm428_vm4, %v540_v37 }
 0x1d0   : > { %v466_v38 = vpop.f32.mrb[4].mxu0 }
 0x1d1   : > { %v760_v39 = vpop.f32.mrb[5].mxu0 }
 0x1d2   : > { %v469_v40 = vpop.f32.mrb[6].mxu0 }
 0x1d3   : > { %v761_v41 = vpop.f32.mrb[7].mxu0 }
 0x1e1   : > { %v611_v42 = vpop.f32.mrb[0].mxu1 }
 0x1e2   : > { %v786_v43 = vadd.f32 %v611_v42, %v466_v38  ;;  %v784_v44 = vpop.f32.mrb[1].mxu1 }
 0x1e3   : > { %v614_v45 = vpop.f32.mrb[2].mxu1 }
 0x1e4   : > { %619 = vst.msk [vmem:[%s273_s29] sm:$0x3] %vm618_vm5, %v786_v43  ;;  %v785_v46 = vpop.f32.mrb[3].mxu1 }
 0x1e5 PF: > { %s17_s24 = sadd.s32 1, %s822_s24  }
 0x1e6   : > { %p14_p4 = scmp.ge.s32.totalorder %s17_s24, 4  }
 0x1e8   :  { %16 = sbr.rel (!%p14_p4) target bundleno = 1 (0x1), region = 80 }

// kernel: densenet_forward.23
= control target key start
LH: loop header
LB: loop body
LE: loop exit
PB: predicated region body
PF: predicated region fallthrough
CT: control target
= control target key end

     0   :  { %s710_s24 = smov 0   ;;  %s771_s0 = inlined_call_operand.vmem [shape: f32[2,1,16], index: 0, kind: input, shape index: {}]   ;;  %s772_s1 = inlined_call_operand.vmem [shape: f32[1,16], index: 1, kind: input, shape index: {}]   ;;  %s773_s2 = inlined_call_operand.vmem [shape: f32[1,16], index: 2, kind: input, shape index: {}]   ;;  %s774_s3 = inlined_call_operand.vmem [shape: bf16[16,32], index: 3, kind: input, shape index: {}]   ;;  %s775_s4 = inlined_call_operand.vmem [shape: f32[1,32], index: 4, kind: input, shape index: {}]   ;;  %s776_s5 = inlined_call_operand.vmem [shape: f32[1,32], index: 5, kind: input, shape index: {}]   ;;  %s777_s6 = inlined_call_operand.vmem [shape: bf16[3,32,8], index: 6, kind: input, shape index: {}]   ;;  %s778_s7 = inlined_call_operand.vmem [shape: f32[2,1,8], index: 7, kind: output, shape index: {}]  }
   0x1 LB: > { %s571_s25 = sadd.s32 4294967295, %s666_s24   ;;  %p575_p0 = scmp.ge.s32.totalorder %s666_s24, 1  ;;  %s666_s24 = sphi %s710_s24, %s17_s24  }
   0x2   : > { %p235_p1 = scmp.lt.s32.totalorder %s666_s24, 3 }
   0x4   : > { %p236_p2 = pnand %p575_p0, %p235_p1 }
   0x5   : > { %v653_v0 = vld [vmem:[%s774_s3] sm:$0xff] (!%p236_p2)   ;;  %v668_v1 = vmov (!%p236_p2), 0.0   ;;  %p263_p3 = scmp.lt.s32.totalorder (!%p236_p2), %s571_s25, 1  ;;  %vm669_vm0 = vmmov (!%p236_p2), 0   ;;  %v655_v4 = vld [vmem:[%s777_s6 + $0x8] sm:$0xff] (!%p236_p2)   ;;  %vm334_vm1 = vcmask (!%p236_p2), 256000  }
   0x6   : > { %239 = sbr.rel (%p236_p2) target bundleno = 467 (0x1d3), region = 48  ;;  %608 = vmatprep.subr.bf16.mxu0 (!%p236_p2), %v668_v1  ;;  %622 = vmatprep.subr.bf16.mxu1 (!%p236_p2), %v668_v1  ;;  %v271_v2 = vld [vmem:[%s772_s1] sm:$0x1] (!%p236_p2)  ;;  %335 = vst.msk [vmem:[#allocation2] sm:$0x7] (!%p236_p2), %vm334_vm1, %v668_v1  ;;  %vm285_vm2 = vcmask (!%p236_p2), 130048  }
   0x7   : > { %609 = vmatpush3.bf16.msra.mxu0 (!%p236_p2), %v653_v0  ;;  %610 = vmatprep.mubr.msk.bf16.mxu0 (!%p236_p2), %vm669_vm0, %v668_v1  ;;  %v654_v3 = vld [vmem:[%s777_s6] sm:$0xff] (!%p236_p2)   ;;  %vm363_vm3 = vcmask (!%p236_p2), 261120   ;;  %v657_v14 = vld [vmem:[%s777_s6 + $0x28] sm:$0xff] (!%p236_p2)   ;;  %v658_v17 = vld [vmem:[%s777_s6 + $0x10] sm:$0xff] (!%p236_p2)   ;;  %vm336_vm4 = vcmask (!%p236_p2), 253952   ;;  %vm525_vm5 = vcmask (!%p236_p2), 57344  }
   0x8   : > { %626 = vmatprep.mubr.msk.bf16.mxu1 (!%p236_p2), %vm669_vm0, %v668_v1  ;;  %614 = vmatprep.subr.bf16.mxu0 (!%p236_p2), %v668_v1  ;;  %v273_v6 = vld [vmem:[%s773_s2] sm:$0x1] (!%p236_p2)  ;;  %v659_v18 = vld [vmem:[%s777_s6 + $0x18] sm:$0xff] (!%p236_p2)  }
   0x9   : > { %623 = vmatpush3.bf16.msra.mxu1 (!%p236_p2), %v654_v3  ;;  %v656_v11 = vld [vmem:[%s777_s6 + $0x20] sm:$0xff] (!%p236_p2)  }
   0xa   : > { %624 = vmatprep.subr.bf16.mxu1 (!%p236_p2), %v668_v1  ;;  %v329_v19 = vld [vmem:[%s775_s4] sm:$0x1] (!%p236_p2) }
   0xb   : > { %v331_v21 = vld [vmem:[%s776_s5] sm:$0x1] (!%p236_p2) }
   0xd   : > { %s780_s25 = smov (!%p263_p3, %s571_s25), 1  ;;  %625 = vmatpush3.bf16.msra.mxu1 %v655_v4  ;;  %v338_v10 = vld [vmem:[#allocation2] sm:$0x1]  ;;  %v462_v15 = vld [vmem:[#allocation2 + $0x2] sm:$0x1] }
   0xe   : > { %s265_s13 = scalar_lea.vmem %s771_s0, %s780_s25  ;;  %630 = vmatprep.subr.bf16.mxu1 %v668_v1  ;;  %v339_v13 = vpack.c.bf16 %v338_v10, %v338_v10  ;;  %v463_v16 = vpack.c.bf16 %v462_v15, %v462_v15  ;;  %s268_s9 = scalar_lea.vmem %s778_s7, %s780_s25 }
   0xf   : > { %v270_v5 = vld [vmem:[%s265_s13] sm:$0x1] }
  0x10   : > { %v272_v7 = vmul.f32 %v271_v2, %v270_v5  ;;  %627 = vmatmul.mubr.msk.bf16.vlgmr.msra.gmra.mrb[0].mxu1 %vm363_vm3, %v339_v13 }
  0x11   : > { %631 = vmatpush3.bf16.msra.mxu1 %v656_v11  ;;  %634 = vmatprep.mubr.msk.bf16.mxu1 %vm669_vm0, %v668_v1 }
  0x12   : > { %v274_v8 = vadd.f32 %v273_v6, %v272_v7  ;;  %632 = vmatprep.subr.bf16.mxu1 %v668_v1 }
  0x14   : > { %v275_v9 = vmax.f32 %v274_v8, 0.0 }
  0x15   : > { %633 = vmatpush3.bf16.msra.mxu1 %v657_v14 }
  0x16   : > { %v276_v12 = vpack.c.bf16 %v275_v9, %v275_v9 }
  0x18   : > { %611 = vmatmul.mubr.msk.bf16.vlgmr.msra.gmra.mrb[0].mxu0 %vm285_vm2, %v276_v12 }
  0x19   : > { %618 = vmatprep.mubr.msk.bf16.mxu0 %vm669_vm0, %v668_v1  ;;  %615 = vmatpush3.bf16.msra.mxu0 %v658_v17 }
  0x1a   : > { %616 = vmatprep.subr.bf16.mxu0 %v668_v1 }
  0x1c   : > { %635 = vmatmul.mubr.msk.bf16.vlgmr.msra.gmra.mrb[0].mxu1 %vm363_vm3, %v463_v16 }
  0x1d   : > { %617 = vmatpush3.bf16.msra.mxu0 %v659_v18 }
  0xeb   : > { %v323_v20 = vpop.f32.mrb[0].mxu0 }
  0xec   : > { %v330_v22 = vmul.f32 %v329_v19, %v323_v20  ;;  %v612_v23 = vpop.f32.mrb[1].mxu0 }
  0xed   : > { %v326_v24 = vpop.f32.mrb[2].mxu0 }
  0xee   : > { %v332_v25 = vadd.f32 %v331_v21, %v330_v22  ;;  %v613_v26 = vpop.f32.mrb[3].mxu0 }
  0xef   : > { %v518_v30 = vpop.f32.mrb[0].mxu1 }
  0xf0   : > { %v333_v27 = vmax.f32 %v332_v25, 0.0  ;;  %v636_v31 = vpop.f32.mrb[1].mxu1 }
  0xf1   : > { %v521_v32 = vpop.f32.mrb[2].mxu1 }
  0xf2   : > { %337 = vst.msk [vmem:[#allocation2 + $0x1] sm:$0x1] %vm336_vm4, %v333_v27  ;;  %v637_v33 = vpop.f32.mrb[3].mxu1 }
  0xf9   : > { %v344_v28 = vld [vmem:[#allocation2 + $0x1] sm:$0x1] }
  0xfa   : > { %v345_v29 = vpack.c.bf16 %v344_v28, %v344_v28 }
  0xfc   : > { %619 = vmatmul.mubr.msk.bf16.vlgmr.msra.gmra.mrb[4].mxu0 %vm363_vm3, %v345_v29 }
 0x1cf   : > { %v401_v34 = vpop.f32.mrb[4].mxu0 }
 0x1d0   : > { %v638_v35 = vadd.f32 %v518_v30, %v401_v34  ;;  %v620_v36 = vpop.f32.mrb[5].mxu0 }
 0x1d1   : > { %v404_v37 = vpop.f32.mrb[6].mxu0 }
 0x1d2   : > { %526 = vst.msk [vmem:[%s268_s9] sm:$0x1] %vm525_vm5, %v638_v35  ;;  %v621_v38 = vpop.f32.mrb[7].mxu0 }
 0x1d3 PF: > { %s17_s24 = sadd.s32 1, %s666_s24  }
 0x1d4   : > { %p14_p4 = scmp.ge.s32.totalorder %s17_s24, 4  }
 0x1d6   :  { %16 = sbr.rel (!%p14_p4) target bundleno = 1 (0x1), region = 80 }

// kernel: densenet_forward.24
= control target key start
LH: loop header
LB: loop body
LE: loop exit
PB: predicated region body
PF: predicated region fallthrough
CT: control target
= control target key end

     0   :  { %s723_s24 = smov 0   ;;  %s787_s0 = inlined_call_operand.vmem [shape: f32[2,1,24], index: 0, kind: input, shape index: {}]   ;;  %s788_s1 = inlined_call_operand.vmem [shape: f32[1,24], index: 1, kind: input, shape index: {}]   ;;  %s789_s2 = inlined_call_operand.vmem [shape: f32[1,24], index: 2, kind: input, shape index: {}]   ;;  %s790_s3 = inlined_call_operand.vmem [shape: bf16[24,32], index: 3, kind: input, shape index: {}]   ;;  %s791_s4 = inlined_call_operand.vmem [shape: f32[1,32], index: 4, kind: input, shape index: {}]   ;;  %s792_s5 = inlined_call_operand.vmem [shape: f32[1,32], index: 5, kind: input, shape index: {}]   ;;  %s793_s6 = inlined_call_operand.vmem [shape: bf16[3,32,8], index: 6, kind: input, shape index: {}]   ;;  %s794_s7 = inlined_call_operand.vmem [shape: f32[2,1,8], index: 7, kind: output, shape index: {}]  }
   0x1 LB: > { %s579_s25 = sadd.s32 4294967295, %s679_s24   ;;  %p583_p0 = scmp.ge.s32.totalorder %s679_s24, 1  ;;  %s679_s24 = sphi %s723_s24, %s17_s24  }
   0x2   : > { %p235_p1 = scmp.lt.s32.totalorder %s679_s24, 3 }
   0x4   : > { %p236_p2 = pnand %p583_p0, %p235_p1 }
   0x5   : > { %v665_v0 = vld [vmem:[%s790_s3] sm:$0xff] (!%p236_p2)   ;;  %v681_v1 = vmov (!%p236_p2), 0.0   ;;  %v666_v2 = vld [vmem:[%s790_s3 + $0x8] ss:$0 sps:$4 sm:$0xff] (!%p236_p2)   ;;  %vm293_vm0 = vcmask (!%p236_p2), 1043456   ;;  %vm682_vm1 = vmmov (!%p236_p2), 0  }
   0x6   : > { %239 = sbr.rel (%p236_p2) target bundleno = 467 (0x1d3), region = 48  ;;  %618 = vmatprep.subr.bf16.mxu0 (!%p236_p2), %v681_v1  ;;  %634 = vmatprep.subr.bf16.mxu1 (!%p236_p2), %v681_v1  ;;  %p263_p3 = scmp.lt.s32.totalorder (!%p236_p2), %s579_s25, 1  ;;  %v295_v3 = vsel (!%p236_p2), %vm293_vm0, %v666_v2, 0  ;;  %v271_v4 = vld [vmem:[%s788_s1] sm:$0x1] (!%p236_p2)  ;;  %v668_v6 = vld [vmem:[%s793_s6 + $0x8] sm:$0xff] (!%p236_p2)  }
   0x7   : > { %619 = vmatpush3.bf16.msra.mxu0 (!%p236_p2), %v665_v0  ;;  %622 = vmatprep.mubr.msk.bf16.mxu0 (!%p236_p2), %vm682_vm1, %v681_v1  ;;  %v667_v5 = vld [vmem:[%s793_s6] sm:$0xff] (!%p236_p2)   ;;  %vm342_vm2 = vcmask (!%p236_p2), 256000   ;;  %vm289_vm3 = vcmask (!%p236_p2), 195584   ;;  %vm371_vm4 = vcmask (!%p236_p2), 261120   ;;  %v670_v16 = vld [vmem:[%s793_s6 + $0x28] sm:$0xff] (!%p236_p2)   ;;  %v671_v19 = vld [vmem:[%s793_s6 + $0x10] sm:$0xff] (!%p236_p2)  }
   0x8   : > { %620 = vmatprep.subr.bf16.mxu0 (!%p236_p2), %v681_v1  ;;  %638 = vmatprep.mubr.msk.bf16.mxu1 (!%p236_p2), %vm682_vm1, %v681_v1  ;;  %343 = vst.msk [vmem:[#allocation2] sm:$0x7] (!%p236_p2), %vm342_vm2, %v681_v1  ;;  %v273_v8 = vld [vmem:[%s789_s2] sm:$0x1] (!%p236_p2)  ;;  %v672_v20 = vld [vmem:[%s793_s6 + $0x18] sm:$0xff] (!%p236_p2)   ;;  %vm344_vm5 = vcmask (!%p236_p2), 253952  }
   0x9   : > { %635 = vmatpush3.bf16.msra.mxu1 (!%p236_p2), %v667_v5  ;;  %v669_v13 = vld [vmem:[%s793_s6 + $0x20] sm:$0xff] (!%p236_p2)   ;;  %vm533_vm6 = vcmask (!%p236_p2), 57344  }
   0xa   : > { %636 = vmatprep.subr.bf16.mxu1 (!%p236_p2), %v681_v1  ;;  %v337_v21 = vld [vmem:[%s791_s4] sm:$0x1] (!%p236_p2) }
   0xb   : > { %621 = vmatpush3.bf16.msra.mxu0 (!%p236_p2), %v295_v3  ;;  %v339_v23 = vld [vmem:[%s792_s5] sm:$0x1] (!%p236_p2) }
   0xc   : > { %626 = vmatprep.subr.bf16.mxu0 (!%p236_p2), %v681_v1 }
   0xd   : > { %s796_s25 = smov (!%p263_p3, %s579_s25), 1  ;;  %637 = vmatpush3.bf16.msra.mxu1 %v668_v6 }
   0xe   : > { %s265_s15 = scalar_lea.vmem %s787_s0, %s796_s25  ;;  %642 = vmatprep.subr.bf16.mxu1 %v681_v1  ;;  %s268_s11 = scalar_lea.vmem %s794_s7, %s796_s25 }
   0xf   : > { %v270_v7 = vld [vmem:[%s265_s15] sm:$0x1]  ;;  %v470_v17 = vld [vmem:[#allocation2 + $0x2] sm:$0x1] }
  0x10   : > { %v272_v9 = vmul.f32 %v271_v4, %v270_v7  ;;  %v346_v12 = vld [vmem:[#allocation2] sm:$0x1]  ;;  %v471_v18 = vpack.c.bf16 %v470_v17, %v470_v17 }
  0x11   : > { %v347_v15 = vpack.c.bf16 %v346_v12, %v346_v12 }
  0x12   : > { %v274_v10 = vadd.f32 %v273_v8, %v272_v9 }
  0x13   : > { %639 = vmatmul.mubr.msk.bf16.vlgmr.msra.gmra.mrb[0].mxu1 %vm371_vm4, %v347_v15 }
  0x14   : > { %v275_v11 = vmax.f32 %v274_v10, 0.0  ;;  %643 = vmatpush3.bf16.msra.mxu1 %v669_v13  ;;  %646 = vmatprep.mubr.msk.bf16.mxu1 %vm682_vm1, %v681_v1 }
  0x15   : > { %644 = vmatprep.subr.bf16.mxu1 %v681_v1 }
  0x16   : > { %v276_v14 = vpack.c.bf16 %v275_v11, %v275_v11 }
  0x18   : > { %623 = vmatmul.mubr.msk.bf16.vlgmr.msra.gmra.mrb[0].mxu0 %vm289_vm3, %v276_v14  ;;  %645 = vmatpush3.bf16.msra.mxu1 %v670_v16 }
  0x19   : > { %630 = vmatprep.mubr.msk.bf16.mxu0 %vm682_vm1, %v681_v1  ;;  %627 = vmatpush3.bf16.msra.mxu0 %v671_v19 }
  0x1a   : > { %628 = vmatprep.subr.bf16.mxu0 %v681_v1 }
  0x1d   : > { %629 = vmatpush3.bf16.msra.mxu0 %v672_v20 }
  0x1f   : > { %647 = vmatmul.mubr.msk.bf16.vlgmr.msra.gmra.mrb[0].mxu1 %vm371_vm4, %v471_v18 }
  0xeb   : > { %v331_v22 = vpop.f32.mrb[0].mxu0 }
  0xec   : > { %v338_v24 = vmul.f32 %v337_v21, %v331_v22  ;;  %v624_v25 = vpop.f32.mrb[1].mxu0 }
  0xed   : > { %v334_v26 = vpop.f32.mrb[2].mxu0 }
  0xee   : > { %v340_v27 = vadd.f32 %v339_v23, %v338_v24  ;;  %v625_v28 = vpop.f32.mrb[3].mxu0 }
  0xf0   : > { %v341_v29 = vmax.f32 %v340_v27, 0.0 }
  0xf2   : > { %345 = vst.msk [vmem:[#allocation2 + $0x1] sm:$0x1] %vm344_vm5, %v341_v29  ;;  %v526_v32 = vpop.f32.mrb[0].mxu1 }
  0xf3   : > { %v648_v33 = vpop.f32.mrb[1].mxu1 }
  0xf4   : > { %v529_v34 = vpop.f32.mrb[2].mxu1 }
  0xf5   : > { %v649_v35 = vpop.f32.mrb[3].mxu1 }
  0xf9   : > { %v352_v30 = vld [vmem:[#allocation2 + $0x1] sm:$0x1] }
  0xfa   : > { %v353_v31 = vpack.c.bf16 %v352_v30, %v352_v30 }
  0xfc   : > { %631 = vmatmul.mubr.msk.bf16.vlgmr.msra.gmra.mrb[4].mxu0 %vm371_vm4, %v353_v31 }
 0x1cf   : > { %v409_v36 = vpop.f32.mrb[4].mxu0 }
 0x1d0   : > { %v650_v37 = vadd.f32 %v526_v32, %v409_v36  ;;  %v632_v38 = vpop.f32.mrb[5].mxu0 }
 0x1d1   : > { %v412_v39 = vpop.f32.mrb[6].mxu0 }
 0x1d2   : > { %534 = vst.msk [vmem:[%s268_s11] sm:$0x1] %vm533_vm6, %v650_v37  ;;  %v633_v40 = vpop.f32.mrb[7].mxu0 }
 0x1d3 PF: > { %s17_s24 = sadd.s32 1, %s679_s24  }
 0x1d4   : > { %p14_p4 = scmp.ge.s32.totalorder %s17_s24, 4  }
 0x1d6   :  { %16 = sbr.rel (!%p14_p4) target bundleno = 1 (0x1), region = 80 }

// kernel: densenet_forward.25
= control target key start
LH: loop header
LB: loop body
LE: loop exit
PB: predicated region body
PF: predicated region fallthrough
CT: control target
= control target key end

     0   :  { %v170_v1 = vmov 0.0   ;;  %vm171_vm0 = vmmov 0   ;;  %s233_s0 = inlined_call_operand.vmem [shape: f32[2,32], index: 0, kind: input, shape index: {}]   ;;  %s234_s1 = inlined_call_operand.vmem [shape: f32[1,32], index: 1, kind: input, shape index: {}]   ;;  %s235_s2 = inlined_call_operand.vmem [shape: f32[1,32], index: 2, kind: input, shape index: {}]   ;;  %s236_s3 = inlined_call_operand.vmem [shape: bf16[32,5], index: 3, kind: input, shape index: {}]   ;;  %s237_s4 = inlined_call_operand.vmem [shape: f32[1,5], index: 4, kind: input, shape index: {}]   ;;  %s238_s5 = inlined_call_operand.hbm [shape: f32[2,5], index: 5, kind: output, shape index: {}]  }
   0x1   :  { %v144_v0 = vld [vmem:[%s236_s3] sm:$0xff]   ;;  %133 = vmatprep.subr.bf16.mxu0 %v170_v1  ;;  %v145_v2 = vld [vmem:[%s236_s3 + $0x8] sm:$0xff]   ;;  %137 = vmatprep.mubr.msk.bf16.mxu0 %vm171_vm0, %v170_v1 }
   0x2   :  { %134 = vmatpush3.bf16.msra.mxu0 %v144_v0  ;;  %v22_v3 = vld [vmem:[%s233_s0] sm:$0x3] }
   0x3   :  { %v124_v4 = vld [vmem:[%s234_s1] ss:$0 sm:$0xff]  ;;  %135 = vmatprep.subr.bf16.mxu0 %v170_v1 }
   0x4   :  { %v125_v5 = vld [vmem:[%s235_s2] ss:$0 sm:$0xff]  ;;  %v30_v6 = vmul.f32 %v124_v4, %v22_v3 }
   0x5   :  { %10 = vsyncpa [#allocation3], 0  ;;  %vm64_vm1 = vcmask 261120   ;;  %v126_v10 = vld [vmem:[%s237_s4] ss:$0 sm:$0xff]  ;;  %s172_s0 = smov [#allocation2]  }
   0x6   :  { %v38_v7 = vadd.f32 %v125_v5, %v30_v6  ;;  %136 = vmatpush3.bf16.msra.mxu0 %v145_v2  ;;  %s116_s29 = sshll.u32 %s172_s0, 4  ;;  %vm108_vm2 = vcmask 33792   ;;  %s117_s29 = int_to_ptr.vmem [resolvable:$true] %s116_s29 }
   0x7   :  { %s146_s1 = scalar_lea.vmem %s117_s29, 32  ;;  %p151_p1 = scmp.lt.s32.totalorder %s117_s29, %s117_s29 }
   0x8   :  { %v39_v8 = vmax.f32 %v38_v7, 0.0  ;;  %p147_p0 = scmp.ne.s32.totalorder %s117_s29, %s146_s1  ;;  %p152_p2 = scmp.lt.s32.totalorder %s146_s1, %s146_s1 }
   0xa   :  { %v40_v9 = vpack.c.bf16 %v39_v8, %v39_v8  ;;  %p153_p3 = por %p152_p2, %p151_p1 }
   0xc   :  { %138 = vmatmul.mubr.msk.bf16.vlgmr.msra.gmra.mrb[0].mxu0 %vm64_vm1, %v40_v9  ;;  %p154_p4 = pnand %p153_p3, %p147_p0 }
  0xdf   :  { %v102_v11 = vpop.f32.mrb[0].mxu0 }
  0xe0   :  { %v103_v12 = vadd.f32 %v126_v10, %v102_v11  ;;  %v139_v13 = vpop.f32.mrb[1].mxu0 }
  0xe1   :  { %v105_v14 = vpop.f32.mrb[2].mxu0 }
  0xe2   :  { %v140_v15 = vpop.f32.mrb[3].mxu0  ;;  %109 = vst.msk [vmem:[#allocation2] sm:$0x3] %vm108_vm2, %v103_v12 }
  0xe3   :  { %157 = shalt.err (!%p154_p4)
}
  0xe4   :  { %s158_s4 = scalar_lea.hbm %s238_s5, 32 }
  0xe5   :  { %p159_p5 = scmp.ne.s32.totalorder %s238_s5, %s158_s4  ;;  %p162_p6 = scmp.lt.u32.totalorder %s158_s4, %s238_s5 }
  0xe7   :  { %p164_p7 = pnand %p162_p6, %p159_p5 }
  0xe9   :  { %167 = shalt.err (!%p164_p7)
}
  0xea   :  { %119 = dma.vmem_to_hbm [thread:$0]  %s117_s29, 32, %s238_s5, [#allocation3]  }
  0xeb   :  { %168 = dma.done.wait [#allocation3], 32  }
  0xec   :  { %169 = vsyncadd [#allocation3], 4294967264 }
  0xed   :  { %123 = vsyncpa [#allocation3], 1 }

</bundles_post_ra>
